<compile_context>
chip_gen: v6e
topology: v6e:2x2x1
jax: 0.10.0
libtpu: 0.0.40
codegen_flags: <defaults>
</compile_context>

<pallas_src>
import jax
import jax.numpy as jnp
from jax import lax
from jax.experimental import pallas as pl
from jax.experimental.pallas import tpu as pltpu

_LANE = 128


def _triple(v):
    if isinstance(v, (tuple, list)):
        assert len(v) == 3
        return tuple(v)
    return (v, v, v)


def _sds(start, size, stride):
    # TODO(synk): stride>1 window slices may lower sub-optimally in Mosaic;
    # only the module's default stride=1 path is exercised here.
    return pl.ds(start, size) if stride == 1 else pl.ds(start, size, stride)


def _ce(v, i, j):
    """Compare-exchange slots i, j (element-wise min to i, max to j)."""
    a, b = v[i], v[j]
    v[i] = jnp.minimum(a, b)
    v[j] = jnp.maximum(a, b)


def _drop_min_max(pool):
    """Return `pool` minus one instance of its min and one of its max.

    Pair adjacent slots, min-chain the even slots into slot 0, max-chain the
    odd slots into slot p-1; CEs preserve the value multiset, so dropping
    slots 0 and p-1 removes exactly the two extremes.  The chain-final
    outputs that land in the dropped slots are dead and are not computed.
    """
    v = list(pool)
    p = len(v)
    assert p >= 3
    for i in range(0, p - 1, 2):          # pair adjacent slots
        _ce(v, i, i + 1)
    if p % 2 == 0:
        for i in range(2, p, 2):          # min of even slots -> slot 0
            if i == p - 2:                # last: slot 0's min output is dead
                v[i] = jnp.maximum(v[0], v[i])
            else:
                _ce(v, 0, i)
        for i in range(1, p - 2, 2):      # max of odd slots -> slot p-1
            if i == p - 3:                # last: slot p-1's max output is dead
                v[i] = jnp.minimum(v[i], v[p - 1])
            else:
                _ce(v, i, p - 1)
    else:
        for i in range(2, p - 1, 2):      # min of even slots -> slot 0
            _ce(v, 0, i)
        # fold unpaired leftover; slot 0's min output is dead (dropped)
        v[p - 1] = jnp.maximum(v[0], v[p - 1])
        for i in range(1, p - 1, 2):      # max of odd slots / leftover -> p-1
            if i == p - 2:
                v[i] = jnp.minimum(v[i], v[p - 1])
            else:
                _ce(v, i, p - 1)
    return v[1:p - 1]


def _lower_median(loaders):
    """Exact lower median of len(loaders) values via forgetful selection.

    Correctness (0-1 principle): with pool sizes p_t and T total drop phases,
    the schedule keeps p_t + t >= T + 3 for every phase t, which is exactly
    the condition under which no needed value can be over-dropped.
    """
    n = len(loaders)
    m = (n - 1) // 2                      # lower median, as in torch.median
    p0 = min(n, n - m + 1)                # smallest pool allowing safe drops
    pool = [loaders[i]() for i in range(p0)]
    nxt = p0
    d = 0                                 # pairs of extremes dropped so far
    while len(pool) >= 3:
        p = len(pool)
        assert (p - 1) + d >= (n - m), "unsafe min drop"
        assert (p - 1) + d >= (m + 1), "unsafe max drop"
        pool = _drop_min_max(pool)
        d += 1
        if nxt < n:                       # lazily pull in the next value
            pool.append(loaders[nxt]())
            nxt += 1
    assert nxt == n
    if len(pool) == 1:
        return pool[0]
    return jnp.minimum(pool[0], pool[1])  # even window size: lower median


def _make_kernel(k, s, Ho, wc, w_starts, use_pair):
    k0, k1, k2 = k
    _, s1, s2 = s                         # D stride handled by the BlockSpecs

    def kernel(*refs):
        x_refs = refs[:k0]                # k0 single-D-plane inputs
        o_ref = refs[k0]

        def load(dz, row, col):
            # (1, 1, wc, c_tile) slice of one input D-plane.
            return x_refs[dz][:, pl.ds(row, 1), _sds(col, wc, s2), :]

        def store_row(h_out, w0, val):
            o_ref[:, pl.ds(h_out, 1), pl.ds(w0, wc), :] = val.astype(o_ref.dtype)

        def median_row(h_out, w0):
            # Generic exact path: forgetful selection over the full window.
            h_in = h_out * s1
            col0 = w0 * s2
            loaders = [
                (lambda dz=dz, dy=dy, dx=dx: load(dz, h_in + dy, col0 + dx))
                for dz in range(k0) for dy in range(k1) for dx in range(k2)]
            store_row(h_out, w0, _lower_median(loaders))

        def pair_rows(h0, w0):
            # Shared-work path (k=(3,3,3), s1=1): output rows h0 and h0+1.
            col0 = w0 * s2
            # Stage 1: the 18 elements common to both windows (input rows
            # h0+1, h0+2, all dz/dx) reduced exactly to their middle 10.
            pool = [load(dz, h0 + 1 + rr, col0 + dx)
                    for dz in range(3) for rr in range(2) for dx in range(3)]
            for _ in range(4):
                pool = _drop_min_max(pool)
            mid10 = pool
            # Stage 2: per output row, lower median of (middle 10) + 9 unique.
            for j, urow in ((0, h0), (1, h0 + 3)):
                uniq = [(lambda dz=dz, dx=dx, r=urow: load(dz, r, col0 + dx))
                        for dz in range(3) for dx in range(3)]
                loaders = [(lambda v=v: v) for v in mid10] + uniq
                store_row(h0 + j, w0, _lower_median(loaders))

        if use_pair:
            n_pairs = Ho // 2
            if n_pairs <= 8:              # small static trip count: unroll
                for i in range(n_pairs):
                    for w0 in w_starts:
                        pair_rows(2 * i, w0)
            else:
                def body(i, c):
                    h0 = i * 2
                    for w0 in w_starts:
                        pair_rows(h0, w0)
                    return c
                lax.fori_loop(0, n_pairs, body, 0)
            if Ho % 2:
                # Peeled overlapping last pair (row Ho-2 recomputed; idempotent).
                for w0 in w_starts:
                    pair_rows(Ho - 2, w0)
        else:
            if Ho <= 8:
                for h in range(Ho):
                    for w0 in w_starts:
                        median_row(h, w0)
            else:
                def body(h, c):
                    for w0 in w_starts:
                        median_row(h, w0)
                    return c
                lax.fori_loop(0, Ho, body, 0)

    return kernel


def median_pool3d(x, kernel_size=(3, 3, 3), stride=1, padding=0):
    """Matches MedianPool3d.forward for NCDHW input x."""
    k = _triple(kernel_size)
    s = _triple(stride)
    # Reproduce `self.padding = _triple(padding) * 2` + F.pad semantics.
    pad6 = tuple(_triple(padding)) * 2
    x = jnp.pad(
        x,
        ((0, 0), (0, 0),
         (pad6[4], pad6[5]), (pad6[2], pad6[3]), (pad6[0], pad6[1])),
        mode="constant")

    N, C, Dp, Hp, Wp = x.shape
    Do = (Dp - k[0]) // s[0] + 1
    Ho = (Hp - k[1]) // s[1] + 1
    Wo = (Wp - k[2]) // s[2] + 1

    # Channel-last lane-dense layout: (Dp, Hp, Wp, N*C), channels padded to 128.
    NC = N * C
    xc = jnp.transpose(x.reshape(NC, Dp, Hp, Wp), (1, 2, 3, 0))
    c_tile = _LANE
    nc_pad = -(-NC // c_tile) * c_tile
    if nc_pad != NC:
        xc = jnp.pad(xc, ((0, 0), (0, 0), (0, 0), (0, nc_pad - NC)))
    num_c = nc_pad // c_tile

    use_pair = (k == (3, 3, 3)) and s[1] == 1 and Ho >= 2

    # W chunk sized so the live compare pool stays register resident
    # (packed-dtype aware: 8/16/32 sublanes per vreg for 4/2/1-byte elements).
    itemsize = jnp.dtype(x.dtype).itemsize
    sublanes_per_vreg = 8 * max(1, 4 // itemsize)
    n_win = k[0] * k[1] * k[2]
    live = 24 if use_pair else (n_win - (n_win - 1) // 2 + 6)
    wc = int(max(1, min(Wo, sublanes_per_vreg * max(1, 40 // live))))
    w_starts = [j * wc for j in range(Wo // wc)]
    if Wo % wc:
        w_starts.append(Wo - wc)          # static clamped tail (idempotent)

    kernel = _make_kernel(k, s, Ho, wc, w_starts, use_pair)

    # k0 single-plane input views of the same array: per-step VMEM is only a
    # few double-buffered (Hp, Wp, 128) planes instead of the whole volume.
    in_specs = [
        pl.BlockSpec((1, Hp, Wp, c_tile),
                     (lambda ci, d, dz=dz: (d * s[0] + dz, 0, 0, ci)))
        for dz in range(k[0])]
    out_spec = pl.BlockSpec((1, Ho, Wo, c_tile), lambda ci, d: (d, 0, 0, ci))

    # Explicit scoped-VMEM sizing: double-buffered plane inputs + output block.
    in_bytes = k[0] * 2 * Hp * Wp * c_tile * itemsize
    out_bytes = 2 * Ho * Wo * c_tile * itemsize
    vmem_limit = int(min(max(2 * (in_bytes + out_bytes) + (4 << 20), 32 << 20),
                         100 << 20))

    out = pl.pallas_call(
        kernel,
        out_shape=jax.ShapeDtypeStruct((Do, Ho, Wo, nc_pad), x.dtype),
        grid=(num_c, Do),
        in_specs=in_specs,
        out_specs=out_spec,
        compiler_params=pltpu.CompilerParams(
            dimension_semantics=("parallel", "parallel"),
            vmem_limit_bytes=vmem_limit),
    )(*([xc] * k[0]))

    out = out[..., :NC]                                  # (Do, Ho, Wo, NC)
    out = jnp.transpose(out, (3, 0, 1, 2)).reshape(N, C, Do, Ho, Wo)
    return out


def _median_pool3d_ref(x, kernel_size=(3, 3, 3), stride=1, padding=0):
    """Pure-JAX reference (window extraction + sort + lower median)."""
    k = _triple(kernel_size)
    s = _triple(stride)
    pad6 = tuple(_triple(padding)) * 2
    x = jnp.pad(
        x,
        ((0, 0), (0, 0),
         (pad6[4], pad6[5]), (pad6[2], pad6[3]), (pad6[0], pad6[1])),
        mode="constant")
    N, C, Dp, Hp, Wp = x.shape
    Do = (Dp - k[0]) // s[0] + 1
    Ho = (Hp - k[1]) // s[1] + 1
    Wo = (Wp - k[2]) // s[2] + 1
    wins = []
    for dz in range(k[0]):
        for dy in range(k[1]):
            for dx in range(k[2]):
                wins.append(
                    x[:, :,
                      dz:dz + (Do - 1) * s[0] + 1:s[0],
                      dy:dy + (Ho - 1) * s[1] + 1:s[1],
                      dx:dx + (Wo - 1) * s[2] + 1:s[2]])
    stacked = jnp.stack(wins, axis=-1)
    srt = jnp.sort(stacked, axis=-1)
    m = (stacked.shape[-1] - 1) // 2
    return srt[..., m]


if __name__ == "__main__":
    # Default case: NCDHW input, 3x3x3 window, stride 1, no padding.
    key = jax.random.PRNGKey(0)
    x = jax.random.normal(key, (2, 4, 8, 8, 8), dtype=jnp.float32)
    out = jax.block_until_ready(median_pool3d(x, kernel_size=(3, 3, 3),
                                              stride=1, padding=0))
    ref = _median_pool3d_ref(x)
    assert out.shape == (2, 4, 6, 6, 6), out.shape
    assert jnp.allclose(out, ref), "Pallas median pool mismatch vs reference"

    # Non-cubic volume, padding, and N*C not a multiple of the lane tile.
    x2 = jax.random.normal(jax.random.PRNGKey(1), (1, 3, 6, 10, 12),
                           dtype=jnp.float32)
    out2 = jax.block_until_ready(median_pool3d(x2, padding=1))
    ref2 = _median_pool3d_ref(x2, padding=1)
    assert out2.shape == ref2.shape, (out2.shape, ref2.shape)
    assert jnp.allclose(out2, ref2), "Pallas median pool mismatch (padded case)"

    # Odd output height: exercises the peeled overlapping last row-pair.
    x3 = jax.random.normal(jax.random.PRNGKey(2), (1, 2, 5, 7, 9),
                           dtype=jnp.float32)
    out3 = jax.block_until_ready(median_pool3d(x3))
    ref3 = _median_pool3d_ref(x3)
    assert out3.shape == ref3.shape, (out3.shape, ref3.shape)
    assert jnp.allclose(out3, ref3), "Pallas median pool mismatch (odd-Ho case)"

    print("KERNEL_OK")
</pallas_src>

<mosaic_0001>
module attributes {stable_mosaic.version = 11 : i64} {
  func.func @kernel(%arg0: i32, %arg1: i32, %arg2: memref<1x8x8x128xf32, #tpu.memory_space<vmem>>, %arg3: memref<1x8x8x128xf32, #tpu.memory_space<vmem>>, %arg4: memref<1x8x8x128xf32, #tpu.memory_space<vmem>>, %arg5: memref<1x6x6x128xf32, #tpu.memory_space<vmem>>) attributes {dimension_semantics = [#tpu.dimension_semantics<parallel>, #tpu.dimension_semantics<parallel>], iteration_bounds = array<i64: 1, 6>, scalar_prefetch = 0 : i64, scratch_operands = 0 : i64, tpu.core_type = #tpu.core_type<tc>, window_params = [{transform_indices = @transform_0, window_bounds = array<i64: 1, 8, 8, 128>}, {transform_indices = @transform_1, window_bounds = array<i64: 1, 8, 8, 128>}, {transform_indices = @transform_2, window_bounds = array<i64: 1, 8, 8, 128>}, {transform_indices = @transform_3, window_bounds = array<i64: 1, 6, 6, 128>}]} {
    %c0 = arith.constant 0 : index
    %c1 = arith.constant 1 : index
    %c0_0 = arith.constant 0 : index
    %c0_1 = arith.constant 0 : index
    %0 = vector.load %arg2[%c0, %c1, %c0_0, %c0_1] : memref<1x8x8x128xf32, #tpu.memory_space<vmem>>, vector<1x1x6x128xf32>
    %c0_2 = arith.constant 0 : index
    %c1_3 = arith.constant 1 : index
    %c1_4 = arith.constant 1 : index
    %c0_5 = arith.constant 0 : index
    %1 = vector.load %arg2[%c0_2, %c1_3, %c1_4, %c0_5] : memref<1x8x8x128xf32, #tpu.memory_space<vmem>>, vector<1x1x6x128xf32>
    %c0_6 = arith.constant 0 : index
    %c1_7 = arith.constant 1 : index
    %c2 = arith.constant 2 : index
    %c0_8 = arith.constant 0 : index
    %2 = vector.load %arg2[%c0_6, %c1_7, %c2, %c0_8] : memref<1x8x8x128xf32, #tpu.memory_space<vmem>>, vector<1x1x6x128xf32>
    %c0_9 = arith.constant 0 : index
    %c2_10 = arith.constant 2 : index
    %c0_11 = arith.constant 0 : index
    %c0_12 = arith.constant 0 : index
    %3 = vector.load %arg2[%c0_9, %c2_10, %c0_11, %c0_12] : memref<1x8x8x128xf32, #tpu.memory_space<vmem>>, vector<1x1x6x128xf32>
    %c0_13 = arith.constant 0 : index
    %c2_14 = arith.constant 2 : index
    %c1_15 = arith.constant 1 : index
    %c0_16 = arith.constant 0 : index
    %4 = vector.load %arg2[%c0_13, %c2_14, %c1_15, %c0_16] : memref<1x8x8x128xf32, #tpu.memory_space<vmem>>, vector<1x1x6x128xf32>
    %c0_17 = arith.constant 0 : index
    %c2_18 = arith.constant 2 : index
    %c2_19 = arith.constant 2 : index
    %c0_20 = arith.constant 0 : index
    %5 = vector.load %arg2[%c0_17, %c2_18, %c2_19, %c0_20] : memref<1x8x8x128xf32, #tpu.memory_space<vmem>>, vector<1x1x6x128xf32>
    %c0_21 = arith.constant 0 : index
    %c1_22 = arith.constant 1 : index
    %c0_23 = arith.constant 0 : index
    %c0_24 = arith.constant 0 : index
    %6 = vector.load %arg3[%c0_21, %c1_22, %c0_23, %c0_24] : memref<1x8x8x128xf32, #tpu.memory_space<vmem>>, vector<1x1x6x128xf32>
    %c0_25 = arith.constant 0 : index
    %c1_26 = arith.constant 1 : index
    %c1_27 = arith.constant 1 : index
    %c0_28 = arith.constant 0 : index
    %7 = vector.load %arg3[%c0_25, %c1_26, %c1_27, %c0_28] : memref<1x8x8x128xf32, #tpu.memory_space<vmem>>, vector<1x1x6x128xf32>
    %c0_29 = arith.constant 0 : index
    %c1_30 = arith.constant 1 : index
    %c2_31 = arith.constant 2 : index
    %c0_32 = arith.constant 0 : index
    %8 = vector.load %arg3[%c0_29, %c1_30, %c2_31, %c0_32] : memref<1x8x8x128xf32, #tpu.memory_space<vmem>>, vector<1x1x6x128xf32>
    %c0_33 = arith.constant 0 : index
    %c2_34 = arith.constant 2 : index
    %c0_35 = arith.constant 0 : index
    %c0_36 = arith.constant 0 : index
    %9 = vector.load %arg3[%c0_33, %c2_34, %c0_35, %c0_36] : memref<1x8x8x128xf32, #tpu.memory_space<vmem>>, vector<1x1x6x128xf32>
    %c0_37 = arith.constant 0 : index
    %c2_38 = arith.constant 2 : index
    %c1_39 = arith.constant 1 : index
    %c0_40 = arith.constant 0 : index
    %10 = vector.load %arg3[%c0_37, %c2_38, %c1_39, %c0_40] : memref<1x8x8x128xf32, #tpu.memory_space<vmem>>, vector<1x1x6x128xf32>
    %c0_41 = arith.constant 0 : index
    %c2_42 = arith.constant 2 : index
    %c2_43 = arith.constant 2 : index
    %c0_44 = arith.constant 0 : index
    %11 = vector.load %arg3[%c0_41, %c2_42, %c2_43, %c0_44] : memref<1x8x8x128xf32, #tpu.memory_space<vmem>>, vector<1x1x6x128xf32>
    %c0_45 = arith.constant 0 : index
    %c1_46 = arith.constant 1 : index
    %c0_47 = arith.constant 0 : index
    %c0_48 = arith.constant 0 : index
    %12 = vector.load %arg4[%c0_45, %c1_46, %c0_47, %c0_48] : memref<1x8x8x128xf32, #tpu.memory_space<vmem>>, vector<1x1x6x128xf32>
    %c0_49 = arith.constant 0 : index
    %c1_50 = arith.constant 1 : index
    %c1_51 = arith.constant 1 : index
    %c0_52 = arith.constant 0 : index
    %13 = vector.load %arg4[%c0_49, %c1_50, %c1_51, %c0_52] : memref<1x8x8x128xf32, #tpu.memory_space<vmem>>, vector<1x1x6x128xf32>
    %c0_53 = arith.constant 0 : index
    %c1_54 = arith.constant 1 : index
    %c2_55 = arith.constant 2 : index
    %c0_56 = arith.constant 0 : index
    %14 = vector.load %arg4[%c0_53, %c1_54, %c2_55, %c0_56] : memref<1x8x8x128xf32, #tpu.memory_space<vmem>>, vector<1x1x6x128xf32>
    %c0_57 = arith.constant 0 : index
    %c2_58 = arith.constant 2 : index
    %c0_59 = arith.constant 0 : index
    %c0_60 = arith.constant 0 : index
    %15 = vector.load %arg4[%c0_57, %c2_58, %c0_59, %c0_60] : memref<1x8x8x128xf32, #tpu.memory_space<vmem>>, vector<1x1x6x128xf32>
    %c0_61 = arith.constant 0 : index
    %c2_62 = arith.constant 2 : index
    %c1_63 = arith.constant 1 : index
    %c0_64 = arith.constant 0 : index
    %16 = vector.load %arg4[%c0_61, %c2_62, %c1_63, %c0_64] : memref<1x8x8x128xf32, #tpu.memory_space<vmem>>, vector<1x1x6x128xf32>
    %c0_65 = arith.constant 0 : index
    %c2_66 = arith.constant 2 : index
    %c2_67 = arith.constant 2 : index
    %c0_68 = arith.constant 0 : index
    %17 = vector.load %arg4[%c0_65, %c2_66, %c2_67, %c0_68] : memref<1x8x8x128xf32, #tpu.memory_space<vmem>>, vector<1x1x6x128xf32>
    %18 = arith.minimumf %0, %1 : vector<1x1x6x128xf32>
    %19 = arith.maximumf %0, %1 : vector<1x1x6x128xf32>
    %20 = arith.minimumf %2, %3 : vector<1x1x6x128xf32>
    %21 = arith.maximumf %2, %3 : vector<1x1x6x128xf32>
    %22 = arith.minimumf %4, %5 : vector<1x1x6x128xf32>
    %23 = arith.maximumf %4, %5 : vector<1x1x6x128xf32>
    %24 = arith.minimumf %6, %7 : vector<1x1x6x128xf32>
    %25 = arith.maximumf %6, %7 : vector<1x1x6x128xf32>
    %26 = arith.minimumf %8, %9 : vector<1x1x6x128xf32>
    %27 = arith.maximumf %8, %9 : vector<1x1x6x128xf32>
    %28 = arith.minimumf %10, %11 : vector<1x1x6x128xf32>
    %29 = arith.maximumf %10, %11 : vector<1x1x6x128xf32>
    %30 = arith.minimumf %12, %13 : vector<1x1x6x128xf32>
    %31 = arith.maximumf %12, %13 : vector<1x1x6x128xf32>
    %32 = arith.minimumf %14, %15 : vector<1x1x6x128xf32>
    %33 = arith.maximumf %14, %15 : vector<1x1x6x128xf32>
    %34 = arith.minimumf %16, %17 : vector<1x1x6x128xf32>
    %35 = arith.maximumf %16, %17 : vector<1x1x6x128xf32>
    %36 = arith.minimumf %18, %20 : vector<1x1x6x128xf32>
    %37 = arith.maximumf %18, %20 : vector<1x1x6x128xf32>
    %38 = arith.minimumf %36, %22 : vector<1x1x6x128xf32>
    %39 = arith.maximumf %36, %22 : vector<1x1x6x128xf32>
    %40 = arith.minimumf %38, %24 : vector<1x1x6x128xf32>
    %41 = arith.maximumf %38, %24 : vector<1x1x6x128xf32>
    %42 = arith.minimumf %40, %26 : vector<1x1x6x128xf32>
    %43 = arith.maximumf %40, %26 : vector<1x1x6x128xf32>
    %44 = arith.minimumf %42, %28 : vector<1x1x6x128xf32>
    %45 = arith.maximumf %42, %28 : vector<1x1x6x128xf32>
    %46 = arith.minimumf %44, %30 : vector<1x1x6x128xf32>
    %47 = arith.maximumf %44, %30 : vector<1x1x6x128xf32>
    %48 = arith.minimumf %46, %32 : vector<1x1x6x128xf32>
    %49 = arith.maximumf %46, %32 : vector<1x1x6x128xf32>
    %50 = arith.maximumf %48, %34 : vector<1x1x6x128xf32>
    %51 = arith.minimumf %19, %35 : vector<1x1x6x128xf32>
    %52 = arith.maximumf %19, %35 : vector<1x1x6x128xf32>
    %53 = arith.minimumf %21, %52 : vector<1x1x6x128xf32>
    %54 = arith.maximumf %21, %52 : vector<1x1x6x128xf32>
    %55 = arith.minimumf %23, %54 : vector<1x1x6x128xf32>
    %56 = arith.maximumf %23, %54 : vector<1x1x6x128xf32>
    %57 = arith.minimumf %25, %56 : vector<1x1x6x128xf32>
    %58 = arith.maximumf %25, %56 : vector<1x1x6x128xf32>
    %59 = arith.minimumf %27, %58 : vector<1x1x6x128xf32>
    %60 = arith.maximumf %27, %58 : vector<1x1x6x128xf32>
    %61 = arith.minimumf %29, %60 : vector<1x1x6x128xf32>
    %62 = arith.maximumf %29, %60 : vector<1x1x6x128xf32>
    %63 = arith.minimumf %31, %62 : vector<1x1x6x128xf32>
    %64 = arith.maximumf %31, %62 : vector<1x1x6x128xf32>
    %65 = arith.minimumf %33, %64 : vector<1x1x6x128xf32>
    %66 = arith.minimumf %51, %37 : vector<1x1x6x128xf32>
    %67 = arith.maximumf %51, %37 : vector<1x1x6x128xf32>
    %68 = arith.minimumf %53, %39 : vector<1x1x6x128xf32>
    %69 = arith.maximumf %53, %39 : vector<1x1x6x128xf32>
    %70 = arith.minimumf %55, %41 : vector<1x1x6x128xf32>
    %71 = arith.maximumf %55, %41 : vector<1x1x6x128xf32>
    %72 = arith.minimumf %57, %43 : vector<1x1x6x128xf32>
    %73 = arith.maximumf %57, %43 : vector<1x1x6x128xf32>
    %74 = arith.minimumf %59, %45 : vector<1x1x6x128xf32>
    %75 = arith.maximumf %59, %45 : vector<1x1x6x128xf32>
    %76 = arith.minimumf %61, %47 : vector<1x1x6x128xf32>
    %77 = arith.maximumf %61, %47 : vector<1x1x6x128xf32>
    %78 = arith.minimumf %63, %49 : vector<1x1x6x128xf32>
    %79 = arith.maximumf %63, %49 : vector<1x1x6x128xf32>
    %80 = arith.minimumf %65, %50 : vector<1x1x6x128xf32>
    %81 = arith.maximumf %65, %50 : vector<1x1x6x128xf32>
    %82 = arith.minimumf %66, %68 : vector<1x1x6x128xf32>
    %83 = arith.maximumf %66, %68 : vector<1x1x6x128xf32>
    %84 = arith.minimumf %82, %70 : vector<1x1x6x128xf32>
    %85 = arith.maximumf %82, %70 : vector<1x1x6x128xf32>
    %86 = arith.minimumf %84, %72 : vector<1x1x6x128xf32>
    %87 = arith.maximumf %84, %72 : vector<1x1x6x128xf32>
    %88 = arith.minimumf %86, %74 : vector<1x1x6x128xf32>
    %89 = arith.maximumf %86, %74 : vector<1x1x6x128xf32>
    %90 = arith.minimumf %88, %76 : vector<1x1x6x128xf32>
    %91 = arith.maximumf %88, %76 : vector<1x1x6x128xf32>
    %92 = arith.minimumf %90, %78 : vector<1x1x6x128xf32>
    %93 = arith.maximumf %90, %78 : vector<1x1x6x128xf32>
    %94 = arith.maximumf %92, %80 : vector<1x1x6x128xf32>
    %95 = arith.minimumf %67, %81 : vector<1x1x6x128xf32>
    %96 = arith.maximumf %67, %81 : vector<1x1x6x128xf32>
    %97 = arith.minimumf %69, %96 : vector<1x1x6x128xf32>
    %98 = arith.maximumf %69, %96 : vector<1x1x6x128xf32>
    %99 = arith.minimumf %71, %98 : vector<1x1x6x128xf32>
    %100 = arith.maximumf %71, %98 : vector<1x1x6x128xf32>
    %101 = arith.minimumf %73, %100 : vector<1x1x6x128xf32>
    %102 = arith.maximumf %73, %100 : vector<1x1x6x128xf32>
    %103 = arith.minimumf %75, %102 : vector<1x1x6x128xf32>
    %104 = arith.maximumf %75, %102 : vector<1x1x6x128xf32>
    %105 = arith.minimumf %77, %104 : vector<1x1x6x128xf32>
    %106 = arith.maximumf %77, %104 : vector<1x1x6x128xf32>
    %107 = arith.minimumf %79, %106 : vector<1x1x6x128xf32>
    %108 = arith.minimumf %95, %83 : vector<1x1x6x128xf32>
    %109 = arith.maximumf %95, %83 : vector<1x1x6x128xf32>
    %110 = arith.minimumf %97, %85 : vector<1x1x6x128xf32>
    %111 = arith.maximumf %97, %85 : vector<1x1x6x128xf32>
    %112 = arith.minimumf %99, %87 : vector<1x1x6x128xf32>
    %113 = arith.maximumf %99, %87 : vector<1x1x6x128xf32>
    %114 = arith.minimumf %101, %89 : vector<1x1x6x128xf32>
    %115 = arith.maximumf %101, %89 : vector<1x1x6x128xf32>
    %116 = arith.minimumf %103, %91 : vector<1x1x6x128xf32>
    %117 = arith.maximumf %103, %91 : vector<1x1x6x128xf32>
    %118 = arith.minimumf %105, %93 : vector<1x1x6x128xf32>
    %119 = arith.maximumf %105, %93 : vector<1x1x6x128xf32>
    %120 = arith.minimumf %107, %94 : vector<1x1x6x128xf32>
    %121 = arith.maximumf %107, %94 : vector<1x1x6x128xf32>
    %122 = arith.minimumf %108, %110 : vector<1x1x6x128xf32>
    %123 = arith.maximumf %108, %110 : vector<1x1x6x128xf32>
    %124 = arith.minimumf %122, %112 : vector<1x1x6x128xf32>
    %125 = arith.maximumf %122, %112 : vector<1x1x6x128xf32>
    %126 = arith.minimumf %124, %114 : vector<1x1x6x128xf32>
    %127 = arith.maximumf %124, %114 : vector<1x1x6x128xf32>
    %128 = arith.minimumf %126, %116 : vector<1x1x6x128xf32>
    %129 = arith.maximumf %126, %116 : vector<1x1x6x128xf32>
    %130 = arith.minimumf %128, %118 : vector<1x1x6x128xf32>
    %131 = arith.maximumf %128, %118 : vector<1x1x6x128xf32>
    %132 = arith.maximumf %130, %120 : vector<1x1x6x128xf32>
    %133 = arith.minimumf %109, %121 : vector<1x1x6x128xf32>
    %134 = arith.maximumf %109, %121 : vector<1x1x6x128xf32>
    %135 = arith.minimumf %111, %134 : vector<1x1x6x128xf32>
    %136 = arith.maximumf %111, %134 : vector<1x1x6x128xf32>
    %137 = arith.minimumf %113, %136 : vector<1x1x6x128xf32>
    %138 = arith.maximumf %113, %136 : vector<1x1x6x128xf32>
    %139 = arith.minimumf %115, %138 : vector<1x1x6x128xf32>
    %140 = arith.maximumf %115, %138 : vector<1x1x6x128xf32>
    %141 = arith.minimumf %117, %140 : vector<1x1x6x128xf32>
    %142 = arith.maximumf %117, %140 : vector<1x1x6x128xf32>
    %143 = arith.minimumf %119, %142 : vector<1x1x6x128xf32>
    %144 = arith.minimumf %133, %123 : vector<1x1x6x128xf32>
    %145 = arith.maximumf %133, %123 : vector<1x1x6x128xf32>
    %146 = arith.minimumf %135, %125 : vector<1x1x6x128xf32>
    %147 = arith.maximumf %135, %125 : vector<1x1x6x128xf32>
    %148 = arith.minimumf %137, %127 : vector<1x1x6x128xf32>
    %149 = arith.maximumf %137, %127 : vector<1x1x6x128xf32>
    %150 = arith.minimumf %139, %129 : vector<1x1x6x128xf32>
    %151 = arith.maximumf %139, %129 : vector<1x1x6x128xf32>
    %152 = arith.minimumf %141, %131 : vector<1x1x6x128xf32>
    %153 = arith.maximumf %141, %131 : vector<1x1x6x128xf32>
    %154 = arith.minimumf %143, %132 : vector<1x1x6x128xf32>
    %155 = arith.maximumf %143, %132 : vector<1x1x6x128xf32>
    %156 = arith.minimumf %144, %146 : vector<1x1x6x128xf32>
    %157 = arith.maximumf %144, %146 : vector<1x1x6x128xf32>
    %158 = arith.minimumf %156, %148 : vector<1x1x6x128xf32>
    %159 = arith.maximumf %156, %148 : vector<1x1x6x128xf32>
    %160 = arith.minimumf %158, %150 : vector<1x1x6x128xf32>
    %161 = arith.maximumf %158, %150 : vector<1x1x6x128xf32>
    %162 = arith.minimumf %160, %152 : vector<1x1x6x128xf32>
    %163 = arith.maximumf %160, %152 : vector<1x1x6x128xf32>
    %164 = arith.maximumf %162, %154 : vector<1x1x6x128xf32>
    %165 = arith.minimumf %145, %155 : vector<1x1x6x128xf32>
    %166 = arith.maximumf %145, %155 : vector<1x1x6x128xf32>
    %167 = arith.minimumf %147, %166 : vector<1x1x6x128xf32>
    %168 = arith.maximumf %147, %166 : vector<1x1x6x128xf32>
    %169 = arith.minimumf %149, %168 : vector<1x1x6x128xf32>
    %170 = arith.maximumf %149, %168 : vector<1x1x6x128xf32>
    %171 = arith.minimumf %151, %170 : vector<1x1x6x128xf32>
    %172 = arith.maximumf %151, %170 : vector<1x1x6x128xf32>
    %173 = arith.minimumf %153, %172 : vector<1x1x6x128xf32>
    %c0_69 = arith.constant 0 : index
    %c0_70 = arith.constant 0 : index
    %c0_71 = arith.constant 0 : index
    %c0_72 = arith.constant 0 : index
    %174 = vector.load %arg2[%c0_69, %c0_70, %c0_71, %c0_72] : memref<1x8x8x128xf32, #tpu.memory_space<vmem>>, vector<1x1x6x128xf32>
    %175 = arith.minimumf %165, %157 : vector<1x1x6x128xf32>
    %176 = arith.maximumf %165, %157 : vector<1x1x6x128xf32>
    %177 = arith.minimumf %167, %159 : vector<1x1x6x128xf32>
    %178 = arith.maximumf %167, %159 : vector<1x1x6x128xf32>
    %179 = arith.minimumf %169, %161 : vector<1x1x6x128xf32>
    %180 = arith.maximumf %169, %161 : vector<1x1x6x128xf32>
    %181 = arith.minimumf %171, %163 : vector<1x1x6x128xf32>
    %182 = arith.maximumf %171, %163 : vector<1x1x6x128xf32>
    %183 = arith.minimumf %173, %164 : vector<1x1x6x128xf32>
    %184 = arith.maximumf %173, %164 : vector<1x1x6x128xf32>
    %185 = arith.minimumf %175, %177 : vector<1x1x6x128xf32>
    %186 = arith.maximumf %175, %177 : vector<1x1x6x128xf32>
    %187 = arith.minimumf %185, %179 : vector<1x1x6x128xf32>
    %188 = arith.maximumf %185, %179 : vector<1x1x6x128xf32>
    %189 = arith.minimumf %187, %181 : vector<1x1x6x128xf32>
    %190 = arith.maximumf %187, %181 : vector<1x1x6x128xf32>
    %191 = arith.minimumf %189, %183 : vector<1x1x6x128xf32>
    %192 = arith.maximumf %189, %183 : vector<1x1x6x128xf32>
    %193 = arith.maximumf %191, %174 : vector<1x1x6x128xf32>
    %194 = arith.minimumf %176, %193 : vector<1x1x6x128xf32>
    %195 = arith.maximumf %176, %193 : vector<1x1x6x128xf32>
    %196 = arith.minimumf %178, %195 : vector<1x1x6x128xf32>
    %197 = arith.maximumf %178, %195 : vector<1x1x6x128xf32>
    %198 = arith.minimumf %180, %197 : vector<1x1x6x128xf32>
    %199 = arith.maximumf %180, %197 : vector<1x1x6x128xf32>
    %200 = arith.minimumf %182, %199 : vector<1x1x6x128xf32>
    %201 = arith.maximumf %182, %199 : vector<1x1x6x128xf32>
    %202 = arith.minimumf %184, %201 : vector<1x1x6x128xf32>
    %c0_73 = arith.constant 0 : index
    %c0_74 = arith.constant 0 : index
    %c1_75 = arith.constant 1 : index
    %c0_76 = arith.constant 0 : index
    %203 = vector.load %arg2[%c0_73, %c0_74, %c1_75, %c0_76] : memref<1x8x8x128xf32, #tpu.memory_space<vmem>>, vector<1x1x6x128xf32>
    %204 = arith.minimumf %194, %186 : vector<1x1x6x128xf32>
    %205 = arith.maximumf %194, %186 : vector<1x1x6x128xf32>
    %206 = arith.minimumf %196, %188 : vector<1x1x6x128xf32>
    %207 = arith.maximumf %196, %188 : vector<1x1x6x128xf32>
    %208 = arith.minimumf %198, %190 : vector<1x1x6x128xf32>
    %209 = arith.maximumf %198, %190 : vector<1x1x6x128xf32>
    %210 = arith.minimumf %200, %192 : vector<1x1x6x128xf32>
    %211 = arith.maximumf %200, %192 : vector<1x1x6x128xf32>
    %212 = arith.minimumf %202, %203 : vector<1x1x6x128xf32>
    %213 = arith.maximumf %202, %203 : vector<1x1x6x128xf32>
    %214 = arith.minimumf %204, %206 : vector<1x1x6x128xf32>
    %215 = arith.maximumf %204, %206 : vector<1x1x6x128xf32>
    %216 = arith.minimumf %214, %208 : vector<1x1x6x128xf32>
    %217 = arith.maximumf %214, %208 : vector<1x1x6x128xf32>
    %218 = arith.minimumf %216, %210 : vector<1x1x6x128xf32>
    %219 = arith.maximumf %216, %210 : vector<1x1x6x128xf32>
    %220 = arith.maximumf %218, %212 : vector<1x1x6x128xf32>
    %221 = arith.minimumf %205, %213 : vector<1x1x6x128xf32>
    %222 = arith.maximumf %205, %213 : vector<1x1x6x128xf32>
    %223 = arith.minimumf %207, %222 : vector<1x1x6x128xf32>
    %224 = arith.maximumf %207, %222 : vector<1x1x6x128xf32>
    %225 = arith.minimumf %209, %224 : vector<1x1x6x128xf32>
    %226 = arith.maximumf %209, %224 : vector<1x1x6x128xf32>
    %227 = arith.minimumf %211, %226 : vector<1x1x6x128xf32>
    %c0_77 = arith.constant 0 : index
    %c0_78 = arith.constant 0 : index
    %c2_79 = arith.constant 2 : index
    %c0_80 = arith.constant 0 : index
    %228 = vector.load %arg2[%c0_77, %c0_78, %c2_79, %c0_80] : memref<1x8x8x128xf32, #tpu.memory_space<vmem>>, vector<1x1x6x128xf32>
    %229 = arith.minimumf %221, %215 : vector<1x1x6x128xf32>
    %230 = arith.maximumf %221, %215 : vector<1x1x6x128xf32>
    %231 = arith.minimumf %223, %217 : vector<1x1x6x128xf32>
    %232 = arith.maximumf %223, %217 : vector<1x1x6x128xf32>
    %233 = arith.minimumf %225, %219 : vector<1x1x6x128xf32>
    %234 = arith.maximumf %225, %219 : vector<1x1x6x128xf32>
    %235 = arith.minimumf %227, %220 : vector<1x1x6x128xf32>
    %236 = arith.maximumf %227, %220 : vector<1x1x6x128xf32>
    %237 = arith.minimumf %229, %231 : vector<1x1x6x128xf32>
    %238 = arith.maximumf %229, %231 : vector<1x1x6x128xf32>
    %239 = arith.minimumf %237, %233 : vector<1x1x6x128xf32>
    %240 = arith.maximumf %237, %233 : vector<1x1x6x128xf32>
    %241 = arith.minimumf %239, %235 : vector<1x1x6x128xf32>
    %242 = arith.maximumf %239, %235 : vector<1x1x6x128xf32>
    %243 = arith.maximumf %241, %228 : vector<1x1x6x128xf32>
    %244 = arith.minimumf %230, %243 : vector<1x1x6x128xf32>
    %245 = arith.maximumf %230, %243 : vector<1x1x6x128xf32>
    %246 = arith.minimumf %232, %245 : vector<1x1x6x128xf32>
    %247 = arith.maximumf %232, %245 : vector<1x1x6x128xf32>
    %248 = arith.minimumf %234, %247 : vector<1x1x6x128xf32>
    %249 = arith.maximumf %234, %247 : vector<1x1x6x128xf32>
    %250 = arith.minimumf %236, %249 : vector<1x1x6x128xf32>
    %c0_81 = arith.constant 0 : index
    %c0_82 = arith.constant 0 : index
    %c0_83 = arith.constant 0 : index
    %c0_84 = arith.constant 0 : index
    %251 = vector.load %arg3[%c0_81, %c0_82, %c0_83, %c0_84] : memref<1x8x8x128xf32, #tpu.memory_space<vmem>>, vector<1x1x6x128xf32>
    %252 = arith.minimumf %244, %238 : vector<1x1x6x128xf32>
    %253 = arith.maximumf %244, %238 : vector<1x1x6x128xf32>
    %254 = arith.minimumf %246, %240 : vector<1x1x6x128xf32>
    %255 = arith.maximumf %246, %240 : vector<1x1x6x128xf32>
    %256 = arith.minimumf %248, %242 : vector<1x1x6x128xf32>
    %257 = arith.maximumf %248, %242 : vector<1x1x6x128xf32>
    %258 = arith.minimumf %250, %251 : vector<1x1x6x128xf32>
    %259 = arith.maximumf %250, %251 : vector<1x1x6x128xf32>
    %260 = arith.minimumf %252, %254 : vector<1x1x6x128xf32>
    %261 = arith.maximumf %252, %254 : vector<1x1x6x128xf32>
    %262 = arith.minimumf %260, %256 : vector<1x1x6x128xf32>
    %263 = arith.maximumf %260, %256 : vector<1x1x6x128xf32>
    %264 = arith.maximumf %262, %258 : vector<1x1x6x128xf32>
    %265 = arith.minimumf %253, %259 : vector<1x1x6x128xf32>
    %266 = arith.maximumf %253, %259 : vector<1x1x6x128xf32>
    %267 = arith.minimumf %255, %266 : vector<1x1x6x128xf32>
    %268 = arith.maximumf %255, %266 : vector<1x1x6x128xf32>
    %269 = arith.minimumf %257, %268 : vector<1x1x6x128xf32>
    %c0_85 = arith.constant 0 : index
    %c0_86 = arith.constant 0 : index
    %c1_87 = arith.constant 1 : index
    %c0_88 = arith.constant 0 : index
    %270 = vector.load %arg3[%c0_85, %c0_86, %c1_87, %c0_88] : memref<1x8x8x128xf32, #tpu.memory_space<vmem>>, vector<1x1x6x128xf32>
    %271 = arith.minimumf %265, %261 : vector<1x1x6x128xf32>
    %272 = arith.maximumf %265, %261 : vector<1x1x6x128xf32>
    %273 = arith.minimumf %267, %263 : vector<1x1x6x128xf32>
    %274 = arith.maximumf %267, %263 : vector<1x1x6x128xf32>
    %275 = arith.minimumf %269, %264 : vector<1x1x6x128xf32>
    %276 = arith.maximumf %269, %264 : vector<1x1x6x128xf32>
    %277 = arith.minimumf %271, %273 : vector<1x1x6x128xf32>
    %278 = arith.maximumf %271, %273 : vector<1x1x6x128xf32>
    %279 = arith.minimumf %277, %275 : vector<1x1x6x128xf32>
    %280 = arith.maximumf %277, %275 : vector<1x1x6x128xf32>
    %281 = arith.maximumf %279, %270 : vector<1x1x6x128xf32>
    %282 = arith.minimumf %272, %281 : vector<1x1x6x128xf32>
    %283 = arith.maximumf %272, %281 : vector<1x1x6x128xf32>
    %284 = arith.minimumf %274, %283 : vector<1x1x6x128xf32>
    %285 = arith.maximumf %274, %283 : vector<1x1x6x128xf32>
    %286 = arith.minimumf %276, %285 : vector<1x1x6x128xf32>
    %c0_89 = arith.constant 0 : index
    %c0_90 = arith.constant 0 : index
    %c2_91 = arith.constant 2 : index
    %c0_92 = arith.constant 0 : index
    %287 = vector.load %arg3[%c0_89, %c0_90, %c2_91, %c0_92] : memref<1x8x8x128xf32, #tpu.memory_space<vmem>>, vector<1x1x6x128xf32>
    %288 = arith.minimumf %282, %278 : vector<1x1x6x128xf32>
    %289 = arith.maximumf %282, %278 : vector<1x1x6x128xf32>
    %290 = arith.minimumf %284, %280 : vector<1x1x6x128xf32>
    %291 = arith.maximumf %284, %280 : vector<1x1x6x128xf32>
    %292 = arith.minimumf %286, %287 : vector<1x1x6x128xf32>
    %293 = arith.maximumf %286, %287 : vector<1x1x6x128xf32>
    %294 = arith.minimumf %288, %290 : vector<1x1x6x128xf32>
    %295 = arith.maximumf %288, %290 : vector<1x1x6x128xf32>
    %296 = arith.maximumf %294, %292 : vector<1x1x6x128xf32>
    %297 = arith.minimumf %289, %293 : vector<1x1x6x128xf32>
    %298 = arith.maximumf %289, %293 : vector<1x1x6x128xf32>
    %299 = arith.minimumf %291, %298 : vector<1x1x6x128xf32>
    %c0_93 = arith.constant 0 : index
    %c0_94 = arith.constant 0 : index
    %c0_95 = arith.constant 0 : index
    %c0_96 = arith.constant 0 : index
    %300 = vector.load %arg4[%c0_93, %c0_94, %c0_95, %c0_96] : memref<1x8x8x128xf32, #tpu.memory_space<vmem>>, vector<1x1x6x128xf32>
    %301 = arith.minimumf %297, %295 : vector<1x1x6x128xf32>
    %302 = arith.maximumf %297, %295 : vector<1x1x6x128xf32>
    %303 = arith.minimumf %299, %296 : vector<1x1x6x128xf32>
    %304 = arith.maximumf %299, %296 : vector<1x1x6x128xf32>
    %305 = arith.minimumf %301, %303 : vector<1x1x6x128xf32>
    %306 = arith.maximumf %301, %303 : vector<1x1x6x128xf32>
    %307 = arith.maximumf %305, %300 : vector<1x1x6x128xf32>
    %308 = arith.minimumf %302, %307 : vector<1x1x6x128xf32>
    %309 = arith.maximumf %302, %307 : vector<1x1x6x128xf32>
    %310 = arith.minimumf %304, %309 : vector<1x1x6x128xf32>
    %c0_97 = arith.constant 0 : index
    %c0_98 = arith.constant 0 : index
    %c1_99 = arith.constant 1 : index
    %c0_100 = arith.constant 0 : index
    %311 = vector.load %arg4[%c0_97, %c0_98, %c1_99, %c0_100] : memref<1x8x8x128xf32, #tpu.memory_space<vmem>>, vector<1x1x6x128xf32>
    %312 = arith.minimumf %308, %306 : vector<1x1x6x128xf32>
    %313 = arith.maximumf %308, %306 : vector<1x1x6x128xf32>
    %314 = arith.minimumf %310, %311 : vector<1x1x6x128xf32>
    %315 = arith.maximumf %310, %311 : vector<1x1x6x128xf32>
    %316 = arith.maximumf %312, %314 : vector<1x1x6x128xf32>
    %317 = arith.minimumf %313, %315 : vector<1x1x6x128xf32>
    %c0_101 = arith.constant 0 : index
    %c0_102 = arith.constant 0 : index
    %c2_103 = arith.constant 2 : index
    %c0_104 = arith.constant 0 : index
    %318 = vector.load %arg4[%c0_101, %c0_102, %c2_103, %c0_104] : memref<1x8x8x128xf32, #tpu.memory_space<vmem>>, vector<1x1x6x128xf32>
    %319 = arith.minimumf %317, %316 : vector<1x1x6x128xf32>
    %320 = arith.maximumf %317, %316 : vector<1x1x6x128xf32>
    %321 = arith.maximumf %319, %318 : vector<1x1x6x128xf32>
    %322 = arith.minimumf %320, %321 : vector<1x1x6x128xf32>
    %c0_105 = arith.constant 0 : index
    %c0_106 = arith.constant 0 : index
    %c0_107 = arith.constant 0 : index
    %c0_108 = arith.constant 0 : index
    %323 = vector.load %arg5[%c0_105, %c0_106, %c0_107, %c0_108] : memref<1x6x6x128xf32, #tpu.memory_space<vmem>>, vector<1x1x6x128xf32>
    tpu.vector_store %arg5[%c0_105, %c0_106, %c0_107, %c0_108], %322 {strides = array<i32>} : memref<1x6x6x128xf32, #tpu.memory_space<vmem>>, vector<1x1x6x128xf32>,
    %c0_109 = arith.constant 0 : index
    %c3 = arith.constant 3 : index
    %c0_110 = arith.constant 0 : index
    %c0_111 = arith.constant 0 : index
    %324 = vector.load %arg2[%c0_109, %c3, %c0_110, %c0_111] : memref<1x8x8x128xf32, #tpu.memory_space<vmem>>, vector<1x1x6x128xf32>
    %325 = arith.minimumf %165, %157 : vector<1x1x6x128xf32>
    %326 = arith.maximumf %165, %157 : vector<1x1x6x128xf32>
    %327 = arith.minimumf %167, %159 : vector<1x1x6x128xf32>
    %328 = arith.maximumf %167, %159 : vector<1x1x6x128xf32>
    %329 = arith.minimumf %169, %161 : vector<1x1x6x128xf32>
    %330 = arith.maximumf %169, %161 : vector<1x1x6x128xf32>
    %331 = arith.minimumf %171, %163 : vector<1x1x6x128xf32>
    %332 = arith.maximumf %171, %163 : vector<1x1x6x128xf32>
    %333 = arith.minimumf %173, %164 : vector<1x1x6x128xf32>
    %334 = arith.maximumf %173, %164 : vector<1x1x6x128xf32>
    %335 = arith.minimumf %325, %327 : vector<1x1x6x128xf32>
    %336 = arith.maximumf %325, %327 : vector<1x1x6x128xf32>
    %337 = arith.minimumf %335, %329 : vector<1x1x6x128xf32>
    %338 = arith.maximumf %335, %329 : vector<1x1x6x128xf32>
    %339 = arith.minimumf %337, %331 : vector<1x1x6x128xf32>
    %340 = arith.maximumf %337, %331 : vector<1x1x6x128xf32>
    %341 = arith.minimumf %339, %333 : vector<1x1x6x128xf32>
    %342 = arith.maximumf %339, %333 : vector<1x1x6x128xf32>
    %343 = arith.maximumf %341, %324 : vector<1x1x6x128xf32>
    %344 = arith.minimumf %326, %343 : vector<1x1x6x128xf32>
    %345 = arith.maximumf %326, %343 : vector<1x1x6x128xf32>
    %346 = arith.minimumf %328, %345 : vector<1x1x6x128xf32>
    %347 = arith.maximumf %328, %345 : vector<1x1x6x128xf32>
    %348 = arith.minimumf %330, %347 : vector<1x1x6x128xf32>
    %349 = arith.maximumf %330, %347 : vector<1x1x6x128xf32>
    %350 = arith.minimumf %332, %349 : vector<1x1x6x128xf32>
    %351 = arith.maximumf %332, %349 : vector<1x1x6x128xf32>
    %352 = arith.minimumf %334, %351 : vector<1x1x6x128xf32>
    %c0_112 = arith.constant 0 : index
    %c3_113 = arith.constant 3 : index
    %c1_114 = arith.constant 1 : index
    %c0_115 = arith.constant 0 : index
    %353 = vector.load %arg2[%c0_112, %c3_113, %c1_114, %c0_115] : memref<1x8x8x128xf32, #tpu.memory_space<vmem>>, vector<1x1x6x128xf32>
    %354 = arith.minimumf %344, %336 : vector<1x1x6x128xf32>
    %355 = arith.maximumf %344, %336 : vector<1x1x6x128xf32>
    %356 = arith.minimumf %346, %338 : vector<1x1x6x128xf32>
    %357 = arith.maximumf %346, %338 : vector<1x1x6x128xf32>
    %358 = arith.minimumf %348, %340 : vector<1x1x6x128xf32>
    %359 = arith.maximumf %348, %340 : vector<1x1x6x128xf32>
    %360 = arith.minimumf %350, %342 : vector<1x1x6x128xf32>
    %361 = arith.maximumf %350, %342 : vector<1x1x6x128xf32>
    %362 = arith.minimumf %352, %353 : vector<1x1x6x128xf32>
    %363 = arith.maximumf %352, %353 : vector<1x1x6x128xf32>
    %364 = arith.minimumf %354, %356 : vector<1x1x6x128xf32>
    %365 = arith.maximumf %354, %356 : vector<1x1x6x128xf32>
    %366 = arith.minimumf %364, %358 : vector<1x1x6x128xf32>
    %367 = arith.maximumf %364, %358 : vector<1x1x6x128xf32>
    %368 = arith.minimumf %366, %360 : vector<1x1x6x128xf32>
    %369 = arith.maximumf %366, %360 : vector<1x1x6x128xf32>
    %370 = arith.maximumf %368, %362 : vector<1x1x6x128xf32>
    %371 = arith.minimumf %355, %363 : vector<1x1x6x128xf32>
    %372 = arith.maximumf %355, %363 : vector<1x1x6x128xf32>
    %373 = arith.minimumf %357, %372 : vector<1x1x6x128xf32>
    %374 = arith.maximumf %357, %372 : vector<1x1x6x128xf32>
    %375 = arith.minimumf %359, %374 : vector<1x1x6x128xf32>
    %376 = arith.maximumf %359, %374 : vector<1x1x6x128xf32>
    %377 = arith.minimumf %361, %376 : vector<1x1x6x128xf32>
    %c0_116 = arith.constant 0 : index
    %c3_117 = arith.constant 3 : index
    %c2_118 = arith.constant 2 : index
    %c0_119 = arith.constant 0 : index
    %378 = vector.load %arg2[%c0_116, %c3_117, %c2_118, %c0_119] : memref<1x8x8x128xf32, #tpu.memory_space<vmem>>, vector<1x1x6x128xf32>
    %379 = arith.minimumf %371, %365 : vector<1x1x6x128xf32>
    %380 = arith.maximumf %371, %365 : vector<1x1x6x128xf32>
    %381 = arith.minimumf %373, %367 : vector<1x1x6x128xf32>
    %382 = arith.maximumf %373, %367 : vector<1x1x6x128xf32>
    %383 = arith.minimumf %375, %369 : vector<1x1x6x128xf32>
    %384 = arith.maximumf %375, %369 : vector<1x1x6x128xf32>
    %385 = arith.minimumf %377, %370 : vector<1x1x6x128xf32>
    %386 = arith.maximumf %377, %370 : vector<1x1x6x128xf32>
    %387 = arith.minimumf %379, %381 : vector<1x1x6x128xf32>
    %388 = arith.maximumf %379, %381 : vector<1x1x6x128xf32>
    %389 = arith.minimumf %387, %383 : vector<1x1x6x128xf32>
    %390 = arith.maximumf %387, %383 : vector<1x1x6x128xf32>
    %391 = arith.minimumf %389, %385 : vector<1x1x6x128xf32>
    %392 = arith.maximumf %389, %385 : vector<1x1x6x128xf32>
    %393 = arith.maximumf %391, %378 : vector<1x1x6x128xf32>
    %394 = arith.minimumf %380, %393 : vector<1x1x6x128xf32>
    %395 = arith.maximumf %380, %393 : vector<1x1x6x128xf32>
    %396 = arith.minimumf %382, %395 : vector<1x1x6x128xf32>
    %397 = arith.maximumf %382, %395 : vector<1x1x6x128xf32>
    %398 = arith.minimumf %384, %397 : vector<1x1x6x128xf32>
    %399 = arith.maximumf %384, %397 : vector<1x1x6x128xf32>
    %400 = arith.minimumf %386, %399 : vector<1x1x6x128xf32>
    %c0_120 = arith.constant 0 : index
    %c3_121 = arith.constant 3 : index
    %c0_122 = arith.constant 0 : index
    %c0_123 = arith.constant 0 : index
    %401 = vector.load %arg3[%c0_120, %c3_121, %c0_122, %c0_123] : memref<1x8x8x128xf32, #tpu.memory_space<vmem>>, vector<1x1x6x128xf32>
    %402 = arith.minimumf %394, %388 : vector<1x1x6x128xf32>
    %403 = arith.maximumf %394, %388 : vector<1x1x6x128xf32>
    %404 = arith.minimumf %396, %390 : vector<1x1x6x128xf32>
    %405 = arith.maximumf %396, %390 : vector<1x1x6x128xf32>
    %406 = arith.minimumf %398, %392 : vector<1x1x6x128xf32>
    %407 = arith.maximumf %398, %392 : vector<1x1x6x128xf32>
    %408 = arith.minimumf %400, %401 : vector<1x1x6x128xf32>
    %409 = arith.maximumf %400, %401 : vector<1x1x6x128xf32>
    %410 = arith.minimumf %402, %404 : vector<1x1x6x128xf32>
    %411 = arith.maximumf %402, %404 : vector<1x1x6x128xf32>
    %412 = arith.minimumf %410, %406 : vector<1x1x6x128xf32>
    %413 = arith.maximumf %410, %406 : vector<1x1x6x128xf32>
    %414 = arith.maximumf %412, %408 : vector<1x1x6x128xf32>
    %415 = arith.minimumf %403, %409 : vector<1x1x6x128xf32>
    %416 = arith.maximumf %403, %409 : vector<1x1x6x128xf32>
    %417 = arith.minimumf %405, %416 : vector<1x1x6x128xf32>
    %418 = arith.maximumf %405, %416 : vector<1x1x6x128xf32>
    %419 = arith.minimumf %407, %418 : vector<1x1x6x128xf32>
    %c0_124 = arith.constant 0 : index
    %c3_125 = arith.constant 3 : index
    %c1_126 = arith.constant 1 : index
    %c0_127 = arith.constant 0 : index
    %420 = vector.load %arg3[%c0_124, %c3_125, %c1_126, %c0_127] : memref<1x8x8x128xf32, #tpu.memory_space<vmem>>, vector<1x1x6x128xf32>
    %421 = arith.minimumf %415, %411 : vector<1x1x6x128xf32>
    %422 = arith.maximumf %415, %411 : vector<1x1x6x128xf32>
    %423 = arith.minimumf %417, %413 : vector<1x1x6x128xf32>
    %424 = arith.maximumf %417, %413 : vector<1x1x6x128xf32>
    %425 = arith.minimumf %419, %414 : vector<1x1x6x128xf32>
    %426 = arith.maximumf %419, %414 : vector<1x1x6x128xf32>
    %427 = arith.minimumf %421, %423 : vector<1x1x6x128xf32>
    %428 = arith.maximumf %421, %423 : vector<1x1x6x128xf32>
    %429 = arith.minimumf %427, %425 : vector<1x1x6x128xf32>
    %430 = arith.maximumf %427, %425 : vector<1x1x6x128xf32>
    %431 = arith.maximumf %429, %420 : vector<1x1x6x128xf32>
    %432 = arith.minimumf %422, %431 : vector<1x1x6x128xf32>
    %433 = arith.maximumf %422, %431 : vector<1x1x6x128xf32>
    %434 = arith.minimumf %424, %433 : vector<1x1x6x128xf32>
    %435 = arith.maximumf %424, %433 : vector<1x1x6x128xf32>
    %436 = arith.minimumf %426, %435 : vector<1x1x6x128xf32>
    %c0_128 = arith.constant 0 : index
    %c3_129 = arith.constant 3 : index
    %c2_130 = arith.constant 2 : index
    %c0_131 = arith.constant 0 : index
    %437 = vector.load %arg3[%c0_128, %c3_129, %c2_130, %c0_131] : memref<1x8x8x128xf32, #tpu.memory_space<vmem>>, vector<1x1x6x128xf32>
    %438 = arith.minimumf %432, %428 : vector<1x1x6x128xf32>
    %439 = arith.maximumf %432, %428 : vector<1x1x6x128xf32>
    %440 = arith.minimumf %434, %430 : vector<1x1x6x128xf32>
    %441 = arith.maximumf %434, %430 : vector<1x1x6x128xf32>
    %442 = arith.minimumf %436, %437 : vector<1x1x6x128xf32>
    %443 = arith.maximumf %436, %437 : vector<1x1x6x128xf32>
    %444 = arith.minimumf %438, %440 : vector<1x1x6x128xf32>
    %445 = arith.maximumf %438, %440 : vector<1x1x6x128xf32>
    %446 = arith.maximumf %444, %442 : vector<1x1x6x128xf32>
    %447 = arith.minimumf %439, %443 : vector<1x1x6x128xf32>
    %448 = arith.maximumf %439, %443 : vector<1x1x6x128xf32>
    %449 = arith.minimumf %441, %448 : vector<1x1x6x128xf32>
    %c0_132 = arith.constant 0 : index
    %c3_133 = arith.constant 3 : index
    %c0_134 = arith.constant 0 : index
    %c0_135 = arith.constant 0 : index
    %450 = vector.load %arg4[%c0_132, %c3_133, %c0_134, %c0_135] : memref<1x8x8x128xf32, #tpu.memory_space<vmem>>, vector<1x1x6x128xf32>
    %451 = arith.minimumf %447, %445 : vector<1x1x6x128xf32>
    %452 = arith.maximumf %447, %445 : vector<1x1x6x128xf32>
    %453 = arith.minimumf %449, %446 : vector<1x1x6x128xf32>
    %454 = arith.maximumf %449, %446 : vector<1x1x6x128xf32>
    %455 = arith.minimumf %451, %453 : vector<1x1x6x128xf32>
    %456 = arith.maximumf %451, %453 : vector<1x1x6x128xf32>
    %457 = arith.maximumf %455, %450 : vector<1x1x6x128xf32>
    %458 = arith.minimumf %452, %457 : vector<1x1x6x128xf32>
    %459 = arith.maximumf %452, %457 : vector<1x1x6x128xf32>
    %460 = arith.minimumf %454, %459 : vector<1x1x6x128xf32>
    %c0_136 = arith.constant 0 : index
    %c3_137 = arith.constant 3 : index
    %c1_138 = arith.constant 1 : index
    %c0_139 = arith.constant 0 : index
    %461 = vector.load %arg4[%c0_136, %c3_137, %c1_138, %c0_139] : memref<1x8x8x128xf32, #tpu.memory_space<vmem>>, vector<1x1x6x128xf32>
    %462 = arith.minimumf %458, %456 : vector<1x1x6x128xf32>
    %463 = arith.maximumf %458, %456 : vector<1x1x6x128xf32>
    %464 = arith.minimumf %460, %461 : vector<1x1x6x128xf32>
    %465 = arith.maximumf %460, %461 : vector<1x1x6x128xf32>
    %466 = arith.maximumf %462, %464 : vector<1x1x6x128xf32>
    %467 = arith.minimumf %463, %465 : vector<1x1x6x128xf32>
    %c0_140 = arith.constant 0 : index
    %c3_141 = arith.constant 3 : index
    %c2_142 = arith.constant 2 : index
    %c0_143 = arith.constant 0 : index
    %468 = vector.load %arg4[%c0_140, %c3_141, %c2_142, %c0_143] : memref<1x8x8x128xf32, #tpu.memory_space<vmem>>, vector<1x1x6x128xf32>
    %469 = arith.minimumf %467, %466 : vector<1x1x6x128xf32>
    %470 = arith.maximumf %467, %466 : vector<1x1x6x128xf32>
    %471 = arith.maximumf %469, %468 : vector<1x1x6x128xf32>
    %472 = arith.minimumf %470, %471 : vector<1x1x6x128xf32>
    %c0_144 = arith.constant 0 : index
    %c1_145 = arith.constant 1 : index
    %c0_146 = arith.constant 0 : index
    %c0_147 = arith.constant 0 : index
    %473 = vector.load %arg5[%c0_144, %c1_145, %c0_146, %c0_147] : memref<1x6x6x128xf32, #tpu.memory_space<vmem>>, vector<1x1x6x128xf32>
    tpu.vector_store %arg5[%c0_144, %c1_145, %c0_146, %c0_147], %472 {strides = array<i32>} : memref<1x6x6x128xf32, #tpu.memory_space<vmem>>, vector<1x1x6x128xf32>,
    %c0_148 = arith.constant 0 : index
    %c3_149 = arith.constant 3 : index
    %c0_150 = arith.constant 0 : index
    %c0_151 = arith.constant 0 : index
    %474 = vector.load %arg2[%c0_148, %c3_149, %c0_150, %c0_151] : memref<1x8x8x128xf32, #tpu.memory_space<vmem>>, vector<1x1x6x128xf32>
    %c0_152 = arith.constant 0 : index
    %c3_153 = arith.constant 3 : index
    %c1_154 = arith.constant 1 : index
    %c0_155 = arith.constant 0 : index
    %475 = vector.load %arg2[%c0_152, %c3_153, %c1_154, %c0_155] : memref<1x8x8x128xf32, #tpu.memory_space<vmem>>, vector<1x1x6x128xf32>
    %c0_156 = arith.constant 0 : index
    %c3_157 = arith.constant 3 : index
    %c2_158 = arith.constant 2 : index
    %c0_159 = arith.constant 0 : index
    %476 = vector.load %arg2[%c0_156, %c3_157, %c2_158, %c0_159] : memref<1x8x8x128xf32, #tpu.memory_space<vmem>>, vector<1x1x6x128xf32>
    %c0_160 = arith.constant 0 : index
    %c4 = arith.constant 4 : index
    %c0_161 = arith.constant 0 : index
    %c0_162 = arith.constant 0 : index
    %477 = vector.load %arg2[%c0_160, %c4, %c0_161, %c0_162] : memref<1x8x8x128xf32, #tpu.memory_space<vmem>>, vector<1x1x6x128xf32>
    %c0_163 = arith.constant 0 : index
    %c4_164 = arith.constant 4 : index
    %c1_165 = arith.constant 1 : index
    %c0_166 = arith.constant 0 : index
    %478 = vector.load %arg2[%c0_163, %c4_164, %c1_165, %c0_166] : memref<1x8x8x128xf32, #tpu.memory_space<vmem>>, vector<1x1x6x128xf32>
    %c0_167 = arith.constant 0 : index
    %c4_168 = arith.constant 4 : index
    %c2_169 = arith.constant 2 : index
    %c0_170 = arith.constant 0 : index
    %479 = vector.load %arg2[%c0_167, %c4_168, %c2_169, %c0_170] : memref<1x8x8x128xf32, #tpu.memory_space<vmem>>, vector<1x1x6x128xf32>
    %c0_171 = arith.constant 0 : index
    %c3_172 = arith.constant 3 : index
    %c0_173 = arith.constant 0 : index
    %c0_174 = arith.constant 0 : index
    %480 = vector.load %arg3[%c0_171, %c3_172, %c0_173, %c0_174] : memref<1x8x8x128xf32, #tpu.memory_space<vmem>>, vector<1x1x6x128xf32>
    %c0_175 = arith.constant 0 : index
    %c3_176 = arith.constant 3 : index
    %c1_177 = arith.constant 1 : index
    %c0_178 = arith.constant 0 : index
    %481 = vector.load %arg3[%c0_175, %c3_176, %c1_177, %c0_178] : memref<1x8x8x128xf32, #tpu.memory_space<vmem>>, vector<1x1x6x128xf32>
    %c0_179 = arith.constant 0 : index
    %c3_180 = arith.constant 3 : index
    %c2_181 = arith.constant 2 : index
    %c0_182 = arith.constant 0 : index
    %482 = vector.load %arg3[%c0_179, %c3_180, %c2_181, %c0_182] : memref<1x8x8x128xf32, #tpu.memory_space<vmem>>, vector<1x1x6x128xf32>
    %c0_183 = arith.constant 0 : index
    %c4_184 = arith.constant 4 : index
    %c0_185 = arith.constant 0 : index
    %c0_186 = arith.constant 0 : index
    %483 = vector.load %arg3[%c0_183, %c4_184, %c0_185, %c0_186] : memref<1x8x8x128xf32, #tpu.memory_space<vmem>>, vector<1x1x6x128xf32>
    %c0_187 = arith.constant 0 : index
    %c4_188 = arith.constant 4 : index
    %c1_189 = arith.constant 1 : index
    %c0_190 = arith.constant 0 : index
    %484 = vector.load %arg3[%c0_187, %c4_188, %c1_189, %c0_190] : memref<1x8x8x128xf32, #tpu.memory_space<vmem>>, vector<1x1x6x128xf32>
    %c0_191 = arith.constant 0 : index
    %c4_192 = arith.constant 4 : index
    %c2_193 = arith.constant 2 : index
    %c0_194 = arith.constant 0 : index
    %485 = vector.load %arg3[%c0_191, %c4_192, %c2_193, %c0_194] : memref<1x8x8x128xf32, #tpu.memory_space<vmem>>, vector<1x1x6x128xf32>
    %c0_195 = arith.constant 0 : index
    %c3_196 = arith.constant 3 : index
    %c0_197 = arith.constant 0 : index
    %c0_198 = arith.constant 0 : index
    %486 = vector.load %arg4[%c0_195, %c3_196, %c0_197, %c0_198] : memref<1x8x8x128xf32, #tpu.memory_space<vmem>>, vector<1x1x6x128xf32>
    %c0_199 = arith.constant 0 : index
    %c3_200 = arith.constant 3 : index
    %c1_201 = arith.constant 1 : index
    %c0_202 = arith.constant 0 : index
    %487 = vector.load %arg4[%c0_199, %c3_200, %c1_201, %c0_202] : memref<1x8x8x128xf32, #tpu.memory_space<vmem>>, vector<1x1x6x128xf32>
    %c0_203 = arith.constant 0 : index
    %c3_204 = arith.constant 3 : index
    %c2_205 = arith.constant 2 : index
    %c0_206 = arith.constant 0 : index
    %488 = vector.load %arg4[%c0_203, %c3_204, %c2_205, %c0_206] : memref<1x8x8x128xf32, #tpu.memory_space<vmem>>, vector<1x1x6x128xf32>
    %c0_207 = arith.constant 0 : index
    %c4_208 = arith.constant 4 : index
    %c0_209 = arith.constant 0 : index
    %c0_210 = arith.constant 0 : index
    %489 = vector.load %arg4[%c0_207, %c4_208, %c0_209, %c0_210] : memref<1x8x8x128xf32, #tpu.memory_space<vmem>>, vector<1x1x6x128xf32>
    %c0_211 = arith.constant 0 : index
    %c4_212 = arith.constant 4 : index
    %c1_213 = arith.constant 1 : index
    %c0_214 = arith.constant 0 : index
    %490 = vector.load %arg4[%c0_211, %c4_212, %c1_213, %c0_214] : memref<1x8x8x128xf32, #tpu.memory_space<vmem>>, vector<1x1x6x128xf32>
    %c0_215 = arith.constant 0 : index
    %c4_216 = arith.constant 4 : index
    %c2_217 = arith.constant 2 : index
    %c0_218 = arith.constant 0 : index
    %491 = vector.load %arg4[%c0_215, %c4_216, %c2_217, %c0_218] : memref<1x8x8x128xf32, #tpu.memory_space<vmem>>, vector<1x1x6x128xf32>
    %492 = arith.minimumf %474, %475 : vector<1x1x6x128xf32>
    %493 = arith.maximumf %474, %475 : vector<1x1x6x128xf32>
    %494 = arith.minimumf %476, %477 : vector<1x1x6x128xf32>
    %495 = arith.maximumf %476, %477 : vector<1x1x6x128xf32>
    %496 = arith.minimumf %478, %479 : vector<1x1x6x128xf32>
    %497 = arith.maximumf %478, %479 : vector<1x1x6x128xf32>
    %498 = arith.minimumf %480, %481 : vector<1x1x6x128xf32>
    %499 = arith.maximumf %480, %481 : vector<1x1x6x128xf32>
    %500 = arith.minimumf %482, %483 : vector<1x1x6x128xf32>
    %501 = arith.maximumf %482, %483 : vector<1x1x6x128xf32>
    %502 = arith.minimumf %484, %485 : vector<1x1x6x128xf32>
    %503 = arith.maximumf %484, %485 : vector<1x1x6x128xf32>
    %504 = arith.minimumf %486, %487 : vector<1x1x6x128xf32>
    %505 = arith.maximumf %486, %487 : vector<1x1x6x128xf32>
    %506 = arith.minimumf %488, %489 : vector<1x1x6x128xf32>
    %507 = arith.maximumf %488, %489 : vector<1x1x6x128xf32>
    %508 = arith.minimumf %490, %491 : vector<1x1x6x128xf32>
    %509 = arith.maximumf %490, %491 : vector<1x1x6x128xf32>
    %510 = arith.minimumf %492, %494 : vector<1x1x6x128xf32>
    %511 = arith.maximumf %492, %494 : vector<1x1x6x128xf32>
    %512 = arith.minimumf %510, %496 : vector<1x1x6x128xf32>
    %513 = arith.maximumf %510, %496 : vector<1x1x6x128xf32>
    %514 = arith.minimumf %512, %498 : vector<1x1x6x128xf32>
    %515 = arith.maximumf %512, %498 : vector<1x1x6x128xf32>
    %516 = arith.minimumf %514, %500 : vector<1x1x6x128xf32>
    %517 = arith.maximumf %514, %500 : vector<1x1x6x128xf32>
    %518 = arith.minimumf %516, %502 : vector<1x1x6x128xf32>
    %519 = arith.maximumf %516, %502 : vector<1x1x6x128xf32>
    %520 = arith.minimumf %518, %504 : vector<1x1x6x128xf32>
    %521 = arith.maximumf %518, %504 : vector<1x1x6x128xf32>
    %522 = arith.minimumf %520, %506 : vector<1x1x6x128xf32>
    %523 = arith.maximumf %520, %506 : vector<1x1x6x128xf32>
    %524 = arith.maximumf %522, %508 : vector<1x1x6x128xf32>
    %525 = arith.minimumf %493, %509 : vector<1x1x6x128xf32>
    %526 = arith.maximumf %493, %509 : vector<1x1x6x128xf32>
    %527 = arith.minimumf %495, %526 : vector<1x1x6x128xf32>
    %528 = arith.maximumf %495, %526 : vector<1x1x6x128xf32>
    %529 = arith.minimumf %497, %528 : vector<1x1x6x128xf32>
    %530 = arith.maximumf %497, %528 : vector<1x1x6x128xf32>
    %531 = arith.minimumf %499, %530 : vector<1x1x6x128xf32>
    %532 = arith.maximumf %499, %530 : vector<1x1x6x128xf32>
    %533 = arith.minimumf %501, %532 : vector<1x1x6x128xf32>
    %534 = arith.maximumf %501, %532 : vector<1x1x6x128xf32>
    %535 = arith.minimumf %503, %534 : vector<1x1x6x128xf32>
    %536 = arith.maximumf %503, %534 : vector<1x1x6x128xf32>
    %537 = arith.minimumf %505, %536 : vector<1x1x6x128xf32>
    %538 = arith.maximumf %505, %536 : vector<1x1x6x128xf32>
    %539 = arith.minimumf %507, %538 : vector<1x1x6x128xf32>
    %540 = arith.minimumf %525, %511 : vector<1x1x6x128xf32>
    %541 = arith.maximumf %525, %511 : vector<1x1x6x128xf32>
    %542 = arith.minimumf %527, %513 : vector<1x1x6x128xf32>
    %543 = arith.maximumf %527, %513 : vector<1x1x6x128xf32>
    %544 = arith.minimumf %529, %515 : vector<1x1x6x128xf32>
    %545 = arith.maximumf %529, %515 : vector<1x1x6x128xf32>
    %546 = arith.minimumf %531, %517 : vector<1x1x6x128xf32>
    %547 = arith.maximumf %531, %517 : vector<1x1x6x128xf32>
    %548 = arith.minimumf %533, %519 : vector<1x1x6x128xf32>
    %549 = arith.maximumf %533, %519 : vector<1x1x6x128xf32>
    %550 = arith.minimumf %535, %521 : vector<1x1x6x128xf32>
    %551 = arith.maximumf %535, %521 : vector<1x1x6x128xf32>
    %552 = arith.minimumf %537, %523 : vector<1x1x6x128xf32>
    %553 = arith.maximumf %537, %523 : vector<1x1x6x128xf32>
    %554 = arith.minimumf %539, %524 : vector<1x1x6x128xf32>
    %555 = arith.maximumf %539, %524 : vector<1x1x6x128xf32>
    %556 = arith.minimumf %540, %542 : vector<1x1x6x128xf32>
    %557 = arith.maximumf %540, %542 : vector<1x1x6x128xf32>
    %558 = arith.minimumf %556, %544 : vector<1x1x6x128xf32>
    %559 = arith.maximumf %556, %544 : vector<1x1x6x128xf32>
    %560 = arith.minimumf %558, %546 : vector<1x1x6x128xf32>
    %561 = arith.maximumf %558, %546 : vector<1x1x6x128xf32>
    %562 = arith.minimumf %560, %548 : vector<1x1x6x128xf32>
    %563 = arith.maximumf %560, %548 : vector<1x1x6x128xf32>
    %564 = arith.minimumf %562, %550 : vector<1x1x6x128xf32>
    %565 = arith.maximumf %562, %550 : vector<1x1x6x128xf32>
    %566 = arith.minimumf %564, %552 : vector<1x1x6x128xf32>
    %567 = arith.maximumf %564, %552 : vector<1x1x6x128xf32>
    %568 = arith.maximumf %566, %554 : vector<1x1x6x128xf32>
    %569 = arith.minimumf %541, %555 : vector<1x1x6x128xf32>
    %570 = arith.maximumf %541, %555 : vector<1x1x6x128xf32>
    %571 = arith.minimumf %543, %570 : vector<1x1x6x128xf32>
    %572 = arith.maximumf %543, %570 : vector<1x1x6x128xf32>
    %573 = arith.minimumf %545, %572 : vector<1x1x6x128xf32>
    %574 = arith.maximumf %545, %572 : vector<1x1x6x128xf32>
    %575 = arith.minimumf %547, %574 : vector<1x1x6x128xf32>
    %576 = arith.maximumf %547, %574 : vector<1x1x6x128xf32>
    %577 = arith.minimumf %549, %576 : vector<1x1x6x128xf32>
    %578 = arith.maximumf %549, %576 : vector<1x1x6x128xf32>
    %579 = arith.minimumf %551, %578 : vector<1x1x6x128xf32>
    %580 = arith.maximumf %551, %578 : vector<1x1x6x128xf32>
    %581 = arith.minimumf %553, %580 : vector<1x1x6x128xf32>
    %582 = arith.minimumf %569, %557 : vector<1x1x6x128xf32>
    %583 = arith.maximumf %569, %557 : vector<1x1x6x128xf32>
    %584 = arith.minimumf %571, %559 : vector<1x1x6x128xf32>
    %585 = arith.maximumf %571, %559 : vector<1x1x6x128xf32>
    %586 = arith.minimumf %573, %561 : vector<1x1x6x128xf32>
    %587 = arith.maximumf %573, %561 : vector<1x1x6x128xf32>
    %588 = arith.minimumf %575, %563 : vector<1x1x6x128xf32>
    %589 = arith.maximumf %575, %563 : vector<1x1x6x128xf32>
    %590 = arith.minimumf %577, %565 : vector<1x1x6x128xf32>
    %591 = arith.maximumf %577, %565 : vector<1x1x6x128xf32>
    %592 = arith.minimumf %579, %567 : vector<1x1x6x128xf32>
    %593 = arith.maximumf %579, %567 : vector<1x1x6x128xf32>
    %594 = arith.minimumf %581, %568 : vector<1x1x6x128xf32>
    %595 = arith.maximumf %581, %568 : vector<1x1x6x128xf32>
    %596 = arith.minimumf %582, %584 : vector<1x1x6x128xf32>
    %597 = arith.maximumf %582, %584 : vector<1x1x6x128xf32>
    %598 = arith.minimumf %596, %586 : vector<1x1x6x128xf32>
    %599 = arith.maximumf %596, %586 : vector<1x1x6x128xf32>
    %600 = arith.minimumf %598, %588 : vector<1x1x6x128xf32>
    %601 = arith.maximumf %598, %588 : vector<1x1x6x128xf32>
    %602 = arith.minimumf %600, %590 : vector<1x1x6x128xf32>
    %603 = arith.maximumf %600, %590 : vector<1x1x6x128xf32>
    %604 = arith.minimumf %602, %592 : vector<1x1x6x128xf32>
    %605 = arith.maximumf %602, %592 : vector<1x1x6x128xf32>
    %606 = arith.maximumf %604, %594 : vector<1x1x6x128xf32>
    %607 = arith.minimumf %583, %595 : vector<1x1x6x128xf32>
    %608 = arith.maximumf %583, %595 : vector<1x1x6x128xf32>
    %609 = arith.minimumf %585, %608 : vector<1x1x6x128xf32>
    %610 = arith.maximumf %585, %608 : vector<1x1x6x128xf32>
    %611 = arith.minimumf %587, %610 : vector<1x1x6x128xf32>
    %612 = arith.maximumf %587, %610 : vector<1x1x6x128xf32>
    %613 = arith.minimumf %589, %612 : vector<1x1x6x128xf32>
    %614 = arith.maximumf %589, %612 : vector<1x1x6x128xf32>
    %615 = arith.minimumf %591, %614 : vector<1x1x6x128xf32>
    %616 = arith.maximumf %591, %614 : vector<1x1x6x128xf32>
    %617 = arith.minimumf %593, %616 : vector<1x1x6x128xf32>
    %618 = arith.minimumf %607, %597 : vector<1x1x6x128xf32>
    %619 = arith.maximumf %607, %597 : vector<1x1x6x128xf32>
    %620 = arith.minimumf %609, %599 : vector<1x1x6x128xf32>
    %621 = arith.maximumf %609, %599 : vector<1x1x6x128xf32>
    %622 = arith.minimumf %611, %601 : vector<1x1x6x128xf32>
    %623 = arith.maximumf %611, %601 : vector<1x1x6x128xf32>
    %624 = arith.minimumf %613, %603 : vector<1x1x6x128xf32>
    %625 = arith.maximumf %613, %603 : vector<1x1x6x128xf32>
    %626 = arith.minimumf %615, %605 : vector<1x1x6x128xf32>
    %627 = arith.maximumf %615, %605 : vector<1x1x6x128xf32>
    %628 = arith.minimumf %617, %606 : vector<1x1x6x128xf32>
    %629 = arith.maximumf %617, %606 : vector<1x1x6x128xf32>
    %630 = arith.minimumf %618, %620 : vector<1x1x6x128xf32>
    %631 = arith.maximumf %618, %620 : vector<1x1x6x128xf32>
    %632 = arith.minimumf %630, %622 : vector<1x1x6x128xf32>
    %633 = arith.maximumf %630, %622 : vector<1x1x6x128xf32>
    %634 = arith.minimumf %632, %624 : vector<1x1x6x128xf32>
    %635 = arith.maximumf %632, %624 : vector<1x1x6x128xf32>
    %636 = arith.minimumf %634, %626 : vector<1x1x6x128xf32>
    %637 = arith.maximumf %634, %626 : vector<1x1x6x128xf32>
    %638 = arith.maximumf %636, %628 : vector<1x1x6x128xf32>
    %639 = arith.minimumf %619, %629 : vector<1x1x6x128xf32>
    %640 = arith.maximumf %619, %629 : vector<1x1x6x128xf32>
    %641 = arith.minimumf %621, %640 : vector<1x1x6x128xf32>
    %642 = arith.maximumf %621, %640 : vector<1x1x6x128xf32>
    %643 = arith.minimumf %623, %642 : vector<1x1x6x128xf32>
    %644 = arith.maximumf %623, %642 : vector<1x1x6x128xf32>
    %645 = arith.minimumf %625, %644 : vector<1x1x6x128xf32>
    %646 = arith.maximumf %625, %644 : vector<1x1x6x128xf32>
    %647 = arith.minimumf %627, %646 : vector<1x1x6x128xf32>
    %c0_219 = arith.constant 0 : index
    %c2_220 = arith.constant 2 : index
    %c0_221 = arith.constant 0 : index
    %c0_222 = arith.constant 0 : index
    %648 = vector.load %arg2[%c0_219, %c2_220, %c0_221, %c0_222] : memref<1x8x8x128xf32, #tpu.memory_space<vmem>>, vector<1x1x6x128xf32>
    %649 = arith.minimumf %639, %631 : vector<1x1x6x128xf32>
    %650 = arith.maximumf %639, %631 : vector<1x1x6x128xf32>
    %651 = arith.minimumf %641, %633 : vector<1x1x6x128xf32>
    %652 = arith.maximumf %641, %633 : vector<1x1x6x128xf32>
    %653 = arith.minimumf %643, %635 : vector<1x1x6x128xf32>
    %654 = arith.maximumf %643, %635 : vector<1x1x6x128xf32>
    %655 = arith.minimumf %645, %637 : vector<1x1x6x128xf32>
    %656 = arith.maximumf %645, %637 : vector<1x1x6x128xf32>
    %657 = arith.minimumf %647, %638 : vector<1x1x6x128xf32>
    %658 = arith.maximumf %647, %638 : vector<1x1x6x128xf32>
    %659 = arith.minimumf %649, %651 : vector<1x1x6x128xf32>
    %660 = arith.maximumf %649, %651 : vector<1x1x6x128xf32>
    %661 = arith.minimumf %659, %653 : vector<1x1x6x128xf32>
    %662 = arith.maximumf %659, %653 : vector<1x1x6x128xf32>
    %663 = arith.minimumf %661, %655 : vector<1x1x6x128xf32>
    %664 = arith.maximumf %661, %655 : vector<1x1x6x128xf32>
    %665 = arith.minimumf %663, %657 : vector<1x1x6x128xf32>
    %666 = arith.maximumf %663, %657 : vector<1x1x6x128xf32>
    %667 = arith.maximumf %665, %648 : vector<1x1x6x128xf32>
    %668 = arith.minimumf %650, %667 : vector<1x1x6x128xf32>
    %669 = arith.maximumf %650, %667 : vector<1x1x6x128xf32>
    %670 = arith.minimumf %652, %669 : vector<1x1x6x128xf32>
    %671 = arith.maximumf %652, %669 : vector<1x1x6x128xf32>
    %672 = arith.minimumf %654, %671 : vector<1x1x6x128xf32>
    %673 = arith.maximumf %654, %671 : vector<1x1x6x128xf32>
    %674 = arith.minimumf %656, %673 : vector<1x1x6x128xf32>
    %675 = arith.maximumf %656, %673 : vector<1x1x6x128xf32>
    %676 = arith.minimumf %658, %675 : vector<1x1x6x128xf32>
    %c0_223 = arith.constant 0 : index
    %c2_224 = arith.constant 2 : index
    %c1_225 = arith.constant 1 : index
    %c0_226 = arith.constant 0 : index
    %677 = vector.load %arg2[%c0_223, %c2_224, %c1_225, %c0_226] : memref<1x8x8x128xf32, #tpu.memory_space<vmem>>, vector<1x1x6x128xf32>
    %678 = arith.minimumf %668, %660 : vector<1x1x6x128xf32>
    %679 = arith.maximumf %668, %660 : vector<1x1x6x128xf32>
    %680 = arith.minimumf %670, %662 : vector<1x1x6x128xf32>
    %681 = arith.maximumf %670, %662 : vector<1x1x6x128xf32>
    %682 = arith.minimumf %672, %664 : vector<1x1x6x128xf32>
    %683 = arith.maximumf %672, %664 : vector<1x1x6x128xf32>
    %684 = arith.minimumf %674, %666 : vector<1x1x6x128xf32>
    %685 = arith.maximumf %674, %666 : vector<1x1x6x128xf32>
    %686 = arith.minimumf %676, %677 : vector<1x1x6x128xf32>
    %687 = arith.maximumf %676, %677 : vector<1x1x6x128xf32>
    %688 = arith.minimumf %678, %680 : vector<1x1x6x128xf32>
    %689 = arith.maximumf %678, %680 : vector<1x1x6x128xf32>
    %690 = arith.minimumf %688, %682 : vector<1x1x6x128xf32>
    %691 = arith.maximumf %688, %682 : vector<1x1x6x128xf32>
    %692 = arith.minimumf %690, %684 : vector<1x1x6x128xf32>
    %693 = arith.maximumf %690, %684 : vector<1x1x6x128xf32>
    %694 = arith.maximumf %692, %686 : vector<1x1x6x128xf32>
    %695 = arith.minimumf %679, %687 : vector<1x1x6x128xf32>
    %696 = arith.maximumf %679, %687 : vector<1x1x6x128xf32>
    %697 = arith.minimumf %681, %696 : vector<1x1x6x128xf32>
    %698 = arith.maximumf %681, %696 : vector<1x1x6x128xf32>
    %699 = arith.minimumf %683, %698 : vector<1x1x6x128xf32>
    %700 = arith.maximumf %683, %698 : vector<1x1x6x128xf32>
    %701 = arith.minimumf %685, %700 : vector<1x1x6x128xf32>
    %c0_227 = arith.constant 0 : index
    %c2_228 = arith.constant 2 : index
    %c2_229 = arith.constant 2 : index
    %c0_230 = arith.constant 0 : index
    %702 = vector.load %arg2[%c0_227, %c2_228, %c2_229, %c0_230] : memref<1x8x8x128xf32, #tpu.memory_space<vmem>>, vector<1x1x6x128xf32>
    %703 = arith.minimumf %695, %689 : vector<1x1x6x128xf32>
    %704 = arith.maximumf %695, %689 : vector<1x1x6x128xf32>
    %705 = arith.minimumf %697, %691 : vector<1x1x6x128xf32>
    %706 = arith.maximumf %697, %691 : vector<1x1x6x128xf32>
    %707 = arith.minimumf %699, %693 : vector<1x1x6x128xf32>
    %708 = arith.maximumf %699, %693 : vector<1x1x6x128xf32>
    %709 = arith.minimumf %701, %694 : vector<1x1x6x128xf32>
    %710 = arith.maximumf %701, %694 : vector<1x1x6x128xf32>
    %711 = arith.minimumf %703, %705 : vector<1x1x6x128xf32>
    %712 = arith.maximumf %703, %705 : vector<1x1x6x128xf32>
    %713 = arith.minimumf %711, %707 : vector<1x1x6x128xf32>
    %714 = arith.maximumf %711, %707 : vector<1x1x6x128xf32>
    %715 = arith.minimumf %713, %709 : vector<1x1x6x128xf32>
    %716 = arith.maximumf %713, %709 : vector<1x1x6x128xf32>
    %717 = arith.maximumf %715, %702 : vector<1x1x6x128xf32>
    %718 = arith.minimumf %704, %717 : vector<1x1x6x128xf32>
    %719 = arith.maximumf %704, %717 : vector<1x1x6x128xf32>
    %720 = arith.minimumf %706, %719 : vector<1x1x6x128xf32>
    %721 = arith.maximumf %706, %719 : vector<1x1x6x128xf32>
    %722 = arith.minimumf %708, %721 : vector<1x1x6x128xf32>
    %723 = arith.maximumf %708, %721 : vector<1x1x6x128xf32>
    %724 = arith.minimumf %710, %723 : vector<1x1x6x128xf32>
    %c0_231 = arith.constant 0 : index
    %c2_232 = arith.constant 2 : index
    %c0_233 = arith.constant 0 : index
    %c0_234 = arith.constant 0 : index
    %725 = vector.load %arg3[%c0_231, %c2_232, %c0_233, %c0_234] : memref<1x8x8x128xf32, #tpu.memory_space<vmem>>, vector<1x1x6x128xf32>
    %726 = arith.minimumf %718, %712 : vector<1x1x6x128xf32>
    %727 = arith.maximumf %718, %712 : vector<1x1x6x128xf32>
    %728 = arith.minimumf %720, %714 : vector<1x1x6x128xf32>
    %729 = arith.maximumf %720, %714 : vector<1x1x6x128xf32>
    %730 = arith.minimumf %722, %716 : vector<1x1x6x128xf32>
    %731 = arith.maximumf %722, %716 : vector<1x1x6x128xf32>
    %732 = arith.minimumf %724, %725 : vector<1x1x6x128xf32>
    %733 = arith.maximumf %724, %725 : vector<1x1x6x128xf32>
    %734 = arith.minimumf %726, %728 : vector<1x1x6x128xf32>
    %735 = arith.maximumf %726, %728 : vector<1x1x6x128xf32>
    %736 = arith.minimumf %734, %730 : vector<1x1x6x128xf32>
    %737 = arith.maximumf %734, %730 : vector<1x1x6x128xf32>
    %738 = arith.maximumf %736, %732 : vector<1x1x6x128xf32>
    %739 = arith.minimumf %727, %733 : vector<1x1x6x128xf32>
    %740 = arith.maximumf %727, %733 : vector<1x1x6x128xf32>
    %741 = arith.minimumf %729, %740 : vector<1x1x6x128xf32>
    %742 = arith.maximumf %729, %740 : vector<1x1x6x128xf32>
    %743 = arith.minimumf %731, %742 : vector<1x1x6x128xf32>
    %c0_235 = arith.constant 0 : index
    %c2_236 = arith.constant 2 : index
    %c1_237 = arith.constant 1 : index
    %c0_238 = arith.constant 0 : index
    %744 = vector.load %arg3[%c0_235, %c2_236, %c1_237, %c0_238] : memref<1x8x8x128xf32, #tpu.memory_space<vmem>>, vector<1x1x6x128xf32>
    %745 = arith.minimumf %739, %735 : vector<1x1x6x128xf32>
    %746 = arith.maximumf %739, %735 : vector<1x1x6x128xf32>
    %747 = arith.minimumf %741, %737 : vector<1x1x6x128xf32>
    %748 = arith.maximumf %741, %737 : vector<1x1x6x128xf32>
    %749 = arith.minimumf %743, %738 : vector<1x1x6x128xf32>
    %750 = arith.maximumf %743, %738 : vector<1x1x6x128xf32>
    %751 = arith.minimumf %745, %747 : vector<1x1x6x128xf32>
    %752 = arith.maximumf %745, %747 : vector<1x1x6x128xf32>
    %753 = arith.minimumf %751, %749 : vector<1x1x6x128xf32>
    %754 = arith.maximumf %751, %749 : vector<1x1x6x128xf32>
    %755 = arith.maximumf %753, %744 : vector<1x1x6x128xf32>
    %756 = arith.minimumf %746, %755 : vector<1x1x6x128xf32>
    %757 = arith.maximumf %746, %755 : vector<1x1x6x128xf32>
    %758 = arith.minimumf %748, %757 : vector<1x1x6x128xf32>
    %759 = arith.maximumf %748, %757 : vector<1x1x6x128xf32>
    %760 = arith.minimumf %750, %759 : vector<1x1x6x128xf32>
    %c0_239 = arith.constant 0 : index
    %c2_240 = arith.constant 2 : index
    %c2_241 = arith.constant 2 : index
    %c0_242 = arith.constant 0 : index
    %761 = vector.load %arg3[%c0_239, %c2_240, %c2_241, %c0_242] : memref<1x8x8x128xf32, #tpu.memory_space<vmem>>, vector<1x1x6x128xf32>
    %762 = arith.minimumf %756, %752 : vector<1x1x6x128xf32>
    %763 = arith.maximumf %756, %752 : vector<1x1x6x128xf32>
    %764 = arith.minimumf %758, %754 : vector<1x1x6x128xf32>
    %765 = arith.maximumf %758, %754 : vector<1x1x6x128xf32>
    %766 = arith.minimumf %760, %761 : vector<1x1x6x128xf32>
    %767 = arith.maximumf %760, %761 : vector<1x1x6x128xf32>
    %768 = arith.minimumf %762, %764 : vector<1x1x6x128xf32>
    %769 = arith.maximumf %762, %764 : vector<1x1x6x128xf32>
    %770 = arith.maximumf %768, %766 : vector<1x1x6x128xf32>
    %771 = arith.minimumf %763, %767 : vector<1x1x6x128xf32>
    %772 = arith.maximumf %763, %767 : vector<1x1x6x128xf32>
    %773 = arith.minimumf %765, %772 : vector<1x1x6x128xf32>
    %c0_243 = arith.constant 0 : index
    %c2_244 = arith.constant 2 : index
    %c0_245 = arith.constant 0 : index
    %c0_246 = arith.constant 0 : index
    %774 = vector.load %arg4[%c0_243, %c2_244, %c0_245, %c0_246] : memref<1x8x8x128xf32, #tpu.memory_space<vmem>>, vector<1x1x6x128xf32>
    %775 = arith.minimumf %771, %769 : vector<1x1x6x128xf32>
    %776 = arith.maximumf %771, %769 : vector<1x1x6x128xf32>
    %777 = arith.minimumf %773, %770 : vector<1x1x6x128xf32>
    %778 = arith.maximumf %773, %770 : vector<1x1x6x128xf32>
    %779 = arith.minimumf %775, %777 : vector<1x1x6x128xf32>
    %780 = arith.maximumf %775, %777 : vector<1x1x6x128xf32>
    %781 = arith.maximumf %779, %774 : vector<1x1x6x128xf32>
    %782 = arith.minimumf %776, %781 : vector<1x1x6x128xf32>
    %783 = arith.maximumf %776, %781 : vector<1x1x6x128xf32>
    %784 = arith.minimumf %778, %783 : vector<1x1x6x128xf32>
    %c0_247 = arith.constant 0 : index
    %c2_248 = arith.constant 2 : index
    %c1_249 = arith.constant 1 : index
    %c0_250 = arith.constant 0 : index
    %785 = vector.load %arg4[%c0_247, %c2_248, %c1_249, %c0_250] : memref<1x8x8x128xf32, #tpu.memory_space<vmem>>, vector<1x1x6x128xf32>
    %786 = arith.minimumf %782, %780 : vector<1x1x6x128xf32>
    %787 = arith.maximumf %782, %780 : vector<1x1x6x128xf32>
    %788 = arith.minimumf %784, %785 : vector<1x1x6x128xf32>
    %789 = arith.maximumf %784, %785 : vector<1x1x6x128xf32>
    %790 = arith.maximumf %786, %788 : vector<1x1x6x128xf32>
    %791 = arith.minimumf %787, %789 : vector<1x1x6x128xf32>
    %c0_251 = arith.constant 0 : index
    %c2_252 = arith.constant 2 : index
    %c2_253 = arith.constant 2 : index
    %c0_254 = arith.constant 0 : index
    %792 = vector.load %arg4[%c0_251, %c2_252, %c2_253, %c0_254] : memref<1x8x8x128xf32, #tpu.memory_space<vmem>>, vector<1x1x6x128xf32>
    %793 = arith.minimumf %791, %790 : vector<1x1x6x128xf32>
    %794 = arith.maximumf %791, %790 : vector<1x1x6x128xf32>
    %795 = arith.maximumf %793, %792 : vector<1x1x6x128xf32>
    %796 = arith.minimumf %794, %795 : vector<1x1x6x128xf32>
    %c0_255 = arith.constant 0 : index
    %c2_256 = arith.constant 2 : index
    %c0_257 = arith.constant 0 : index
    %c0_258 = arith.constant 0 : index
    %797 = vector.load %arg5[%c0_255, %c2_256, %c0_257, %c0_258] : memref<1x6x6x128xf32, #tpu.memory_space<vmem>>, vector<1x1x6x128xf32>
    tpu.vector_store %arg5[%c0_255, %c2_256, %c0_257, %c0_258], %796 {strides = array<i32>} : memref<1x6x6x128xf32, #tpu.memory_space<vmem>>, vector<1x1x6x128xf32>,
    %c0_259 = arith.constant 0 : index
    %c5 = arith.constant 5 : index
    %c0_260 = arith.constant 0 : index
    %c0_261 = arith.constant 0 : index
    %798 = vector.load %arg2[%c0_259, %c5, %c0_260, %c0_261] : memref<1x8x8x128xf32, #tpu.memory_space<vmem>>, vector<1x1x6x128xf32>
    %799 = arith.minimumf %639, %631 : vector<1x1x6x128xf32>
    %800 = arith.maximumf %639, %631 : vector<1x1x6x128xf32>
    %801 = arith.minimumf %641, %633 : vector<1x1x6x128xf32>
    %802 = arith.maximumf %641, %633 : vector<1x1x6x128xf32>
    %803 = arith.minimumf %643, %635 : vector<1x1x6x128xf32>
    %804 = arith.maximumf %643, %635 : vector<1x1x6x128xf32>
    %805 = arith.minimumf %645, %637 : vector<1x1x6x128xf32>
    %806 = arith.maximumf %645, %637 : vector<1x1x6x128xf32>
    %807 = arith.minimumf %647, %638 : vector<1x1x6x128xf32>
    %808 = arith.maximumf %647, %638 : vector<1x1x6x128xf32>
    %809 = arith.minimumf %799, %801 : vector<1x1x6x128xf32>
    %810 = arith.maximumf %799, %801 : vector<1x1x6x128xf32>
    %811 = arith.minimumf %809, %803 : vector<1x1x6x128xf32>
    %812 = arith.maximumf %809, %803 : vector<1x1x6x128xf32>
    %813 = arith.minimumf %811, %805 : vector<1x1x6x128xf32>
    %814 = arith.maximumf %811, %805 : vector<1x1x6x128xf32>
    %815 = arith.minimumf %813, %807 : vector<1x1x6x128xf32>
    %816 = arith.maximumf %813, %807 : vector<1x1x6x128xf32>
    %817 = arith.maximumf %815, %798 : vector<1x1x6x128xf32>
    %818 = arith.minimumf %800, %817 : vector<1x1x6x128xf32>
    %819 = arith.maximumf %800, %817 : vector<1x1x6x128xf32>
    %820 = arith.minimumf %802, %819 : vector<1x1x6x128xf32>
    %821 = arith.maximumf %802, %819 : vector<1x1x6x128xf32>
    %822 = arith.minimumf %804, %821 : vector<1x1x6x128xf32>
    %823 = arith.maximumf %804, %821 : vector<1x1x6x128xf32>
    %824 = arith.minimumf %806, %823 : vector<1x1x6x128xf32>
    %825 = arith.maximumf %806, %823 : vector<1x1x6x128xf32>
    %826 = arith.minimumf %808, %825 : vector<1x1x6x128xf32>
    %c0_262 = arith.constant 0 : index
    %c5_263 = arith.constant 5 : index
    %c1_264 = arith.constant 1 : index
    %c0_265 = arith.constant 0 : index
    %827 = vector.load %arg2[%c0_262, %c5_263, %c1_264, %c0_265] : memref<1x8x8x128xf32, #tpu.memory_space<vmem>>, vector<1x1x6x128xf32>
    %828 = arith.minimumf %818, %810 : vector<1x1x6x128xf32>
    %829 = arith.maximumf %818, %810 : vector<1x1x6x128xf32>
    %830 = arith.minimumf %820, %812 : vector<1x1x6x128xf32>
    %831 = arith.maximumf %820, %812 : vector<1x1x6x128xf32>
    %832 = arith.minimumf %822, %814 : vector<1x1x6x128xf32>
    %833 = arith.maximumf %822, %814 : vector<1x1x6x128xf32>
    %834 = arith.minimumf %824, %816 : vector<1x1x6x128xf32>
    %835 = arith.maximumf %824, %816 : vector<1x1x6x128xf32>
    %836 = arith.minimumf %826, %827 : vector<1x1x6x128xf32>
    %837 = arith.maximumf %826, %827 : vector<1x1x6x128xf32>
    %838 = arith.minimumf %828, %830 : vector<1x1x6x128xf32>
    %839 = arith.maximumf %828, %830 : vector<1x1x6x128xf32>
    %840 = arith.minimumf %838, %832 : vector<1x1x6x128xf32>
    %841 = arith.maximumf %838, %832 : vector<1x1x6x128xf32>
    %842 = arith.minimumf %840, %834 : vector<1x1x6x128xf32>
    %843 = arith.maximumf %840, %834 : vector<1x1x6x128xf32>
    %844 = arith.maximumf %842, %836 : vector<1x1x6x128xf32>
    %845 = arith.minimumf %829, %837 : vector<1x1x6x128xf32>
    %846 = arith.maximumf %829, %837 : vector<1x1x6x128xf32>
    %847 = arith.minimumf %831, %846 : vector<1x1x6x128xf32>
    %848 = arith.maximumf %831, %846 : vector<1x1x6x128xf32>
    %849 = arith.minimumf %833, %848 : vector<1x1x6x128xf32>
    %850 = arith.maximumf %833, %848 : vector<1x1x6x128xf32>
    %851 = arith.minimumf %835, %850 : vector<1x1x6x128xf32>
    %c0_266 = arith.constant 0 : index
    %c5_267 = arith.constant 5 : index
    %c2_268 = arith.constant 2 : index
    %c0_269 = arith.constant 0 : index
    %852 = vector.load %arg2[%c0_266, %c5_267, %c2_268, %c0_269] : memref<1x8x8x128xf32, #tpu.memory_space<vmem>>, vector<1x1x6x128xf32>
    %853 = arith.minimumf %845, %839 : vector<1x1x6x128xf32>
    %854 = arith.maximumf %845, %839 : vector<1x1x6x128xf32>
    %855 = arith.minimumf %847, %841 : vector<1x1x6x128xf32>
    %856 = arith.maximumf %847, %841 : vector<1x1x6x128xf32>
    %857 = arith.minimumf %849, %843 : vector<1x1x6x128xf32>
    %858 = arith.maximumf %849, %843 : vector<1x1x6x128xf32>
    %859 = arith.minimumf %851, %844 : vector<1x1x6x128xf32>
    %860 = arith.maximumf %851, %844 : vector<1x1x6x128xf32>
    %861 = arith.minimumf %853, %855 : vector<1x1x6x128xf32>
    %862 = arith.maximumf %853, %855 : vector<1x1x6x128xf32>
    %863 = arith.minimumf %861, %857 : vector<1x1x6x128xf32>
    %864 = arith.maximumf %861, %857 : vector<1x1x6x128xf32>
    %865 = arith.minimumf %863, %859 : vector<1x1x6x128xf32>
    %866 = arith.maximumf %863, %859 : vector<1x1x6x128xf32>
    %867 = arith.maximumf %865, %852 : vector<1x1x6x128xf32>
    %868 = arith.minimumf %854, %867 : vector<1x1x6x128xf32>
    %869 = arith.maximumf %854, %867 : vector<1x1x6x128xf32>
    %870 = arith.minimumf %856, %869 : vector<1x1x6x128xf32>
    %871 = arith.maximumf %856, %869 : vector<1x1x6x128xf32>
    %872 = arith.minimumf %858, %871 : vector<1x1x6x128xf32>
    %873 = arith.maximumf %858, %871 : vector<1x1x6x128xf32>
    %874 = arith.minimumf %860, %873 : vector<1x1x6x128xf32>
    %c0_270 = arith.constant 0 : index
    %c5_271 = arith.constant 5 : index
    %c0_272 = arith.constant 0 : index
    %c0_273 = arith.constant 0 : index
    %875 = vector.load %arg3[%c0_270, %c5_271, %c0_272, %c0_273] : memref<1x8x8x128xf32, #tpu.memory_space<vmem>>, vector<1x1x6x128xf32>
    %876 = arith.minimumf %868, %862 : vector<1x1x6x128xf32>
    %877 = arith.maximumf %868, %862 : vector<1x1x6x128xf32>
    %878 = arith.minimumf %870, %864 : vector<1x1x6x128xf32>
    %879 = arith.maximumf %870, %864 : vector<1x1x6x128xf32>
    %880 = arith.minimumf %872, %866 : vector<1x1x6x128xf32>
    %881 = arith.maximumf %872, %866 : vector<1x1x6x128xf32>
    %882 = arith.minimumf %874, %875 : vector<1x1x6x128xf32>
    %883 = arith.maximumf %874, %875 : vector<1x1x6x128xf32>
    %884 = arith.minimumf %876, %878 : vector<1x1x6x128xf32>
    %885 = arith.maximumf %876, %878 : vector<1x1x6x128xf32>
    %886 = arith.minimumf %884, %880 : vector<1x1x6x128xf32>
    %887 = arith.maximumf %884, %880 : vector<1x1x6x128xf32>
    %888 = arith.maximumf %886, %882 : vector<1x1x6x128xf32>
    %889 = arith.minimumf %877, %883 : vector<1x1x6x128xf32>
    %890 = arith.maximumf %877, %883 : vector<1x1x6x128xf32>
    %891 = arith.minimumf %879, %890 : vector<1x1x6x128xf32>
    %892 = arith.maximumf %879, %890 : vector<1x1x6x128xf32>
    %893 = arith.minimumf %881, %892 : vector<1x1x6x128xf32>
    %c0_274 = arith.constant 0 : index
    %c5_275 = arith.constant 5 : index
    %c1_276 = arith.constant 1 : index
    %c0_277 = arith.constant 0 : index
    %894 = vector.load %arg3[%c0_274, %c5_275, %c1_276, %c0_277] : memref<1x8x8x128xf32, #tpu.memory_space<vmem>>, vector<1x1x6x128xf32>
    %895 = arith.minimumf %889, %885 : vector<1x1x6x128xf32>
    %896 = arith.maximumf %889, %885 : vector<1x1x6x128xf32>
    %897 = arith.minimumf %891, %887 : vector<1x1x6x128xf32>
    %898 = arith.maximumf %891, %887 : vector<1x1x6x128xf32>
    %899 = arith.minimumf %893, %888 : vector<1x1x6x128xf32>
    %900 = arith.maximumf %893, %888 : vector<1x1x6x128xf32>
    %901 = arith.minimumf %895, %897 : vector<1x1x6x128xf32>
    %902 = arith.maximumf %895, %897 : vector<1x1x6x128xf32>
    %903 = arith.minimumf %901, %899 : vector<1x1x6x128xf32>
    %904 = arith.maximumf %901, %899 : vector<1x1x6x128xf32>
    %905 = arith.maximumf %903, %894 : vector<1x1x6x128xf32>
    %906 = arith.minimumf %896, %905 : vector<1x1x6x128xf32>
    %907 = arith.maximumf %896, %905 : vector<1x1x6x128xf32>
    %908 = arith.minimumf %898, %907 : vector<1x1x6x128xf32>
    %909 = arith.maximumf %898, %907 : vector<1x1x6x128xf32>
    %910 = arith.minimumf %900, %909 : vector<1x1x6x128xf32>
    %c0_278 = arith.constant 0 : index
    %c5_279 = arith.constant 5 : index
    %c2_280 = arith.constant 2 : index
    %c0_281 = arith.constant 0 : index
    %911 = vector.load %arg3[%c0_278, %c5_279, %c2_280, %c0_281] : memref<1x8x8x128xf32, #tpu.memory_space<vmem>>, vector<1x1x6x128xf32>
    %912 = arith.minimumf %906, %902 : vector<1x1x6x128xf32>
    %913 = arith.maximumf %906, %902 : vector<1x1x6x128xf32>
    %914 = arith.minimumf %908, %904 : vector<1x1x6x128xf32>
    %915 = arith.maximumf %908, %904 : vector<1x1x6x128xf32>
    %916 = arith.minimumf %910, %911 : vector<1x1x6x128xf32>
    %917 = arith.maximumf %910, %911 : vector<1x1x6x128xf32>
    %918 = arith.minimumf %912, %914 : vector<1x1x6x128xf32>
    %919 = arith.maximumf %912, %914 : vector<1x1x6x128xf32>
    %920 = arith.maximumf %918, %916 : vector<1x1x6x128xf32>
    %921 = arith.minimumf %913, %917 : vector<1x1x6x128xf32>
    %922 = arith.maximumf %913, %917 : vector<1x1x6x128xf32>
    %923 = arith.minimumf %915, %922 : vector<1x1x6x128xf32>
    %c0_282 = arith.constant 0 : index
    %c5_283 = arith.constant 5 : index
    %c0_284 = arith.constant 0 : index
    %c0_285 = arith.constant 0 : index
    %924 = vector.load %arg4[%c0_282, %c5_283, %c0_284, %c0_285] : memref<1x8x8x128xf32, #tpu.memory_space<vmem>>, vector<1x1x6x128xf32>
    %925 = arith.minimumf %921, %919 : vector<1x1x6x128xf32>
    %926 = arith.maximumf %921, %919 : vector<1x1x6x128xf32>
    %927 = arith.minimumf %923, %920 : vector<1x1x6x128xf32>
    %928 = arith.maximumf %923, %920 : vector<1x1x6x128xf32>
    %929 = arith.minimumf %925, %927 : vector<1x1x6x128xf32>
    %930 = arith.maximumf %925, %927 : vector<1x1x6x128xf32>
    %931 = arith.maximumf %929, %924 : vector<1x1x6x128xf32>
    %932 = arith.minimumf %926, %931 : vector<1x1x6x128xf32>
    %933 = arith.maximumf %926, %931 : vector<1x1x6x128xf32>
    %934 = arith.minimumf %928, %933 : vector<1x1x6x128xf32>
    %c0_286 = arith.constant 0 : index
    %c5_287 = arith.constant 5 : index
    %c1_288 = arith.constant 1 : index
    %c0_289 = arith.constant 0 : index
    %935 = vector.load %arg4[%c0_286, %c5_287, %c1_288, %c0_289] : memref<1x8x8x128xf32, #tpu.memory_space<vmem>>, vector<1x1x6x128xf32>
    %936 = arith.minimumf %932, %930 : vector<1x1x6x128xf32>
    %937 = arith.maximumf %932, %930 : vector<1x1x6x128xf32>
    %938 = arith.minimumf %934, %935 : vector<1x1x6x128xf32>
    %939 = arith.maximumf %934, %935 : vector<1x1x6x128xf32>
    %940 = arith.maximumf %936, %938 : vector<1x1x6x128xf32>
    %941 = arith.minimumf %937, %939 : vector<1x1x6x128xf32>
    %c0_290 = arith.constant 0 : index
    %c5_291 = arith.constant 5 : index
    %c2_292 = arith.constant 2 : index
    %c0_293 = arith.constant 0 : index
    %942 = vector.load %arg4[%c0_290, %c5_291, %c2_292, %c0_293] : memref<1x8x8x128xf32, #tpu.memory_space<vmem>>, vector<1x1x6x128xf32>
    %943 = arith.minimumf %941, %940 : vector<1x1x6x128xf32>
    %944 = arith.maximumf %941, %940 : vector<1x1x6x128xf32>
    %945 = arith.maximumf %943, %942 : vector<1x1x6x128xf32>
    %946 = arith.minimumf %944, %945 : vector<1x1x6x128xf32>
    %c0_294 = arith.constant 0 : index
    %c3_295 = arith.constant 3 : index
    %c0_296 = arith.constant 0 : index
    %c0_297 = arith.constant 0 : index
    %947 = vector.load %arg5[%c0_294, %c3_295, %c0_296, %c0_297] : memref<1x6x6x128xf32, #tpu.memory_space<vmem>>, vector<1x1x6x128xf32>
    tpu.vector_store %arg5[%c0_294, %c3_295, %c0_296, %c0_297], %946 {strides = array<i32>} : memref<1x6x6x128xf32, #tpu.memory_space<vmem>>, vector<1x1x6x128xf32>,
    %c0_298 = arith.constant 0 : index
    %c5_299 = arith.constant 5 : index
    %c0_300 = arith.constant 0 : index
    %c0_301 = arith.constant 0 : index
    %948 = vector.load %arg2[%c0_298, %c5_299, %c0_300, %c0_301] : memref<1x8x8x128xf32, #tpu.memory_space<vmem>>, vector<1x1x6x128xf32>
    %c0_302 = arith.constant 0 : index
    %c5_303 = arith.constant 5 : index
    %c1_304 = arith.constant 1 : index
    %c0_305 = arith.constant 0 : index
    %949 = vector.load %arg2[%c0_302, %c5_303, %c1_304, %c0_305] : memref<1x8x8x128xf32, #tpu.memory_space<vmem>>, vector<1x1x6x128xf32>
    %c0_306 = arith.constant 0 : index
    %c5_307 = arith.constant 5 : index
    %c2_308 = arith.constant 2 : index
    %c0_309 = arith.constant 0 : index
    %950 = vector.load %arg2[%c0_306, %c5_307, %c2_308, %c0_309] : memref<1x8x8x128xf32, #tpu.memory_space<vmem>>, vector<1x1x6x128xf32>
    %c0_310 = arith.constant 0 : index
    %c6 = arith.constant 6 : index
    %c0_311 = arith.constant 0 : index
    %c0_312 = arith.constant 0 : index
    %951 = vector.load %arg2[%c0_310, %c6, %c0_311, %c0_312] : memref<1x8x8x128xf32, #tpu.memory_space<vmem>>, vector<1x1x6x128xf32>
    %c0_313 = arith.constant 0 : index
    %c6_314 = arith.constant 6 : index
    %c1_315 = arith.constant 1 : index
    %c0_316 = arith.constant 0 : index
    %952 = vector.load %arg2[%c0_313, %c6_314, %c1_315, %c0_316] : memref<1x8x8x128xf32, #tpu.memory_space<vmem>>, vector<1x1x6x128xf32>
    %c0_317 = arith.constant 0 : index
    %c6_318 = arith.constant 6 : index
    %c2_319 = arith.constant 2 : index
    %c0_320 = arith.constant 0 : index
    %953 = vector.load %arg2[%c0_317, %c6_318, %c2_319, %c0_320] : memref<1x8x8x128xf32, #tpu.memory_space<vmem>>, vector<1x1x6x128xf32>
    %c0_321 = arith.constant 0 : index
    %c5_322 = arith.constant 5 : index
    %c0_323 = arith.constant 0 : index
    %c0_324 = arith.constant 0 : index
    %954 = vector.load %arg3[%c0_321, %c5_322, %c0_323, %c0_324] : memref<1x8x8x128xf32, #tpu.memory_space<vmem>>, vector<1x1x6x128xf32>
    %c0_325 = arith.constant 0 : index
    %c5_326 = arith.constant 5 : index
    %c1_327 = arith.constant 1 : index
    %c0_328 = arith.constant 0 : index
    %955 = vector.load %arg3[%c0_325, %c5_326, %c1_327, %c0_328] : memref<1x8x8x128xf32, #tpu.memory_space<vmem>>, vector<1x1x6x128xf32>
    %c0_329 = arith.constant 0 : index
    %c5_330 = arith.constant 5 : index
    %c2_331 = arith.constant 2 : index
    %c0_332 = arith.constant 0 : index
    %956 = vector.load %arg3[%c0_329, %c5_330, %c2_331, %c0_332] : memref<1x8x8x128xf32, #tpu.memory_space<vmem>>, vector<1x1x6x128xf32>
    %c0_333 = arith.constant 0 : index
    %c6_334 = arith.constant 6 : index
    %c0_335 = arith.constant 0 : index
    %c0_336 = arith.constant 0 : index
    %957 = vector.load %arg3[%c0_333, %c6_334, %c0_335, %c0_336] : memref<1x8x8x128xf32, #tpu.memory_space<vmem>>, vector<1x1x6x128xf32>
    %c0_337 = arith.constant 0 : index
    %c6_338 = arith.constant 6 : index
    %c1_339 = arith.constant 1 : index
    %c0_340 = arith.constant 0 : index
    %958 = vector.load %arg3[%c0_337, %c6_338, %c1_339, %c0_340] : memref<1x8x8x128xf32, #tpu.memory_space<vmem>>, vector<1x1x6x128xf32>
    %c0_341 = arith.constant 0 : index
    %c6_342 = arith.constant 6 : index
    %c2_343 = arith.constant 2 : index
    %c0_344 = arith.constant 0 : index
    %959 = vector.load %arg3[%c0_341, %c6_342, %c2_343, %c0_344] : memref<1x8x8x128xf32, #tpu.memory_space<vmem>>, vector<1x1x6x128xf32>
    %c0_345 = arith.constant 0 : index
    %c5_346 = arith.constant 5 : index
    %c0_347 = arith.constant 0 : index
    %c0_348 = arith.constant 0 : index
    %960 = vector.load %arg4[%c0_345, %c5_346, %c0_347, %c0_348] : memref<1x8x8x128xf32, #tpu.memory_space<vmem>>, vector<1x1x6x128xf32>
    %c0_349 = arith.constant 0 : index
    %c5_350 = arith.constant 5 : index
    %c1_351 = arith.constant 1 : index
    %c0_352 = arith.constant 0 : index
    %961 = vector.load %arg4[%c0_349, %c5_350, %c1_351, %c0_352] : memref<1x8x8x128xf32, #tpu.memory_space<vmem>>, vector<1x1x6x128xf32>
    %c0_353 = arith.constant 0 : index
    %c5_354 = arith.constant 5 : index
    %c2_355 = arith.constant 2 : index
    %c0_356 = arith.constant 0 : index
    %962 = vector.load %arg4[%c0_353, %c5_354, %c2_355, %c0_356] : memref<1x8x8x128xf32, #tpu.memory_space<vmem>>, vector<1x1x6x128xf32>
    %c0_357 = arith.constant 0 : index
    %c6_358 = arith.constant 6 : index
    %c0_359 = arith.constant 0 : index
    %c0_360 = arith.constant 0 : index
    %963 = vector.load %arg4[%c0_357, %c6_358, %c0_359, %c0_360] : memref<1x8x8x128xf32, #tpu.memory_space<vmem>>, vector<1x1x6x128xf32>
    %c0_361 = arith.constant 0 : index
    %c6_362 = arith.constant 6 : index
    %c1_363 = arith.constant 1 : index
    %c0_364 = arith.constant 0 : index
    %964 = vector.load %arg4[%c0_361, %c6_362, %c1_363, %c0_364] : memref<1x8x8x128xf32, #tpu.memory_space<vmem>>, vector<1x1x6x128xf32>
    %c0_365 = arith.constant 0 : index
    %c6_366 = arith.constant 6 : index
    %c2_367 = arith.constant 2 : index
    %c0_368 = arith.constant 0 : index
    %965 = vector.load %arg4[%c0_365, %c6_366, %c2_367, %c0_368] : memref<1x8x8x128xf32, #tpu.memory_space<vmem>>, vector<1x1x6x128xf32>
    %966 = arith.minimumf %948, %949 : vector<1x1x6x128xf32>
    %967 = arith.maximumf %948, %949 : vector<1x1x6x128xf32>
    %968 = arith.minimumf %950, %951 : vector<1x1x6x128xf32>
    %969 = arith.maximumf %950, %951 : vector<1x1x6x128xf32>
    %970 = arith.minimumf %952, %953 : vector<1x1x6x128xf32>
    %971 = arith.maximumf %952, %953 : vector<1x1x6x128xf32>
    %972 = arith.minimumf %954, %955 : vector<1x1x6x128xf32>
    %973 = arith.maximumf %954, %955 : vector<1x1x6x128xf32>
    %974 = arith.minimumf %956, %957 : vector<1x1x6x128xf32>
    %975 = arith.maximumf %956, %957 : vector<1x1x6x128xf32>
    %976 = arith.minimumf %958, %959 : vector<1x1x6x128xf32>
    %977 = arith.maximumf %958, %959 : vector<1x1x6x128xf32>
    %978 = arith.minimumf %960, %961 : vector<1x1x6x128xf32>
    %979 = arith.maximumf %960, %961 : vector<1x1x6x128xf32>
    %980 = arith.minimumf %962, %963 : vector<1x1x6x128xf32>
    %981 = arith.maximumf %962, %963 : vector<1x1x6x128xf32>
    %982 = arith.minimumf %964, %965 : vector<1x1x6x128xf32>
    %983 = arith.maximumf %964, %965 : vector<1x1x6x128xf32>
    %984 = arith.minimumf %966, %968 : vector<1x1x6x128xf32>
    %985 = arith.maximumf %966, %968 : vector<1x1x6x128xf32>
    %986 = arith.minimumf %984, %970 : vector<1x1x6x128xf32>
    %987 = arith.maximumf %984, %970 : vector<1x1x6x128xf32>
    %988 = arith.minimumf %986, %972 : vector<1x1x6x128xf32>
    %989 = arith.maximumf %986, %972 : vector<1x1x6x128xf32>
    %990 = arith.minimumf %988, %974 : vector<1x1x6x128xf32>
    %991 = arith.maximumf %988, %974 : vector<1x1x6x128xf32>
    %992 = arith.minimumf %990, %976 : vector<1x1x6x128xf32>
    %993 = arith.maximumf %990, %976 : vector<1x1x6x128xf32>
    %994 = arith.minimumf %992, %978 : vector<1x1x6x128xf32>
    %995 = arith.maximumf %992, %978 : vector<1x1x6x128xf32>
    %996 = arith.minimumf %994, %980 : vector<1x1x6x128xf32>
    %997 = arith.maximumf %994, %980 : vector<1x1x6x128xf32>
    %998 = arith.maximumf %996, %982 : vector<1x1x6x128xf32>
    %999 = arith.minimumf %967, %983 : vector<1x1x6x128xf32>
    %1000 = arith.maximumf %967, %983 : vector<1x1x6x128xf32>
    %1001 = arith.minimumf %969, %1000 : vector<1x1x6x128xf32>
    %1002 = arith.maximumf %969, %1000 : vector<1x1x6x128xf32>
    %1003 = arith.minimumf %971, %1002 : vector<1x1x6x128xf32>
    %1004 = arith.maximumf %971, %1002 : vector<1x1x6x128xf32>
    %1005 = arith.minimumf %973, %1004 : vector<1x1x6x128xf32>
    %1006 = arith.maximumf %973, %1004 : vector<1x1x6x128xf32>
    %1007 = arith.minimumf %975, %1006 : vector<1x1x6x128xf32>
    %1008 = arith.maximumf %975, %1006 : vector<1x1x6x128xf32>
    %1009 = arith.minimumf %977, %1008 : vector<1x1x6x128xf32>
    %1010 = arith.maximumf %977, %1008 : vector<1x1x6x128xf32>
    %1011 = arith.minimumf %979, %1010 : vector<1x1x6x128xf32>
    %1012 = arith.maximumf %979, %1010 : vector<1x1x6x128xf32>
    %1013 = arith.minimumf %981, %1012 : vector<1x1x6x128xf32>
    %1014 = arith.minimumf %999, %985 : vector<1x1x6x128xf32>
    %1015 = arith.maximumf %999, %985 : vector<1x1x6x128xf32>
    %1016 = arith.minimumf %1001, %987 : vector<1x1x6x128xf32>
    %1017 = arith.maximumf %1001, %987 : vector<1x1x6x128xf32>
    %1018 = arith.minimumf %1003, %989 : vector<1x1x6x128xf32>
    %1019 = arith.maximumf %1003, %989 : vector<1x1x6x128xf32>
    %1020 = arith.minimumf %1005, %991 : vector<1x1x6x128xf32>
    %1021 = arith.maximumf %1005, %991 : vector<1x1x6x128xf32>
    %1022 = arith.minimumf %1007, %993 : vector<1x1x6x128xf32>
    %1023 = arith.maximumf %1007, %993 : vector<1x1x6x128xf32>
    %1024 = arith.minimumf %1009, %995 : vector<1x1x6x128xf32>
    %1025 = arith.maximumf %1009, %995 : vector<1x1x6x128xf32>
    %1026 = arith.minimumf %1011, %997 : vector<1x1x6x128xf32>
    %1027 = arith.maximumf %1011, %997 : vector<1x1x6x128xf32>
    %1028 = arith.minimumf %1013, %998 : vector<1x1x6x128xf32>
    %1029 = arith.maximumf %1013, %998 : vector<1x1x6x128xf32>
    %1030 = arith.minimumf %1014, %1016 : vector<1x1x6x128xf32>
    %1031 = arith.maximumf %1014, %1016 : vector<1x1x6x128xf32>
    %1032 = arith.minimumf %1030, %1018 : vector<1x1x6x128xf32>
    %1033 = arith.maximumf %1030, %1018 : vector<1x1x6x128xf32>
    %1034 = arith.minimumf %1032, %1020 : vector<1x1x6x128xf32>
    %1035 = arith.maximumf %1032, %1020 : vector<1x1x6x128xf32>
    %1036 = arith.minimumf %1034, %1022 : vector<1x1x6x128xf32>
    %1037 = arith.maximumf %1034, %1022 : vector<1x1x6x128xf32>
    %1038 = arith.minimumf %1036, %1024 : vector<1x1x6x128xf32>
    %1039 = arith.maximumf %1036, %1024 : vector<1x1x6x128xf32>
    %1040 = arith.minimumf %1038, %1026 : vector<1x1x6x128xf32>
    %1041 = arith.maximumf %1038, %1026 : vector<1x1x6x128xf32>
    %1042 = arith.maximumf %1040, %1028 : vector<1x1x6x128xf32>
    %1043 = arith.minimumf %1015, %1029 : vector<1x1x6x128xf32>
    %1044 = arith.maximumf %1015, %1029 : vector<1x1x6x128xf32>
    %1045 = arith.minimumf %1017, %1044 : vector<1x1x6x128xf32>
    %1046 = arith.maximumf %1017, %1044 : vector<1x1x6x128xf32>
    %1047 = arith.minimumf %1019, %1046 : vector<1x1x6x128xf32>
    %1048 = arith.maximumf %1019, %1046 : vector<1x1x6x128xf32>
    %1049 = arith.minimumf %1021, %1048 : vector<1x1x6x128xf32>
    %1050 = arith.maximumf %1021, %1048 : vector<1x1x6x128xf32>
    %1051 = arith.minimumf %1023, %1050 : vector<1x1x6x128xf32>
    %1052 = arith.maximumf %1023, %1050 : vector<1x1x6x128xf32>
    %1053 = arith.minimumf %1025, %1052 : vector<1x1x6x128xf32>
    %1054 = arith.maximumf %1025, %1052 : vector<1x1x6x128xf32>
    %1055 = arith.minimumf %1027, %1054 : vector<1x1x6x128xf32>
    %1056 = arith.minimumf %1043, %1031 : vector<1x1x6x128xf32>
    %1057 = arith.maximumf %1043, %1031 : vector<1x1x6x128xf32>
    %1058 = arith.minimumf %1045, %1033 : vector<1x1x6x128xf32>
    %1059 = arith.maximumf %1045, %1033 : vector<1x1x6x128xf32>
    %1060 = arith.minimumf %1047, %1035 : vector<1x1x6x128xf32>
    %1061 = arith.maximumf %1047, %1035 : vector<1x1x6x128xf32>
    %1062 = arith.minimumf %1049, %1037 : vector<1x1x6x128xf32>
    %1063 = arith.maximumf %1049, %1037 : vector<1x1x6x128xf32>
    %1064 = arith.minimumf %1051, %1039 : vector<1x1x6x128xf32>
    %1065 = arith.maximumf %1051, %1039 : vector<1x1x6x128xf32>
    %1066 = arith.minimumf %1053, %1041 : vector<1x1x6x128xf32>
    %1067 = arith.maximumf %1053, %1041 : vector<1x1x6x128xf32>
    %1068 = arith.minimumf %1055, %1042 : vector<1x1x6x128xf32>
    %1069 = arith.maximumf %1055, %1042 : vector<1x1x6x128xf32>
    %1070 = arith.minimumf %1056, %1058 : vector<1x1x6x128xf32>
    %1071 = arith.maximumf %1056, %1058 : vector<1x1x6x128xf32>
    %1072 = arith.minimumf %1070, %1060 : vector<1x1x6x128xf32>
    %1073 = arith.maximumf %1070, %1060 : vector<1x1x6x128xf32>
    %1074 = arith.minimumf %1072, %1062 : vector<1x1x6x128xf32>
    %1075 = arith.maximumf %1072, %1062 : vector<1x1x6x128xf32>
    %1076 = arith.minimumf %1074, %1064 : vector<1x1x6x128xf32>
    %1077 = arith.maximumf %1074, %1064 : vector<1x1x6x128xf32>
    %1078 = arith.minimumf %1076, %1066 : vector<1x1x6x128xf32>
    %1079 = arith.maximumf %1076, %1066 : vector<1x1x6x128xf32>
    %1080 = arith.maximumf %1078, %1068 : vector<1x1x6x128xf32>
    %1081 = arith.minimumf %1057, %1069 : vector<1x1x6x128xf32>
    %1082 = arith.maximumf %1057, %1069 : vector<1x1x6x128xf32>
    %1083 = arith.minimumf %1059, %1082 : vector<1x1x6x128xf32>
    %1084 = arith.maximumf %1059, %1082 : vector<1x1x6x128xf32>
    %1085 = arith.minimumf %1061, %1084 : vector<1x1x6x128xf32>
    %1086 = arith.maximumf %1061, %1084 : vector<1x1x6x128xf32>
    %1087 = arith.minimumf %1063, %1086 : vector<1x1x6x128xf32>
    %1088 = arith.maximumf %1063, %1086 : vector<1x1x6x128xf32>
    %1089 = arith.minimumf %1065, %1088 : vector<1x1x6x128xf32>
    %1090 = arith.maximumf %1065, %1088 : vector<1x1x6x128xf32>
    %1091 = arith.minimumf %1067, %1090 : vector<1x1x6x128xf32>
    %1092 = arith.minimumf %1081, %1071 : vector<1x1x6x128xf32>
    %1093 = arith.maximumf %1081, %1071 : vector<1x1x6x128xf32>
    %1094 = arith.minimumf %1083, %1073 : vector<1x1x6x128xf32>
    %1095 = arith.maximumf %1083, %1073 : vector<1x1x6x128xf32>
    %1096 = arith.minimumf %1085, %1075 : vector<1x1x6x128xf32>
    %1097 = arith.maximumf %1085, %1075 : vector<1x1x6x128xf32>
    %1098 = arith.minimumf %1087, %1077 : vector<1x1x6x128xf32>
    %1099 = arith.maximumf %1087, %1077 : vector<1x1x6x128xf32>
    %1100 = arith.minimumf %1089, %1079 : vector<1x1x6x128xf32>
    %1101 = arith.maximumf %1089, %1079 : vector<1x1x6x128xf32>
    %1102 = arith.minimumf %1091, %1080 : vector<1x1x6x128xf32>
    %1103 = arith.maximumf %1091, %1080 : vector<1x1x6x128xf32>
    %1104 = arith.minimumf %1092, %1094 : vector<1x1x6x128xf32>
    %1105 = arith.maximumf %1092, %1094 : vector<1x1x6x128xf32>
    %1106 = arith.minimumf %1104, %1096 : vector<1x1x6x128xf32>
    %1107 = arith.maximumf %1104, %1096 : vector<1x1x6x128xf32>
    %1108 = arith.minimumf %1106, %1098 : vector<1x1x6x128xf32>
    %1109 = arith.maximumf %1106, %1098 : vector<1x1x6x128xf32>
    %1110 = arith.minimumf %1108, %1100 : vector<1x1x6x128xf32>
    %1111 = arith.maximumf %1108, %1100 : vector<1x1x6x128xf32>
    %1112 = arith.maximumf %1110, %1102 : vector<1x1x6x128xf32>
    %1113 = arith.minimumf %1093, %1103 : vector<1x1x6x128xf32>
    %1114 = arith.maximumf %1093, %1103 : vector<1x1x6x128xf32>
    %1115 = arith.minimumf %1095, %1114 : vector<1x1x6x128xf32>
    %1116 = arith.maximumf %1095, %1114 : vector<1x1x6x128xf32>
    %1117 = arith.minimumf %1097, %1116 : vector<1x1x6x128xf32>
    %1118 = arith.maximumf %1097, %1116 : vector<1x1x6x128xf32>
    %1119 = arith.minimumf %1099, %1118 : vector<1x1x6x128xf32>
    %1120 = arith.maximumf %1099, %1118 : vector<1x1x6x128xf32>
    %1121 = arith.minimumf %1101, %1120 : vector<1x1x6x128xf32>
    %c0_369 = arith.constant 0 : index
    %c4_370 = arith.constant 4 : index
    %c0_371 = arith.constant 0 : index
    %c0_372 = arith.constant 0 : index
    %1122 = vector.load %arg2[%c0_369, %c4_370, %c0_371, %c0_372] : memref<1x8x8x128xf32, #tpu.memory_space<vmem>>, vector<1x1x6x128xf32>
    %1123 = arith.minimumf %1113, %1105 : vector<1x1x6x128xf32>
    %1124 = arith.maximumf %1113, %1105 : vector<1x1x6x128xf32>
    %1125 = arith.minimumf %1115, %1107 : vector<1x1x6x128xf32>
    %1126 = arith.maximumf %1115, %1107 : vector<1x1x6x128xf32>
    %1127 = arith.minimumf %1117, %1109 : vector<1x1x6x128xf32>
    %1128 = arith.maximumf %1117, %1109 : vector<1x1x6x128xf32>
    %1129 = arith.minimumf %1119, %1111 : vector<1x1x6x128xf32>
    %1130 = arith.maximumf %1119, %1111 : vector<1x1x6x128xf32>
    %1131 = arith.minimumf %1121, %1112 : vector<1x1x6x128xf32>
    %1132 = arith.maximumf %1121, %1112 : vector<1x1x6x128xf32>
    %1133 = arith.minimumf %1123, %1125 : vector<1x1x6x128xf32>
    %1134 = arith.maximumf %1123, %1125 : vector<1x1x6x128xf32>
    %1135 = arith.minimumf %1133, %1127 : vector<1x1x6x128xf32>
    %1136 = arith.maximumf %1133, %1127 : vector<1x1x6x128xf32>
    %1137 = arith.minimumf %1135, %1129 : vector<1x1x6x128xf32>
    %1138 = arith.maximumf %1135, %1129 : vector<1x1x6x128xf32>
    %1139 = arith.minimumf %1137, %1131 : vector<1x1x6x128xf32>
    %1140 = arith.maximumf %1137, %1131 : vector<1x1x6x128xf32>
    %1141 = arith.maximumf %1139, %1122 : vector<1x1x6x128xf32>
    %1142 = arith.minimumf %1124, %1141 : vector<1x1x6x128xf32>
    %1143 = arith.maximumf %1124, %1141 : vector<1x1x6x128xf32>
    %1144 = arith.minimumf %1126, %1143 : vector<1x1x6x128xf32>
    %1145 = arith.maximumf %1126, %1143 : vector<1x1x6x128xf32>
    %1146 = arith.minimumf %1128, %1145 : vector<1x1x6x128xf32>
    %1147 = arith.maximumf %1128, %1145 : vector<1x1x6x128xf32>
    %1148 = arith.minimumf %1130, %1147 : vector<1x1x6x128xf32>
    %1149 = arith.maximumf %1130, %1147 : vector<1x1x6x128xf32>
    %1150 = arith.minimumf %1132, %1149 : vector<1x1x6x128xf32>
    %c0_373 = arith.constant 0 : index
    %c4_374 = arith.constant 4 : index
    %c1_375 = arith.constant 1 : index
    %c0_376 = arith.constant 0 : index
    %1151 = vector.load %arg2[%c0_373, %c4_374, %c1_375, %c0_376] : memref<1x8x8x128xf32, #tpu.memory_space<vmem>>, vector<1x1x6x128xf32>
    %1152 = arith.minimumf %1142, %1134 : vector<1x1x6x128xf32>
    %1153 = arith.maximumf %1142, %1134 : vector<1x1x6x128xf32>
    %1154 = arith.minimumf %1144, %1136 : vector<1x1x6x128xf32>
    %1155 = arith.maximumf %1144, %1136 : vector<1x1x6x128xf32>
    %1156 = arith.minimumf %1146, %1138 : vector<1x1x6x128xf32>
    %1157 = arith.maximumf %1146, %1138 : vector<1x1x6x128xf32>
    %1158 = arith.minimumf %1148, %1140 : vector<1x1x6x128xf32>
    %1159 = arith.maximumf %1148, %1140 : vector<1x1x6x128xf32>
    %1160 = arith.minimumf %1150, %1151 : vector<1x1x6x128xf32>
    %1161 = arith.maximumf %1150, %1151 : vector<1x1x6x128xf32>
    %1162 = arith.minimumf %1152, %1154 : vector<1x1x6x128xf32>
    %1163 = arith.maximumf %1152, %1154 : vector<1x1x6x128xf32>
    %1164 = arith.minimumf %1162, %1156 : vector<1x1x6x128xf32>
    %1165 = arith.maximumf %1162, %1156 : vector<1x1x6x128xf32>
    %1166 = arith.minimumf %1164, %1158 : vector<1x1x6x128xf32>
    %1167 = arith.maximumf %1164, %1158 : vector<1x1x6x128xf32>
    %1168 = arith.maximumf %1166, %1160 : vector<1x1x6x128xf32>
    %1169 = arith.minimumf %1153, %1161 : vector<1x1x6x128xf32>
    %1170 = arith.maximumf %1153, %1161 : vector<1x1x6x128xf32>
    %1171 = arith.minimumf %1155, %1170 : vector<1x1x6x128xf32>
    %1172 = arith.maximumf %1155, %1170 : vector<1x1x6x128xf32>
    %1173 = arith.minimumf %1157, %1172 : vector<1x1x6x128xf32>
    %1174 = arith.maximumf %1157, %1172 : vector<1x1x6x128xf32>
    %1175 = arith.minimumf %1159, %1174 : vector<1x1x6x128xf32>
    %c0_377 = arith.constant 0 : index
    %c4_378 = arith.constant 4 : index
    %c2_379 = arith.constant 2 : index
    %c0_380 = arith.constant 0 : index
    %1176 = vector.load %arg2[%c0_377, %c4_378, %c2_379, %c0_380] : memref<1x8x8x128xf32, #tpu.memory_space<vmem>>, vector<1x1x6x128xf32>
    %1177 = arith.minimumf %1169, %1163 : vector<1x1x6x128xf32>
    %1178 = arith.maximumf %1169, %1163 : vector<1x1x6x128xf32>
    %1179 = arith.minimumf %1171, %1165 : vector<1x1x6x128xf32>
    %1180 = arith.maximumf %1171, %1165 : vector<1x1x6x128xf32>
    %1181 = arith.minimumf %1173, %1167 : vector<1x1x6x128xf32>
    %1182 = arith.maximumf %1173, %1167 : vector<1x1x6x128xf32>
    %1183 = arith.minimumf %1175, %1168 : vector<1x1x6x128xf32>
    %1184 = arith.maximumf %1175, %1168 : vector<1x1x6x128xf32>
    %1185 = arith.minimumf %1177, %1179 : vector<1x1x6x128xf32>
    %1186 = arith.maximumf %1177, %1179 : vector<1x1x6x128xf32>
    %1187 = arith.minimumf %1185, %1181 : vector<1x1x6x128xf32>
    %1188 = arith.maximumf %1185, %1181 : vector<1x1x6x128xf32>
    %1189 = arith.minimumf %1187, %1183 : vector<1x1x6x128xf32>
    %1190 = arith.maximumf %1187, %1183 : vector<1x1x6x128xf32>
    %1191 = arith.maximumf %1189, %1176 : vector<1x1x6x128xf32>
    %1192 = arith.minimumf %1178, %1191 : vector<1x1x6x128xf32>
    %1193 = arith.maximumf %1178, %1191 : vector<1x1x6x128xf32>
    %1194 = arith.minimumf %1180, %1193 : vector<1x1x6x128xf32>
    %1195 = arith.maximumf %1180, %1193 : vector<1x1x6x128xf32>
    %1196 = arith.minimumf %1182, %1195 : vector<1x1x6x128xf32>
    %1197 = arith.maximumf %1182, %1195 : vector<1x1x6x128xf32>
    %1198 = arith.minimumf %1184, %1197 : vector<1x1x6x128xf32>
    %c0_381 = arith.constant 0 : index
    %c4_382 = arith.constant 4 : index
    %c0_383 = arith.constant 0 : index
    %c0_384 = arith.constant 0 : index
    %1199 = vector.load %arg3[%c0_381, %c4_382, %c0_383, %c0_384] : memref<1x8x8x128xf32, #tpu.memory_space<vmem>>, vector<1x1x6x128xf32>
    %1200 = arith.minimumf %1192, %1186 : vector<1x1x6x128xf32>
    %1201 = arith.maximumf %1192, %1186 : vector<1x1x6x128xf32>
    %1202 = arith.minimumf %1194, %1188 : vector<1x1x6x128xf32>
    %1203 = arith.maximumf %1194, %1188 : vector<1x1x6x128xf32>
    %1204 = arith.minimumf %1196, %1190 : vector<1x1x6x128xf32>
    %1205 = arith.maximumf %1196, %1190 : vector<1x1x6x128xf32>
    %1206 = arith.minimumf %1198, %1199 : vector<1x1x6x128xf32>
    %1207 = arith.maximumf %1198, %1199 : vector<1x1x6x128xf32>
    %1208 = arith.minimumf %1200, %1202 : vector<1x1x6x128xf32>
    %1209 = arith.maximumf %1200, %1202 : vector<1x1x6x128xf32>
    %1210 = arith.minimumf %1208, %1204 : vector<1x1x6x128xf32>
    %1211 = arith.maximumf %1208, %1204 : vector<1x1x6x128xf32>
    %1212 = arith.maximumf %1210, %1206 : vector<1x1x6x128xf32>
    %1213 = arith.minimumf %1201, %1207 : vector<1x1x6x128xf32>
    %1214 = arith.maximumf %1201, %1207 : vector<1x1x6x128xf32>
    %1215 = arith.minimumf %1203, %1214 : vector<1x1x6x128xf32>
    %1216 = arith.maximumf %1203, %1214 : vector<1x1x6x128xf32>
    %1217 = arith.minimumf %1205, %1216 : vector<1x1x6x128xf32>
    %c0_385 = arith.constant 0 : index
    %c4_386 = arith.constant 4 : index
    %c1_387 = arith.constant 1 : index
    %c0_388 = arith.constant 0 : index
    %1218 = vector.load %arg3[%c0_385, %c4_386, %c1_387, %c0_388] : memref<1x8x8x128xf32, #tpu.memory_space<vmem>>, vector<1x1x6x128xf32>
    %1219 = arith.minimumf %1213, %1209 : vector<1x1x6x128xf32>
    %1220 = arith.maximumf %1213, %1209 : vector<1x1x6x128xf32>
    %1221 = arith.minimumf %1215, %1211 : vector<1x1x6x128xf32>
    %1222 = arith.maximumf %1215, %1211 : vector<1x1x6x128xf32>
    %1223 = arith.minimumf %1217, %1212 : vector<1x1x6x128xf32>
    %1224 = arith.maximumf %1217, %1212 : vector<1x1x6x128xf32>
    %1225 = arith.minimumf %1219, %1221 : vector<1x1x6x128xf32>
    %1226 = arith.maximumf %1219, %1221 : vector<1x1x6x128xf32>
    %1227 = arith.minimumf %1225, %1223 : vector<1x1x6x128xf32>
    %1228 = arith.maximumf %1225, %1223 : vector<1x1x6x128xf32>
    %1229 = arith.maximumf %1227, %1218 : vector<1x1x6x128xf32>
    %1230 = arith.minimumf %1220, %1229 : vector<1x1x6x128xf32>
    %1231 = arith.maximumf %1220, %1229 : vector<1x1x6x128xf32>
    %1232 = arith.minimumf %1222, %1231 : vector<1x1x6x128xf32>
    %1233 = arith.maximumf %1222, %1231 : vector<1x1x6x128xf32>
    %1234 = arith.minimumf %1224, %1233 : vector<1x1x6x128xf32>
    %c0_389 = arith.constant 0 : index
    %c4_390 = arith.constant 4 : index
    %c2_391 = arith.constant 2 : index
    %c0_392 = arith.constant 0 : index
    %1235 = vector.load %arg3[%c0_389, %c4_390, %c2_391, %c0_392] : memref<1x8x8x128xf32, #tpu.memory_space<vmem>>, vector<1x1x6x128xf32>
    %1236 = arith.minimumf %1230, %1226 : vector<1x1x6x128xf32>
    %1237 = arith.maximumf %1230, %1226 : vector<1x1x6x128xf32>
    %1238 = arith.minimumf %1232, %1228 : vector<1x1x6x128xf32>
    %1239 = arith.maximumf %1232, %1228 : vector<1x1x6x128xf32>
    %1240 = arith.minimumf %1234, %1235 : vector<1x1x6x128xf32>
    %1241 = arith.maximumf %1234, %1235 : vector<1x1x6x128xf32>
    %1242 = arith.minimumf %1236, %1238 : vector<1x1x6x128xf32>
    %1243 = arith.maximumf %1236, %1238 : vector<1x1x6x128xf32>
    %1244 = arith.maximumf %1242, %1240 : vector<1x1x6x128xf32>
    %1245 = arith.minimumf %1237, %1241 : vector<1x1x6x128xf32>
    %1246 = arith.maximumf %1237, %1241 : vector<1x1x6x128xf32>
    %1247 = arith.minimumf %1239, %1246 : vector<1x1x6x128xf32>
    %c0_393 = arith.constant 0 : index
    %c4_394 = arith.constant 4 : index
    %c0_395 = arith.constant 0 : index
    %c0_396 = arith.constant 0 : index
    %1248 = vector.load %arg4[%c0_393, %c4_394, %c0_395, %c0_396] : memref<1x8x8x128xf32, #tpu.memory_space<vmem>>, vector<1x1x6x128xf32>
    %1249 = arith.minimumf %1245, %1243 : vector<1x1x6x128xf32>
    %1250 = arith.maximumf %1245, %1243 : vector<1x1x6x128xf32>
    %1251 = arith.minimumf %1247, %1244 : vector<1x1x6x128xf32>
    %1252 = arith.maximumf %1247, %1244 : vector<1x1x6x128xf32>
    %1253 = arith.minimumf %1249, %1251 : vector<1x1x6x128xf32>
    %1254 = arith.maximumf %1249, %1251 : vector<1x1x6x128xf32>
    %1255 = arith.maximumf %1253, %1248 : vector<1x1x6x128xf32>
    %1256 = arith.minimumf %1250, %1255 : vector<1x1x6x128xf32>
    %1257 = arith.maximumf %1250, %1255 : vector<1x1x6x128xf32>
    %1258 = arith.minimumf %1252, %1257 : vector<1x1x6x128xf32>
    %c0_397 = arith.constant 0 : index
    %c4_398 = arith.constant 4 : index
    %c1_399 = arith.constant 1 : index
    %c0_400 = arith.constant 0 : index
    %1259 = vector.load %arg4[%c0_397, %c4_398, %c1_399, %c0_400] : memref<1x8x8x128xf32, #tpu.memory_space<vmem>>, vector<1x1x6x128xf32>
    %1260 = arith.minimumf %1256, %1254 : vector<1x1x6x128xf32>
    %1261 = arith.maximumf %1256, %1254 : vector<1x1x6x128xf32>
    %1262 = arith.minimumf %1258, %1259 : vector<1x1x6x128xf32>
    %1263 = arith.maximumf %1258, %1259 : vector<1x1x6x128xf32>
    %1264 = arith.maximumf %1260, %1262 : vector<1x1x6x128xf32>
    %1265 = arith.minimumf %1261, %1263 : vector<1x1x6x128xf32>
    %c0_401 = arith.constant 0 : index
    %c4_402 = arith.constant 4 : index
    %c2_403 = arith.constant 2 : index
    %c0_404 = arith.constant 0 : index
    %1266 = vector.load %arg4[%c0_401, %c4_402, %c2_403, %c0_404] : memref<1x8x8x128xf32, #tpu.memory_space<vmem>>, vector<1x1x6x128xf32>
    %1267 = arith.minimumf %1265, %1264 : vector<1x1x6x128xf32>
    %1268 = arith.maximumf %1265, %1264 : vector<1x1x6x128xf32>
    %1269 = arith.maximumf %1267, %1266 : vector<1x1x6x128xf32>
    %1270 = arith.minimumf %1268, %1269 : vector<1x1x6x128xf32>
    %c0_405 = arith.constant 0 : index
    %c4_406 = arith.constant 4 : index
    %c0_407 = arith.constant 0 : index
    %c0_408 = arith.constant 0 : index
    %1271 = vector.load %arg5[%c0_405, %c4_406, %c0_407, %c0_408] : memref<1x6x6x128xf32, #tpu.memory_space<vmem>>, vector<1x1x6x128xf32>
    tpu.vector_store %arg5[%c0_405, %c4_406, %c0_407, %c0_408], %1270 {strides = array<i32>} : memref<1x6x6x128xf32, #tpu.memory_space<vmem>>, vector<1x1x6x128xf32>,
    %c0_409 = arith.constant 0 : index
    %c7 = arith.constant 7 : index
    %c0_410 = arith.constant 0 : index
    %c0_411 = arith.constant 0 : index
    %1272 = vector.load %arg2[%c0_409, %c7, %c0_410, %c0_411] : memref<1x8x8x128xf32, #tpu.memory_space<vmem>>, vector<1x1x6x128xf32>
    %1273 = arith.minimumf %1113, %1105 : vector<1x1x6x128xf32>
    %1274 = arith.maximumf %1113, %1105 : vector<1x1x6x128xf32>
    %1275 = arith.minimumf %1115, %1107 : vector<1x1x6x128xf32>
    %1276 = arith.maximumf %1115, %1107 : vector<1x1x6x128xf32>
    %1277 = arith.minimumf %1117, %1109 : vector<1x1x6x128xf32>
    %1278 = arith.maximumf %1117, %1109 : vector<1x1x6x128xf32>
    %1279 = arith.minimumf %1119, %1111 : vector<1x1x6x128xf32>
    %1280 = arith.maximumf %1119, %1111 : vector<1x1x6x128xf32>
    %1281 = arith.minimumf %1121, %1112 : vector<1x1x6x128xf32>
    %1282 = arith.maximumf %1121, %1112 : vector<1x1x6x128xf32>
    %1283 = arith.minimumf %1273, %1275 : vector<1x1x6x128xf32>
    %1284 = arith.maximumf %1273, %1275 : vector<1x1x6x128xf32>
    %1285 = arith.minimumf %1283, %1277 : vector<1x1x6x128xf32>
    %1286 = arith.maximumf %1283, %1277 : vector<1x1x6x128xf32>
    %1287 = arith.minimumf %1285, %1279 : vector<1x1x6x128xf32>
    %1288 = arith.maximumf %1285, %1279 : vector<1x1x6x128xf32>
    %1289 = arith.minimumf %1287, %1281 : vector<1x1x6x128xf32>
    %1290 = arith.maximumf %1287, %1281 : vector<1x1x6x128xf32>
    %1291 = arith.maximumf %1289, %1272 : vector<1x1x6x128xf32>
    %1292 = arith.minimumf %1274, %1291 : vector<1x1x6x128xf32>
    %1293 = arith.maximumf %1274, %1291 : vector<1x1x6x128xf32>
    %1294 = arith.minimumf %1276, %1293 : vector<1x1x6x128xf32>
    %1295 = arith.maximumf %1276, %1293 : vector<1x1x6x128xf32>
    %1296 = arith.minimumf %1278, %1295 : vector<1x1x6x128xf32>
    %1297 = arith.maximumf %1278, %1295 : vector<1x1x6x128xf32>
    %1298 = arith.minimumf %1280, %1297 : vector<1x1x6x128xf32>
    %1299 = arith.maximumf %1280, %1297 : vector<1x1x6x128xf32>
    %1300 = arith.minimumf %1282, %1299 : vector<1x1x6x128xf32>
    %c0_412 = arith.constant 0 : index
    %c7_413 = arith.constant 7 : index
    %c1_414 = arith.constant 1 : index
    %c0_415 = arith.constant 0 : index
    %1301 = vector.load %arg2[%c0_412, %c7_413, %c1_414, %c0_415] : memref<1x8x8x128xf32, #tpu.memory_space<vmem>>, vector<1x1x6x128xf32>
    %1302 = arith.minimumf %1292, %1284 : vector<1x1x6x128xf32>
    %1303 = arith.maximumf %1292, %1284 : vector<1x1x6x128xf32>
    %1304 = arith.minimumf %1294, %1286 : vector<1x1x6x128xf32>
    %1305 = arith.maximumf %1294, %1286 : vector<1x1x6x128xf32>
    %1306 = arith.minimumf %1296, %1288 : vector<1x1x6x128xf32>
    %1307 = arith.maximumf %1296, %1288 : vector<1x1x6x128xf32>
    %1308 = arith.minimumf %1298, %1290 : vector<1x1x6x128xf32>
    %1309 = arith.maximumf %1298, %1290 : vector<1x1x6x128xf32>
    %1310 = arith.minimumf %1300, %1301 : vector<1x1x6x128xf32>
    %1311 = arith.maximumf %1300, %1301 : vector<1x1x6x128xf32>
    %1312 = arith.minimumf %1302, %1304 : vector<1x1x6x128xf32>
    %1313 = arith.maximumf %1302, %1304 : vector<1x1x6x128xf32>
    %1314 = arith.minimumf %1312, %1306 : vector<1x1x6x128xf32>
    %1315 = arith.maximumf %1312, %1306 : vector<1x1x6x128xf32>
    %1316 = arith.minimumf %1314, %1308 : vector<1x1x6x128xf32>
    %1317 = arith.maximumf %1314, %1308 : vector<1x1x6x128xf32>
    %1318 = arith.maximumf %1316, %1310 : vector<1x1x6x128xf32>
    %1319 = arith.minimumf %1303, %1311 : vector<1x1x6x128xf32>
    %1320 = arith.maximumf %1303, %1311 : vector<1x1x6x128xf32>
    %1321 = arith.minimumf %1305, %1320 : vector<1x1x6x128xf32>
    %1322 = arith.maximumf %1305, %1320 : vector<1x1x6x128xf32>
    %1323 = arith.minimumf %1307, %1322 : vector<1x1x6x128xf32>
    %1324 = arith.maximumf %1307, %1322 : vector<1x1x6x128xf32>
    %1325 = arith.minimumf %1309, %1324 : vector<1x1x6x128xf32>
    %c0_416 = arith.constant 0 : index
    %c7_417 = arith.constant 7 : index
    %c2_418 = arith.constant 2 : index
    %c0_419 = arith.constant 0 : index
    %1326 = vector.load %arg2[%c0_416, %c7_417, %c2_418, %c0_419] : memref<1x8x8x128xf32, #tpu.memory_space<vmem>>, vector<1x1x6x128xf32>
    %1327 = arith.minimumf %1319, %1313 : vector<1x1x6x128xf32>
    %1328 = arith.maximumf %1319, %1313 : vector<1x1x6x128xf32>
    %1329 = arith.minimumf %1321, %1315 : vector<1x1x6x128xf32>
    %1330 = arith.maximumf %1321, %1315 : vector<1x1x6x128xf32>
    %1331 = arith.minimumf %1323, %1317 : vector<1x1x6x128xf32>
    %1332 = arith.maximumf %1323, %1317 : vector<1x1x6x128xf32>
    %1333 = arith.minimumf %1325, %1318 : vector<1x1x6x128xf32>
    %1334 = arith.maximumf %1325, %1318 : vector<1x1x6x128xf32>
    %1335 = arith.minimumf %1327, %1329 : vector<1x1x6x128xf32>
    %1336 = arith.maximumf %1327, %1329 : vector<1x1x6x128xf32>
    %1337 = arith.minimumf %1335, %1331 : vector<1x1x6x128xf32>
    %1338 = arith.maximumf %1335, %1331 : vector<1x1x6x128xf32>
    %1339 = arith.minimumf %1337, %1333 : vector<1x1x6x128xf32>
    %1340 = arith.maximumf %1337, %1333 : vector<1x1x6x128xf32>
    %1341 = arith.maximumf %1339, %1326 : vector<1x1x6x128xf32>
    %1342 = arith.minimumf %1328, %1341 : vector<1x1x6x128xf32>
    %1343 = arith.maximumf %1328, %1341 : vector<1x1x6x128xf32>
    %1344 = arith.minimumf %1330, %1343 : vector<1x1x6x128xf32>
    %1345 = arith.maximumf %1330, %1343 : vector<1x1x6x128xf32>
    %1346 = arith.minimumf %1332, %1345 : vector<1x1x6x128xf32>
    %1347 = arith.maximumf %1332, %1345 : vector<1x1x6x128xf32>
    %1348 = arith.minimumf %1334, %1347 : vector<1x1x6x128xf32>
    %c0_420 = arith.constant 0 : index
    %c7_421 = arith.constant 7 : index
    %c0_422 = arith.constant 0 : index
    %c0_423 = arith.constant 0 : index
    %1349 = vector.load %arg3[%c0_420, %c7_421, %c0_422, %c0_423] : memref<1x8x8x128xf32, #tpu.memory_space<vmem>>, vector<1x1x6x128xf32>
    %1350 = arith.minimumf %1342, %1336 : vector<1x1x6x128xf32>
    %1351 = arith.maximumf %1342, %1336 : vector<1x1x6x128xf32>
    %1352 = arith.minimumf %1344, %1338 : vector<1x1x6x128xf32>
    %1353 = arith.maximumf %1344, %1338 : vector<1x1x6x128xf32>
    %1354 = arith.minimumf %1346, %1340 : vector<1x1x6x128xf32>
    %1355 = arith.maximumf %1346, %1340 : vector<1x1x6x128xf32>
    %1356 = arith.minimumf %1348, %1349 : vector<1x1x6x128xf32>
    %1357 = arith.maximumf %1348, %1349 : vector<1x1x6x128xf32>
    %1358 = arith.minimumf %1350, %1352 : vector<1x1x6x128xf32>
    %1359 = arith.maximumf %1350, %1352 : vector<1x1x6x128xf32>
    %1360 = arith.minimumf %1358, %1354 : vector<1x1x6x128xf32>
    %1361 = arith.maximumf %1358, %1354 : vector<1x1x6x128xf32>
    %1362 = arith.maximumf %1360, %1356 : vector<1x1x6x128xf32>
    %1363 = arith.minimumf %1351, %1357 : vector<1x1x6x128xf32>
    %1364 = arith.maximumf %1351, %1357 : vector<1x1x6x128xf32>
    %1365 = arith.minimumf %1353, %1364 : vector<1x1x6x128xf32>
    %1366 = arith.maximumf %1353, %1364 : vector<1x1x6x128xf32>
    %1367 = arith.minimumf %1355, %1366 : vector<1x1x6x128xf32>
    %c0_424 = arith.constant 0 : index
    %c7_425 = arith.constant 7 : index
    %c1_426 = arith.constant 1 : index
    %c0_427 = arith.constant 0 : index
    %1368 = vector.load %arg3[%c0_424, %c7_425, %c1_426, %c0_427] : memref<1x8x8x128xf32, #tpu.memory_space<vmem>>, vector<1x1x6x128xf32>
    %1369 = arith.minimumf %1363, %1359 : vector<1x1x6x128xf32>
    %1370 = arith.maximumf %1363, %1359 : vector<1x1x6x128xf32>
    %1371 = arith.minimumf %1365, %1361 : vector<1x1x6x128xf32>
    %1372 = arith.maximumf %1365, %1361 : vector<1x1x6x128xf32>
    %1373 = arith.minimumf %1367, %1362 : vector<1x1x6x128xf32>
    %1374 = arith.maximumf %1367, %1362 : vector<1x1x6x128xf32>
    %1375 = arith.minimumf %1369, %1371 : vector<1x1x6x128xf32>
    %1376 = arith.maximumf %1369, %1371 : vector<1x1x6x128xf32>
    %1377 = arith.minimumf %1375, %1373 : vector<1x1x6x128xf32>
    %1378 = arith.maximumf %1375, %1373 : vector<1x1x6x128xf32>
    %1379 = arith.maximumf %1377, %1368 : vector<1x1x6x128xf32>
    %1380 = arith.minimumf %1370, %1379 : vector<1x1x6x128xf32>
    %1381 = arith.maximumf %1370, %1379 : vector<1x1x6x128xf32>
    %1382 = arith.minimumf %1372, %1381 : vector<1x1x6x128xf32>
    %1383 = arith.maximumf %1372, %1381 : vector<1x1x6x128xf32>
    %1384 = arith.minimumf %1374, %1383 : vector<1x1x6x128xf32>
    %c0_428 = arith.constant 0 : index
    %c7_429 = arith.constant 7 : index
    %c2_430 = arith.constant 2 : index
    %c0_431 = arith.constant 0 : index
    %1385 = vector.load %arg3[%c0_428, %c7_429, %c2_430, %c0_431] : memref<1x8x8x128xf32, #tpu.memory_space<vmem>>, vector<1x1x6x128xf32>
    %1386 = arith.minimumf %1380, %1376 : vector<1x1x6x128xf32>
    %1387 = arith.maximumf %1380, %1376 : vector<1x1x6x128xf32>
    %1388 = arith.minimumf %1382, %1378 : vector<1x1x6x128xf32>
    %1389 = arith.maximumf %1382, %1378 : vector<1x1x6x128xf32>
    %1390 = arith.minimumf %1384, %1385 : vector<1x1x6x128xf32>
    %1391 = arith.maximumf %1384, %1385 : vector<1x1x6x128xf32>
    %1392 = arith.minimumf %1386, %1388 : vector<1x1x6x128xf32>
    %1393 = arith.maximumf %1386, %1388 : vector<1x1x6x128xf32>
    %1394 = arith.maximumf %1392, %1390 : vector<1x1x6x128xf32>
    %1395 = arith.minimumf %1387, %1391 : vector<1x1x6x128xf32>
    %1396 = arith.maximumf %1387, %1391 : vector<1x1x6x128xf32>
    %1397 = arith.minimumf %1389, %1396 : vector<1x1x6x128xf32>
    %c0_432 = arith.constant 0 : index
    %c7_433 = arith.constant 7 : index
    %c0_434 = arith.constant 0 : index
    %c0_435 = arith.constant 0 : index
    %1398 = vector.load %arg4[%c0_432, %c7_433, %c0_434, %c0_435] : memref<1x8x8x128xf32, #tpu.memory_space<vmem>>, vector<1x1x6x128xf32>
    %1399 = arith.minimumf %1395, %1393 : vector<1x1x6x128xf32>
    %1400 = arith.maximumf %1395, %1393 : vector<1x1x6x128xf32>
    %1401 = arith.minimumf %1397, %1394 : vector<1x1x6x128xf32>
    %1402 = arith.maximumf %1397, %1394 : vector<1x1x6x128xf32>
    %1403 = arith.minimumf %1399, %1401 : vector<1x1x6x128xf32>
    %1404 = arith.maximumf %1399, %1401 : vector<1x1x6x128xf32>
    %1405 = arith.maximumf %1403, %1398 : vector<1x1x6x128xf32>
    %1406 = arith.minimumf %1400, %1405 : vector<1x1x6x128xf32>
    %1407 = arith.maximumf %1400, %1405 : vector<1x1x6x128xf32>
    %1408 = arith.minimumf %1402, %1407 : vector<1x1x6x128xf32>
    %c0_436 = arith.constant 0 : index
    %c7_437 = arith.constant 7 : index
    %c1_438 = arith.constant 1 : index
    %c0_439 = arith.constant 0 : index
    %1409 = vector.load %arg4[%c0_436, %c7_437, %c1_438, %c0_439] : memref<1x8x8x128xf32, #tpu.memory_space<vmem>>, vector<1x1x6x128xf32>
    %1410 = arith.minimumf %1406, %1404 : vector<1x1x6x128xf32>
    %1411 = arith.maximumf %1406, %1404 : vector<1x1x6x128xf32>
    %1412 = arith.minimumf %1408, %1409 : vector<1x1x6x128xf32>
    %1413 = arith.maximumf %1408, %1409 : vector<1x1x6x128xf32>
    %1414 = arith.maximumf %1410, %1412 : vector<1x1x6x128xf32>
    %1415 = arith.minimumf %1411, %1413 : vector<1x1x6x128xf32>
    %c0_440 = arith.constant 0 : index
    %c7_441 = arith.constant 7 : index
    %c2_442 = arith.constant 2 : index
    %c0_443 = arith.constant 0 : index
    %1416 = vector.load %arg4[%c0_440, %c7_441, %c2_442, %c0_443] : memref<1x8x8x128xf32, #tpu.memory_space<vmem>>, vector<1x1x6x128xf32>
    %1417 = arith.minimumf %1415, %1414 : vector<1x1x6x128xf32>
    %1418 = arith.maximumf %1415, %1414 : vector<1x1x6x128xf32>
    %1419 = arith.maximumf %1417, %1416 : vector<1x1x6x128xf32>
    %1420 = arith.minimumf %1418, %1419 : vector<1x1x6x128xf32>
    %c0_444 = arith.constant 0 : index
    %c5_445 = arith.constant 5 : index
    %c0_446 = arith.constant 0 : index
    %c0_447 = arith.constant 0 : index
    %1421 = vector.load %arg5[%c0_444, %c5_445, %c0_446, %c0_447] : memref<1x6x6x128xf32, #tpu.memory_space<vmem>>, vector<1x1x6x128xf32>
    tpu.vector_store %arg5[%c0_444, %c5_445, %c0_446, %c0_447], %1420 {strides = array<i32>} : memref<1x6x6x128xf32, #tpu.memory_space<vmem>>, vector<1x1x6x128xf32>,
    return
  }
  func.func @transform_0(%arg0: i32, %arg1: i32) -> (i32, i32, i32, i32) {
    %c1_i32 = arith.constant 1 : i32
    %0 = arith.muli %arg1, %c1_i32 : i32
    %c0_i32 = arith.constant 0 : i32
    %1 = arith.addi %0, %c0_i32 : i32
    %c0_i32_0 = arith.constant 0 : i32
    %c0_i32_1 = arith.constant 0 : i32
    %c0_i32_2 = arith.constant 0 : i32
    return %1, %c0_i32_0, %c0_i32_1, %arg0 : i32, i32, i32, i32
  }
  func.func @transform_1(%arg0: i32, %arg1: i32) -> (i32, i32, i32, i32) {
    %c1_i32 = arith.constant 1 : i32
    %0 = arith.muli %arg1, %c1_i32 : i32
    %c1_i32_0 = arith.constant 1 : i32
    %1 = arith.addi %0, %c1_i32_0 : i32
    %c0_i32 = arith.constant 0 : i32
    %c0_i32_1 = arith.constant 0 : i32
    %c0_i32_2 = arith.constant 0 : i32
    return %1, %c0_i32, %c0_i32_1, %arg0 : i32, i32, i32, i32
  }
  func.func @transform_2(%arg0: i32, %arg1: i32) -> (i32, i32, i32, i32) {
    %c1_i32 = arith.constant 1 : i32
    %0 = arith.muli %arg1, %c1_i32 : i32
    %c2_i32 = arith.constant 2 : i32
    %1 = arith.addi %0, %c2_i32 : i32
    %c0_i32 = arith.constant 0 : i32
    %c0_i32_0 = arith.constant 0 : i32
    %c0_i32_1 = arith.constant 0 : i32
    return %1, %c0_i32, %c0_i32_0, %arg0 : i32, i32, i32, i32
  }
  func.func @transform_3(%arg0: i32, %arg1: i32) -> (i32, i32, i32, i32) {
    %c0_i32 = arith.constant 0 : i32
    %c0_i32_0 = arith.constant 0 : i32
    %c0_i32_1 = arith.constant 0 : i32
    return %arg1, %c0_i32, %c0_i32_0, %arg0 : i32, i32, i32, i32
  }
}

</mosaic_0001>

<bundles_post_ra>
// kernel: tpu_custom_call.1
= control target key start
LH: loop header
LB: loop body
LE: loop exit
PB: predicated region body
PF: predicated region fallthrough
CT: control target
= control target key end

     0   :  { %s3353_s0 = inlined_call_operand.hbm [shape: f32[8,8,8,128], index: 0, kind: input, shape index: {}]   ;;  %s3354_s1 = inlined_call_operand.hbm [shape: f32[8,8,8,128], index: 1, kind: input, shape index: {}]   ;;  %s3355_s2 = inlined_call_operand.hbm [shape: f32[8,8,8,128], index: 2, kind: input, shape index: {}]   ;;  %s3356_s3 = inlined_call_operand.hbm [shape: f32[6,6,6,128], index: 3, kind: output, shape index: {}]  }
   0x1   :  { %3368 = sst [smem:[#allocation19_spill]] %s3353_s0 }
   0x2   :  { %3369 = sst [smem:[#allocation20_spill]] %s3354_s1 }
   0x3   :  { %3370 = sst [smem:[#allocation21_spill]] %s3356_s3 }
   0x4   :  { %8 = vsyncpa [#allocation3], 0 }
   0x5   :  { %10 = vsyncpa [#allocation3 + $0x1], 0 }
   0x6   :  { %11 = vsyncpa [#allocation6], 0 }
   0x7   :  { %13 = vsyncpa [#allocation6 + $0x1], 0 }
   0x8   :  { %14 = vsyncpa [#allocation4], 0 }
   0x9   :  { %16 = vsyncpa [#allocation4 + $0x1], 0  ;;  %s2345_s12 = smov 0   ;;  %s2347_s13 = smov 0  }
   0xa   :  { %s2349_s14 = smov 0   ;;  %s2351_s15 = smov 0  }
   0xb   :  { %s2353_s16 = smov 0   ;;  %s2355_s17 = smov 0  }
   0xc   :  { %s2357_s18 = smov 0   ;;  %s2359_s19 = smov 0  }
   0xd   :  { %s2361_s20 = smov 0   ;;  %s2363_s21 = smov 0  }
   0xe   :  { %s2365_s22 = smov 0   ;;  %s2367_s23 = smov 0  }
   0xf LB: > { %3371 = sst [smem:[#allocation13_spill]] %s2303_s20  ;;  %s2404_s24 = sadd.s32 4294967295, %s2315_s23   ;;  %s2315_s23 = sphi %s2367_s23, %s22_s23   ;;  %s2311_s22 = sphi %s2365_s22, %s3406_s22   ;;  %s2307_s21 = sphi %s2363_s21, %s3405_s21   ;;  %s2303_s20 = sphi %s2361_s20, %s3415_s20   ;;  %s2299_s19 = sphi %s2359_s19, %s3414_s19   ;;  %s2295_s18 = sphi %s2357_s18, %s3413_s18   ;;  %s2291_s17 = sphi %s2355_s17, %s3412_s17   ;;  %s2287_s16 = sphi %s2353_s16, %s3411_s16   ;;  %s2283_s15 = sphi %s2351_s15, %s3410_s15   ;;  %s2279_s14 = sphi %s2349_s14, %s3409_s14   ;;  %s2275_s13 = sphi %s2347_s13, %s3408_s13   ;;  %s2271_s12 = sphi %s2345_s12, %s3407_s12  }
  0x10   : > { %3372 = sst [smem:[#allocation14_spill]] %s2307_s21  ;;  %s31_s25 = sadd.s32 1, %s2311_s22 }
  0x11   : > { %3373 = sst [smem:[#allocation15_spill]] %s2311_s22  ;;  %p32_p0 = scmp.ge.s32.totalorder %s31_s25, 6 }
  0x12   : > { %p3366_p1 = scmp.eq.s32.totalorder %s2315_s23, 0  ;;  %p3359_p2 = scmp.eq.s32.totalorder %s2404_s24, 0 }
  0x13   : > { %s73_s26 = sadd.s32 1, %s2291_s17  ;;  %p80_p3 = scmp.ne.s32.totalorder %s2291_s17, %s2287_s16 }
  0x14   : > { %s2410_s27 = scalar_select %p32_p0, 0, %s31_s25  }
  0x15   : > { %p86_p4 = scmp.ne.s32.totalorder %s2287_s16, %s2283_s15  ;;  %p2424_p7 = por %p80_p3, %p3366_p1 }
  0x16   : > { %3374 = sst [smem:[#allocation16_spill]] %s2410_s27  ;;  %s38_s28 = ssub.s32 %s2311_s22, %s2410_s27 }
  0x17   : > { %s67_s29 = sadd.s32 1, %s2410_s27  ;;  %p2418_p5 = scmp.eq.s32.totalorder %s38_s28, 0 }
  0x18   : > { %s68_s4 = ssub.s32 %s31_s25, %s67_s29  ;;  %p2430_p8 = por %p86_p4, %p3359_p2 }
  0x19   : > { %p71_p6 = scmp.eq.s32.totalorder %s68_s4, 0  ;;  %s96_s7 = sadd.s32 2, %s2311_s22 }
  0x1a   : > { %s97_s9 = sadd.s32 2, %s2410_s27  ;;  %p3358_p9 = scmp.lt.s32.totalorder %s2315_s23, 6 }
  0x1b   : > { %s2436_s8 = scalar_select %p71_p6, %s2291_s17, %s73_s26  }
  0x1c   : > { %s2439_s10 = ssub.s32 %s96_s7, %s97_s9  ;;  %s2444_s11 = sshll.u32 %s2311_s22, 10 }
  0x1d   : > { %3378 = sst [smem:[#allocation17_spill]] %s2436_s8  ;;  %s190_s15 = sand.u32 1, %s2315_s23  }
  0x1e   : > { %s192_s25 = sand.u32 1, %s2291_s17   ;;  %s3379_s1 = sld [smem:[#allocation20_spill]] }
  0x1f   : > { %s1847_s28 = sshll.u32 %s192_s25, 6  ;;  %p2456_p11 = pnand %p3358_p9, %p2424_p7 }
  0x20   : > { %s194_s26 = scalar_lea.vmem [#allocation5], %s1847_s28  ;;  %p1853_p12 = scmp.ge.s32.totalorder %s2315_s23, 1 }
  0x21   : > { %s203_s8 = sshll.u32 %s194_s26, 4  ;;  %p234_p13 = scmp.lt.s32.totalorder %s2315_s23, 7  ;;  %s204_s8 = int_to_ptr.vmem [resolvable:$true] %s203_s8 }
  0x22   : > { %s2462_s9 = scalar_lea.sflag [#allocation6], %s190_s15  ;;  %p2095_p0 = pneg %p2456_p11 }
  0x23   : > { %s2106_s25 = scalar_lea.vmem %s204_s8, 1024 }
  0x24   : > { %s1749_s3 = scalar_lea.hbm %s3379_s1, %s2444_s11  ;;  %p2107_p3 = scmp.ne.s32.totalorder %s204_s8, %s2106_s25 }
  0x25   : > { %s1750_s21 = scalar_lea.hbm %s1749_s3, 1024  ;;  %s2317_s3 = smov [#allocation5]  }
  0x26   : > { %p2109_p4 = pnand %p2107_p3, %p2095_p0  ;;  %s2111_s28 = sshll.u32 %s2317_s3, 4  ;;  %s2112_s28 = int_to_ptr.vmem [resolvable:$false] %s2111_s28 }
  0x27   : > { %s2113_s5 = scalar_lea.vmem %s2112_s28, 2048  ;;  %p2114_p10 = scmp.lt.s32.totalorder %s204_s8, %s2112_s28 }
  0x28   : > { %p2110_p6 = pneg %p2109_p4  ;;  %p2115_p7 = scmp.lt.s32.totalorder %s2113_s5, %s2106_s25 }
  0x2a   : > { %p2116_p9 = por %p2115_p7, %p2114_p10 }
  0x2c   : > { %p2117_p2 = pnand %p2116_p9, %p2110_p6 }
  0x2e   : > { %2120 = shalt.err (!%p2117_p2)
}
  0x2f   : > { %s3360_s29 = smov 128   ;;  %s3362_s15 = smov 8  }
  0x30   : > { %1983 = dma.hbm_to_vmem [thread:$0]  (!%p2456_p11), %s1750_s21, 1024, %s204_s8, %s2462_s9, %s3360_s29, %s3360_s29, %s3362_s15  }
  0x31   : > { %p2476_p2 = pnand %p1853_p12, %p234_p13  ;;  %s1841_s26 = sadd.s32 4294967294, %s2315_s23  }
  0x32   : > { %s43_s25 = sadd.s32 1, %s2303_s20  ;;  %p50_p9 = scmp.ne.s32.totalorder %s2303_s20, %s2299_s19 }
  0x33   : > { %s2485_s3 = scalar_select %p2418_p5, %s2303_s20, %s43_s25  }
  0x34   : > { %p56_p10 = scmp.ne.s32.totalorder %s2299_s19, %s2295_s18  ;;  %p142_p0 = scmp.eq.s32.totalorder %s2404_s24, 5 }
  0x35   : > { %3382 = sst [smem:[#allocation18_spill]] %s2485_s3  ;;  %p148_p3 = scmp.eq.s32.totalorder %s1841_s26, 5 }
  0x36   : > { %p52_p4 = por %p3366_p1, %p50_p9  ;;  %p3383_p6 = scmp.eq.s32.totalorder %s2404_s24, 0 }
  0x37   : > { %p2500_p12 = por %p142_p0, %p50_p9  ;;  %p2504_p13 = por %p148_p3, %p56_p10 }
  0x38   : > { %p2496_p11 = por %p3383_p6, %p56_p10  ;;  %s168_s30 = sand.u32 1, %s2303_s20  }
  0x39   : > { %s3386_s7 = scalar_select %p2504_p13, 1, 0 }
  0x3a   : > { %s3387_s0 = sld [smem:[#allocation19_spill]]  ;;  %s1844_s25 = sshll.u32 %s168_s30, 6 }
  0x3b   : > { %p3388_p5 = scmp.lt.s32.totalorder %s2315_s23, 6  ;;  %s172_s15 = scalar_lea.vmem [#allocation2], %s1844_s25 }
  0x3c   : > { %s180_s1 = sshll.u32 %s172_s15, 4  ;;  %s169_s27 = scalar_lea.sflag [#allocation3], %s168_s30  ;;  %s181_s1 = int_to_ptr.vmem [resolvable:$true] %s180_s1 }
  0x3d   : > { %p2515_p7 = pnand %p3388_p5, %p52_p4  ;;  %s2135_s22 = scalar_lea.vmem %s181_s1, 1024 }
  0x3e   : > { %p2136_p10 = scmp.ne.s32.totalorder %s181_s1, %s2135_s22  ;;  %s2320_s3 = smov [#allocation2]  }
  0x3f   : > { %p2124_p9 = pneg %p2515_p7  ;;  %s2140_s28 = sshll.u32 %s2320_s3, 4  ;;  %s2141_s28 = int_to_ptr.vmem [resolvable:$false] %s2140_s28 }
  0x40   : > { %s179_s26 = scalar_lea.hbm %s3387_s0, %s2444_s11  ;;  %s2142_s5 = scalar_lea.vmem %s2141_s28, 2048 }
  0x41   : > { %p2138_p0 = pnand %p2136_p10, %p2124_p9  ;;  %p2143_p6 = scmp.lt.s32.totalorder %s181_s1, %s2141_s28 }
  0x42   : > { %p2144_p4 = scmp.lt.s32.totalorder %s2142_s5, %s2135_s22 }
  0x43   : > { %p2139_p3 = pneg %p2138_p0 }
  0x44   : > { %p2145_p5 = por %p2144_p4, %p2143_p6 }
  0x46   : > { %p2146_p1 = pnand %p2145_p5, %p2139_p3 }
  0x48   : > { %2149 = shalt.err (!%p2146_p1)
}
  0x49   : > { %s3390_s15 = smov 8   ;;  %s3391_s25 = smov 128  }
  0x4a   : > { %1980 = dma.hbm_to_vmem [thread:$0]  (!%p2515_p7), %s179_s26, 1024, %s181_s1, %s169_s27, %s3391_s25, %s3391_s25, %s3390_s15  }
  0x4b   : > { %s103_s22 = sadd.s32 1, %s2279_s14  ;;  %p3392_p1 = scmp.eq.s32.totalorder %s2439_s10, 0 }
  0x4c   : > { %p110_p9 = scmp.ne.s32.totalorder %s2279_s14, %s2275_s13  ;;  %p116_p10 = scmp.ne.s32.totalorder %s2275_s13, %s2271_s12 }
  0x4d   : > { %s2530_s3 = scalar_select %p3392_p1, %s2279_s14, %s103_s22  }
  0x4e   : > { %s215_s29 = sand.u32 1, %s2279_s14   ;;  %s1757_s5 = scalar_lea.hbm %s3355_s2, %s2444_s11 }
  0x4f   : > { %p3393_p0 = scmp.eq.s32.totalorder %s2315_s23, 0  ;;  %p3394_p6 = scmp.eq.s32.totalorder %s2404_s24, 0 }
  0x50   : > { %s1850_s20 = sshll.u32 %s215_s29, 6  ;;  %s1758_s1 = scalar_lea.hbm %s1757_s5, 2048 }
  0x51   : > { %p112_p3 = por %p110_p9, %p3393_p0  ;;  %p2545_p4 = por %p116_p10, %p3394_p6 }
  0x52   : > { %p3396_p7 = scmp.lt.s32.totalorder %s2315_s23, 6  ;;  %s217_s12 = scalar_lea.vmem [#allocation7], %s1850_s20 }
  0x53   : > { %s226_s10 = sshll.u32 %s217_s12, 4  ;;  %s2321_s26 = smov [#allocation7]   ;;  %s227_s10 = int_to_ptr.vmem [resolvable:$true] %s226_s10 }
  0x54   : > { %p2551_p5 = pnand %p3396_p7, %p112_p3  ;;  %s2163_s11 = scalar_lea.vmem %s227_s10, 1024 }
  0x55   : > { %p2164_p9 = scmp.ne.s32.totalorder %s227_s10, %s2163_s11  ;;  %s2168_s22 = sshll.u32 %s2321_s26, 4  ;;  %s2169_s22 = int_to_ptr.vmem [resolvable:$false] %s2168_s22 }
  0x56   : > { %p2152_p1 = pneg %p2551_p5  ;;  %s2170_s29 = scalar_lea.vmem %s2169_s22, 2048 }
  0x57   : > { %p2171_p6 = scmp.lt.s32.totalorder %s227_s10, %s2169_s22  ;;  %p2172_p13 = scmp.lt.s32.totalorder %s2170_s29, %s2163_s11 }
  0x58   : > { %p2166_p0 = pnand %p2164_p9, %p2152_p1 }
  0x59   : > { %p2173_p3 = por %p2172_p13, %p2171_p6 }
  0x5a   : > { %p2167_p10 = pneg %p2166_p0 }
  0x5c   : > { %p2174_p7 = pnand %p2173_p3, %p2167_p10 }
  0x5e   : > { %2177 = shalt.err (!%p2174_p7)
}
  0x5f   : > { %1986 = dma.hbm_to_vmem [thread:$0]  (!%p2551_p5), %s1758_s1, 1024, %s227_s10, %s2462_s9, %s3391_s25, %s3391_s25, %s3390_s15  }
  0x60   : > { %238 = sbr.rel (%p2476_p2) target bundleno = 474 (0x1da), region = 32  ;;  %s2566_s20 = sand.u32 (!%p2476_p2), 1, %s2299_s19  }
  0x61   : > { %s1854_s30 = sshll.u32 (!%p2476_p2), %s2566_s20, 6  ;;  %s241_s28 = scalar_lea.sflag (!%p2476_p2), [#allocation3], %s2566_s20 }
  0x62   : > { %s2570_s5 = scalar_lea.vmem (!%p2476_p2), [#allocation2], %s1854_s30 }
  0x65   : > { %2254 = dma.done.wait (%p2496_p11), %s241_s28, 1024  }
  0x66   : > { %2256 = vsyncadd (%p2496_p11), %s241_s28, 4294966272  ;;  %s249_s9 = sand.u32 1, %s2404_s24   ;;  %s251_s4 = sand.u32 1, %s2287_s16  }
  0x67   : > { %s1855_s15 = sshll.u32 %s251_s4, 6  ;;  %s250_s25 = scalar_lea.sflag [#allocation6], %s249_s9 }
  0x68   : > { %s2578_s1 = scalar_lea.vmem [#allocation5], %s1855_s15 }
  0x69   : > { %2258 = dma.done.wait (%p2430_p8), %s250_s25, 1024  }
  0x6a   : > { %2260 = vsyncadd (%p2430_p8), %s250_s25, 4294966272  ;;  %s260_s27 = sand.u32 1, %s2275_s13  }
  0x6b   : > { %s1856_s12 = sshll.u32 %s260_s27, 6 }
  0x6c   : > { %s2585_s21 = scalar_lea.vmem [#allocation7], %s1856_s12 }
  0x6d   : > { %2262 = dma.done.wait (%p2545_p4), %s250_s25, 1024  }
  0x6e   : > { %2264 = vsyncadd (%p2545_p4), %s250_s25, 4294966272  ;;  %v1857_v0 = vld [vmem:[%s2570_s5 + $0x8] sm:$0x3f]  ;;  %v1860_v3 = vld [vmem:[%s2570_s5 + $0x10] sm:$0x3f]  ;;  %s1967_s0 = smul.u32 48, %s2566_s20 }
  0x6f   : > { %v1858_v1 = vld [vmem:[%s2570_s5 + $0x9] sm:$0x3f]  ;;  %v1861_v4 = vld [vmem:[%s2570_s5 + $0x11] sm:$0x3f]  ;;  %v1885_v56 = vld [vmem:[%s2570_s5 + $0x18] sm:$0x3f] }
  0x70   : > { %v1859_v2 = vld [vmem:[%s2570_s5 + $0xa] sm:$0x3f]  ;;  %v1862_v5 = vld [vmem:[%s2570_s5 + $0x12] sm:$0x3f]  ;;  %v321_v6 = vmin.f32 %v1857_v0, %v1858_v1  ;;  %v322_v13 = vmax.f32 %v1857_v0, %v1858_v1  ;;  %v1886_v57 = vld [vmem:[%s2570_s5 + $0x19] sm:$0x3f] }
  0x71   : > { %v1863_v7 = vld [vmem:[%s2578_s1 + $0x8] sm:$0x3f]  ;;  %v323_v9 = vmin.f32 %v1859_v2, %v1860_v3  ;;  %v325_v10 = vmin.f32 %v1861_v4, %v1862_v5  ;;  %v1866_v12 = vld [vmem:[%s2578_s1 + $0x10] sm:$0x3f]  ;;  %v324_v20 = vmax.f32 %v1859_v2, %v1860_v3  ;;  %v326_v27 = vmax.f32 %v1861_v4, %v1862_v5  ;;  %v1887_v2 = vld [vmem:[%s2570_s5 + $0x1a] sm:$0x3f] }
  0x72   : > { %v1864_v8 = vld [vmem:[%s2578_s1 + $0x9] sm:$0x3f]  ;;  %v2602_v14 = vld [vmem:[%s2585_s21 + $0x11] sm:$0x3f]  ;;  %v1888_v3 = vld [vmem:[%s2570_s5 + $0x20] sm:$0x3f] }
  0x73   : > { %v1865_v11 = vld [vmem:[%s2578_s1 + $0xa] sm:$0x3f]  ;;  %v2605_v15 = vld [vmem:[%s2585_s21 + $0x12] sm:$0x3f]  ;;  %v327_v16 = vmin.f32 %v1863_v7, %v1864_v8  ;;  %v339_v17 = vmin.f32 %v321_v6, %v323_v9  ;;  %v340_v23 = vmax.f32 %v321_v6, %v323_v9  ;;  %v328_v31 = vmax.f32 %v1863_v7, %v1864_v8  ;;  %s2993_s24 = scalar_lea.vmem [#allocation8], %s1967_s0  ;;  %s3399_s6 = sld [smem:[#allocation14_spill]] }
  0x74   : > { %v1867_v18 = vld [vmem:[%s2578_s1 + $0x11] sm:$0x3f]  ;;  %v338_v21 = vmax.f32 %v2602_v14, %v2605_v15  ;;  %v329_v22 = vmin.f32 %v1865_v11, %v1866_v12  ;;  %v1869_v25 = vld [vmem:[%s2585_s21 + $0x8] sm:$0x3f]  ;;  %v330_v36 = vmax.f32 %v1865_v11, %v1866_v12  ;;  %v337_v58 = vmin.f32 %v2602_v14, %v2605_v15  ;;  %s1706_s11 = sshll.u32 %s2993_s24, 4  ;;  %s3400_s29 = sld [smem:[#allocation21_spill]]  ;;  %s3287_s11 = int_to_ptr.vmem [resolvable:$true] %s1706_s11 }
  0x75   : > { %v1868_v19 = vld [vmem:[%s2578_s1 + $0x12] sm:$0x3f]  ;;  %v341_v24 = vmin.f32 %v339_v17, %v325_v10  ;;  %v1870_v26 = vld [vmem:[%s2585_s21 + $0x9] sm:$0x3f]  ;;  %v342_v28 = vmax.f32 %v339_v17, %v325_v10  ;;  %v2621_v6 = vmin.f32 %v1885_v56, %v1886_v57  ;;  %v2623_v7 = vmax.f32 %v1885_v56, %v1886_v57  ;;  %s1692_s28 = scalar_lea.sflag [#allocation4], %s2566_s20  ;;  %s2322_s9 = smov [#allocation8]  }
  0x76   : > { %v354_v29 = vmin.f32 %v322_v13, %v338_v21  ;;  %v355_v30 = vmax.f32 %v322_v13, %v338_v21  ;;  %v331_v32 = vmin.f32 %v1867_v18, %v1868_v19  ;;  %v1871_v34 = vld [vmem:[%s2585_s21 + $0xa] sm:$0x3f]  ;;  %v1872_v35 = vld [vmem:[%s2585_s21 + $0x10] sm:$0x3f]  ;;  %v332_v40 = vmax.f32 %v1867_v18, %v1868_v19  ;;  %v1890_v21 = vld [vmem:[%s2570_s5 + $0x22] sm:$0x3f] }
  0x77   : > { %v343_v33 = vmin.f32 %v341_v24, %v327_v16  ;;  %v344_v37 = vmax.f32 %v341_v24, %v327_v16  ;;  %v333_v41 = vmin.f32 %v1869_v25, %v1870_v26  ;;  %v334_v48 = vmax.f32 %v1869_v25, %v1870_v26  ;;  %v1891_v26 = vld [vmem:[%s2578_s1 + $0x18] sm:$0x3f]  ;;  %s2183_s4 = sshll.u32 %s2322_s9, 4  ;;  %s2184_s4 = int_to_ptr.vmem [resolvable:$false] %s2183_s4 }
  0x78   : > { %v356_v38 = vmin.f32 %v324_v20, %v355_v30  ;;  %v357_v39 = vmax.f32 %v324_v20, %v355_v30  ;;  %v369_v43 = vmin.f32 %v354_v29, %v340_v23  ;;  %v335_v49 = vmin.f32 %v1871_v34, %v1872_v35  ;;  %v1889_v20 = vld [vmem:[%s2570_s5 + $0x21] sm:$0x3f]  ;;  %s2185_s15 = scalar_lea.vmem %s2184_s4, 1536  ;;  %p2186_p13 = scmp.lt.s32.totalorder %s3287_s11, %s2184_s4 }
  0x79   : > { %v345_v42 = vmin.f32 %v343_v33, %v329_v22  ;;  %v346_v44 = vmax.f32 %v343_v33, %v329_v22  ;;  %v336_v50 = vmax.f32 %v1871_v34, %v1872_v35  ;;  %v370_v60 = vmax.f32 %v354_v29, %v340_v23  ;;  %v1894_v33 = vld [vmem:[%s2578_s1 + $0x20] sm:$0x3f]  ;;  %s1968_s10 = smul.u32 768, %s3399_s6 }
  0x7a   : > { %v358_v45 = vmin.f32 %v326_v27, %v357_v39  ;;  %v359_v46 = vmax.f32 %v326_v27, %v357_v39  ;;  %v371_v47 = vmin.f32 %v356_v38, %v342_v28  ;;  %v372_v10 = vmax.f32 %v356_v38, %v342_v28  ;;  %v1892_v27 = vld [vmem:[%s2578_s1 + $0x19] sm:$0x3f] }
  0x7b   : > { %v347_v51 = vmin.f32 %v345_v42, %v331_v32  ;;  %v348_v52 = vmax.f32 %v345_v42, %v331_v32  ;;  %v2627_v14 = vmin.f32 %v1887_v2, %v1888_v3  ;;  %v2629_v15 = vmax.f32 %v1887_v2, %v1888_v3  ;;  %v1893_v32 = vld [vmem:[%s2578_s1 + $0x1a] sm:$0x3f]  ;;  %s3285_s30 = scalar_lea.hbm %s3400_s29, %s1968_s10 }
  0x7c   : > { %v360_v53 = vmin.f32 %v328_v31, %v359_v46  ;;  %v361_v54 = vmax.f32 %v328_v31, %v359_v46  ;;  %v373_v55 = vmin.f32 %v358_v45, %v344_v37  ;;  %v385_v61 = vmin.f32 %v369_v43, %v371_v47  ;;  %v1897_v46 = vld [vmem:[%s2585_s21 + $0x18] sm:$0x3f] }
  0x7d   : > { %v349_v59 = vmin.f32 %v347_v51, %v333_v41  ;;  %v350_v62 = vmax.f32 %v347_v51, %v333_v41  ;;  %v374_v22 = vmax.f32 %v358_v45, %v344_v37  ;;  %v386_v24 = vmax.f32 %v369_v43, %v371_v47  ;;  %v1896_v41 = vld [vmem:[%s2578_s1 + $0x22] sm:$0x3f]  ;;  %v1898_v47 = vld [vmem:[%s2585_s21 + $0x19] sm:$0x3f] }
  0x7e   : > { %v362_v63 = vmin.f32 %v330_v36, %v361_v54  ;;  %v363_v0 = vmax.f32 %v330_v36, %v361_v54  ;;  %v375_v1 = vmin.f32 %v360_v53, %v346_v44  ;;  %v387_v5 = vmin.f32 %v385_v61, %v373_v55  ;;  %v2663_v54 = vld [vmem:[%s2585_s21 + $0x20] sm:$0x3f] }
  0x7f   : > { %v351_v4 = vmin.f32 %v349_v59, %v335_v49  ;;  %v2625_v12 = vmax.f32 %v349_v59, %v335_v49  ;;  %v376_v23 = vmax.f32 %v360_v53, %v346_v44  ;;  %v388_v30 = vmax.f32 %v385_v61, %v373_v55  ;;  %v2660_v53 = vld [vmem:[%s2585_s21 + $0x1a] sm:$0x3f] }
  0x80   : > { %v364_v8 = vmin.f32 %v332_v40, %v363_v0  ;;  %v365_v9 = vmax.f32 %v332_v40, %v363_v0  ;;  %v377_v11 = vmin.f32 %v362_v63, %v348_v52  ;;  %v389_v13 = vmin.f32 %v387_v5, %v375_v1  ;;  %v1895_v40 = vld [vmem:[%s2578_s1 + $0x21] sm:$0x3f] }
  0x81   : > { %v353_v16 = vmax.f32 %v351_v4, %v337_v58  ;;  %v378_v29 = vmax.f32 %v362_v63, %v348_v52  ;;  %v2637_v31 = vmax.f32 %v387_v5, %v375_v1  ;;  %v788_v37 = vmin.f32 %v1889_v20, %v1890_v21  ;;  %v2674_v0 = vld [vmem:[%s2585_s21 + $0x21] sm:$0x3f] }
  0x82   : > { %v2631_v17 = vmin.f32 %v334_v48, %v365_v9  ;;  %v367_v18 = vmax.f32 %v334_v48, %v365_v9  ;;  %v379_v19 = vmin.f32 %v364_v8, %v350_v62  ;;  %v391_v25 = vmin.f32 %v389_v13, %v377_v11 }
  0x83   : > { %v2641_v34 = vmax.f32 %v364_v8, %v350_v62  ;;  %v2645_v39 = vmax.f32 %v389_v13, %v377_v11  ;;  %v2649_v42 = vmax.f32 %v1889_v20, %v1890_v21  ;;  %v790_v43 = vmin.f32 %v1891_v26, %v1892_v27 }
  0x84   : > { %v368_v28 = vmin.f32 %v336_v50, %v367_v18  ;;  %v381_v35 = vmin.f32 %v2631_v17, %v2625_v12  ;;  %v393_v36 = vmin.f32 %v391_v25, %v379_v19  ;;  %v382_v44 = vmax.f32 %v2631_v17, %v2625_v12 }
  0x85   : > { %v2653_v45 = vmax.f32 %v391_v25, %v379_v19  ;;  %v2657_v48 = vmax.f32 %v1891_v26, %v1892_v27  ;;  %v792_v49 = vmin.f32 %v1893_v32, %v1894_v33  ;;  %v2665_v55 = vmax.f32 %v1893_v32, %v1894_v33 }
  0x86   : > { %v384_v38 = vmax.f32 %v368_v28, %v353_v16  ;;  %v383_v50 = vmin.f32 %v368_v28, %v353_v16  ;;  %v395_v56 = vmin.f32 %v393_v36, %v381_v35  ;;  %v794_v57 = vmin.f32 %v1895_v40, %v1896_v41 }
  0x87   : > { %v2667_v58 = vmax.f32 %v1895_v40, %v1896_v41  ;;  %v802_v59 = vmin.f32 %v2621_v6, %v2627_v14  ;;  %v2671_v61 = vmax.f32 %v393_v36, %v381_v35  ;;  %v796_v1 = vmin.f32 %v1897_v46, %v1898_v47 }
  0x88   : > { %v398_v51 = vmin.f32 %v370_v60, %v384_v38  ;;  %v399_v52 = vmax.f32 %v370_v60, %v384_v38  ;;  %v2677_v60 = vld [vmem:[%s2585_s21 + $0x22] sm:$0x3f]  ;;  %v2679_v3 = vmax.f32 %v1897_v46, %v1898_v47  ;;  %v2683_v4 = vmin.f32 %v2660_v53, %v2663_v54 }
  0x89   : > { %v804_v5 = vmin.f32 %v802_v59, %v788_v37  ;;  %v799_v12 = vmax.f32 %v2660_v53, %v2663_v54  ;;  %v800_v13 = vmin.f32 %v2674_v0, %v2677_v60  ;;  %v801_v16 = vmax.f32 %v2674_v0, %v2677_v60 }
  0x8a   : > { %v400_v62 = vmin.f32 %v372_v10, %v399_v52  ;;  %v401_v63 = vmax.f32 %v372_v10, %v399_v52  ;;  %v411_v2 = vmin.f32 %v398_v51, %v386_v24  ;;  %v397_v10 = vmax.f32 %v395_v56, %v383_v50 }
  0x8b   : > { %v806_v17 = vmin.f32 %v804_v5, %v790_v43  ;;  %v412_v20 = vmax.f32 %v398_v51, %v386_v24  ;;  %v817_v27 = vmin.f32 %v2623_v7, %v801_v16  ;;  %v805_v35 = vmax.f32 %v802_v59, %v788_v37 }
  0x8c   : > { %v402_v8 = vmin.f32 %v374_v22, %v401_v63  ;;  %v403_v9 = vmax.f32 %v374_v22, %v401_v63  ;;  %v413_v11 = vmin.f32 %v400_v62, %v388_v30  ;;  %v803_v22 = vmax.f32 %v2621_v6, %v2627_v14 }
  0x8d   : > { %v808_v26 = vmin.f32 %v806_v17, %v792_v49  ;;  %v414_v36 = vmax.f32 %v400_v62, %v388_v30  ;;  %v807_v40 = vmax.f32 %v804_v5, %v790_v43  ;;  %v818_v6 = vmax.f32 %v2623_v7, %v801_v16 }
  0x8e   : > { %v404_v18 = vmin.f32 %v376_v23, %v403_v9  ;;  %v405_v19 = vmax.f32 %v376_v23, %v403_v9  ;;  %v415_v21 = vmin.f32 %v402_v8, %v2637_v31  ;;  %v425_v25 = vmin.f32 %v411_v2, %v413_v11 }
  0x8f   : > { %v810_v41 = vmin.f32 %v808_v26, %v794_v57  ;;  %v416_v14 = vmax.f32 %v402_v8, %v2637_v31  ;;  %v832_v50 = vmin.f32 %v817_v27, %v803_v22  ;;  %v426_v37 = vmax.f32 %v411_v2, %v413_v11 }
  0x90   : > { %v406_v28 = vmin.f32 %v378_v29, %v405_v19  ;;  %v407_v32 = vmax.f32 %v378_v29, %v405_v19  ;;  %v417_v33 = vmin.f32 %v404_v18, %v2645_v39  ;;  %v427_v38 = vmin.f32 %v425_v25, %v415_v21 }
  0x91   : > { %v812_v29 = vmin.f32 %v810_v41, %v796_v1  ;;  %v809_v43 = vmax.f32 %v806_v17, %v792_v49  ;;  %v418_v52 = vmax.f32 %v404_v18, %v2645_v39  ;;  %v428_v56 = vmax.f32 %v425_v25, %v415_v21 }
  0x92   : > { %v2697_v23 = vmin.f32 %v2641_v34, %v407_v32  ;;  %v409_v24 = vmax.f32 %v2641_v34, %v407_v32  ;;  %v419_v46 = vmin.f32 %v406_v28, %v2653_v45  ;;  %v429_v47 = vmin.f32 %v427_v38, %v417_v33 }
  0x93   : > { %v819_v34 = vmin.f32 %v2629_v15, %v818_v6  ;;  %v420_v62 = vmax.f32 %v406_v28, %v2653_v45  ;;  %v2708_v63 = vmax.f32 %v808_v26, %v794_v57  ;;  %v820_v31 = vmax.f32 %v2629_v15, %v818_v6 }
  0x94   : > { %v410_v51 = vmin.f32 %v382_v44, %v409_v24  ;;  %v421_v30 = vmin.f32 %v2697_v23, %v2671_v61  ;;  %v431_v59 = vmin.f32 %v429_v47, %v419_v46  ;;  %v430_v44 = vmax.f32 %v427_v38, %v417_v33 }
  0x95   : > { %v2711_v60 = vmax.f32 %v810_v41, %v796_v1  ;;  %v814_v2 = vmin.f32 %v812_v29, %v2683_v4  ;;  %v822_v8 = vmax.f32 %v2649_v42, %v820_v31  ;;  %v422_v9 = vmax.f32 %v2697_v23, %v2671_v61 }
  0x96   : > { %v424_v7 = vmax.f32 %v410_v51, %v397_v10  ;;  %v423_v0 = vmin.f32 %v410_v51, %v397_v10  ;;  %v433_v49 = vmin.f32 %v431_v59, %v421_v30  ;;  %v432_v45 = vmax.f32 %v429_v47, %v419_v46 }
  0x97   : > { %v2718_v57 = vmax.f32 %v812_v29, %v2683_v4  ;;  %v834_v11 = vmin.f32 %v819_v34, %v805_v35  ;;  %v2720_v15 = vmax.f32 %v431_v59, %v421_v30  ;;  %v2722_v16 = vmax.f32 %v817_v27, %v803_v22 }
  0x98   : > { %v436_v5 = vmin.f32 %v412_v20, %v424_v7  ;;  %v437_v39 = vmax.f32 %v412_v20, %v424_v7  ;;  %v2724_v18 = vmax.f32 %v814_v2, %v800_v13  ;;  %v821_v19 = vmin.f32 %v2649_v42, %v820_v31 }
  0x99   : > { %v824_v20 = vmax.f32 %v2657_v48, %v822_v8  ;;  %v435_v21 = vmax.f32 %v433_v49, %v423_v0  ;;  %v2729_v28 = vmax.f32 %v819_v34, %v805_v35  ;;  %v848_v32 = vmin.f32 %v832_v50, %v834_v11 }
  0x9a   : > { %v438_v10 = vmin.f32 %v414_v36, %v437_v39  ;;  %v439_v1 = vmax.f32 %v414_v36, %v437_v39  ;;  %v447_v17 = vmin.f32 %v436_v5, %v426_v37  ;;  %v2731_v33 = vmax.f32 %v832_v50, %v834_v11 }
  0x9b   : > { %v826_v4 = vmax.f32 %v2665_v55, %v824_v20  ;;  %v823_v13 = vmin.f32 %v2657_v48, %v822_v8  ;;  %v448_v38 = vmax.f32 %v436_v5, %v426_v37  ;;  %v836_v23 = vmin.f32 %v821_v19, %v807_v40 }
  0x9c   : > { %v440_v61 = vmin.f32 %v416_v14, %v439_v1  ;;  %v441_v25 = vmax.f32 %v416_v14, %v439_v1  ;;  %v449_v26 = vmin.f32 %v438_v10, %v428_v56  ;;  %v2735_v14 = vmax.f32 %v821_v19, %v807_v40 }
  0x9d   : > { %v828_v41 = vmax.f32 %v2667_v58, %v826_v4  ;;  %v450_v35 = vmax.f32 %v438_v10, %v428_v56  ;;  %v825_v29 = vmin.f32 %v2665_v55, %v824_v20  ;;  %v2739_v48 = vmax.f32 %v823_v13, %v809_v43 }
  0x9e   : > { %v442_v22 = vmin.f32 %v418_v52, %v441_v25  ;;  %v443_v27 = vmax.f32 %v418_v52, %v441_v25  ;;  %v451_v36 = vmin.f32 %v440_v61, %v430_v44  ;;  %v459_v42 = vmin.f32 %v447_v17, %v449_v26 }
  0x9f   : > { %v830_v50 = vmax.f32 %v2679_v3, %v828_v41  ;;  %v452_v30 = vmax.f32 %v440_v61, %v430_v44  ;;  %v838_v52 = vmin.f32 %v823_v13, %v809_v43  ;;  %v827_v34 = vmin.f32 %v2667_v58, %v826_v4 }
  0xa0   : > { %v444_v24 = vmin.f32 %v420_v62, %v443_v27  ;;  %v445_v46 = vmax.f32 %v420_v62, %v443_v27  ;;  %v453_v6 = vmin.f32 %v442_v22, %v432_v45  ;;  %v461_v47 = vmin.f32 %v459_v42, %v451_v36 }
  0xa1   : > { %v2746_v40 = vmin.f32 %v799_v12, %v830_v50  ;;  %v454_v56 = vmax.f32 %v442_v22, %v432_v45  ;;  %v460_v55 = vmax.f32 %v447_v17, %v449_v26  ;;  %v462_v7 = vmax.f32 %v459_v42, %v451_v36 }
  0xa2   : > { %v446_v51 = vmin.f32 %v422_v9, %v445_v46  ;;  %v455_v37 = vmin.f32 %v444_v24, %v2720_v15  ;;  %v463_v59 = vmin.f32 %v461_v47, %v453_v6  ;;  %v456_v31 = vmax.f32 %v444_v24, %v2720_v15 }
  0xa3   : > { %v464_v0 = vmax.f32 %v461_v47, %v453_v6  ;;  %v2750_v43 = vmin.f32 %v2679_v3, %v828_v41  ;;  %v840_v44 = vmin.f32 %v825_v29, %v2708_v63  ;;  %v2754_v58 = vmax.f32 %v825_v29, %v2708_v63 }
  0xa4   : > { %v458_v62 = vmax.f32 %v446_v51, %v435_v21  ;;  %v847_v53 = vmax.f32 %v2746_v40, %v2724_v18  ;;  %v457_v54 = vmin.f32 %v446_v51, %v435_v21  ;;  %v465_v12 = vmin.f32 %v463_v59, %v455_v37 }
  0xa5   : > { %v842_v5 = vmin.f32 %v827_v34, %v2711_v60  ;;  %v850_v39 = vmin.f32 %v848_v32, %v836_v23  ;;  %v466_v8 = vmax.f32 %v463_v59, %v455_v37  ;;  %v2760_v3 = vmax.f32 %v827_v34, %v2711_v60  ;;  %v477_v34 = vld [vmem:[%s2570_s5] sm:$0x3f] }
  0xa6   : > { %v468_v2 = vmin.f32 %v448_v38, %v458_v62  ;;  %v469_v49 = vmax.f32 %v448_v38, %v458_v62  ;;  %v844_v15 = vmin.f32 %v2750_v43, %v2718_v57  ;;  %v862_v10 = vmax.f32 %v2722_v16, %v847_v53 }
  0xa7   : > { %v852_v63 = vmin.f32 %v850_v39, %v838_v52  ;;  %v845_v20 = vmax.f32 %v2750_v43, %v2718_v57  ;;  %v467_v21 = vmax.f32 %v465_v12, %v457_v54  ;;  %v846_v61 = vmin.f32 %v2746_v40, %v2724_v18  ;;  %v531_v43 = vld [vmem:[%s2570_s5 + $0x2] sm:$0x3f] }
  0xa8   : > { %v470_v9 = vmin.f32 %v450_v35, %v469_v49  ;;  %v471_v45 = vmax.f32 %v450_v35, %v469_v49  ;;  %v478_v11 = vmin.f32 %v468_v2, %v460_v55  ;;  %v851_v25 = vmax.f32 %v848_v32, %v836_v23 }
  0xa9   : > { %v854_v60 = vmin.f32 %v852_v63, %v840_v44  ;;  %v864_v27 = vmax.f32 %v2729_v28, %v862_v10  ;;  %v479_v36 = vmax.f32 %v468_v2, %v460_v55  ;;  %v853_v38 = vmax.f32 %v850_v39, %v838_v52 }
  0xaa   : > { %v472_v1 = vmin.f32 %v452_v30, %v471_v45  ;;  %v473_v17 = vmax.f32 %v452_v30, %v471_v45  ;;  %v480_v19 = vmin.f32 %v470_v9, %v462_v7  ;;  %v481_v24 = vmax.f32 %v470_v9, %v462_v7 }
  0xab   : > { %v856_v42 = vmin.f32 %v854_v60, %v842_v5  ;;  %v861_v6 = vmin.f32 %v2722_v16, %v847_v53  ;;  %v855_v32 = vmax.f32 %v852_v63, %v840_v44  ;;  %v863_v23 = vmin.f32 %v2729_v28, %v862_v10 }
  0xac   : > { %v474_v26 = vmin.f32 %v454_v56, %v473_v17  ;;  %v475_v4 = vmax.f32 %v454_v56, %v473_v17  ;;  %v482_v22 = vmin.f32 %v472_v1, %v464_v0  ;;  %v488_v13 = vmin.f32 %v478_v11, %v480_v19  ;;  %v1875_v56 = vld [vmem:[%s2570_s5 + $0x18] sm:$0x3f] }
  0xad   : > { %v483_v35 = vmax.f32 %v472_v1, %v464_v0  ;;  %v489_v29 = vmax.f32 %v478_v11, %v480_v19  ;;  %v858_v50 = vmin.f32 %v856_v42, %v844_v15  ;;  %v866_v51 = vmax.f32 %v2735_v14, %v864_v27 }
  0xae   : > { %v476_v41 = vmin.f32 %v456_v31, %v475_v4  ;;  %v484_v46 = vmin.f32 %v474_v26, %v466_v8  ;;  %v490_v18 = vmin.f32 %v488_v13, %v482_v22  ;;  %v2773_v30 = vmax.f32 %v474_v26, %v466_v8 }
  0xaf   : > { %v857_v37 = vmax.f32 %v854_v60, %v842_v5  ;;  %v865_v59 = vmin.f32 %v2735_v14, %v864_v27  ;;  %v491_v40 = vmax.f32 %v488_v13, %v482_v22  ;;  %v2778_v16 = vmax.f32 %v856_v42, %v844_v15 }
  0xb0   : > { %v486_v47 = vmin.f32 %v476_v41, %v467_v21  ;;  %v492_v52 = vmin.f32 %v490_v18, %v484_v46  ;;  %v867_v62 = vmin.f32 %v2739_v48, %v866_v51  ;;  %v868_v28 = vmax.f32 %v2739_v48, %v866_v51 }
  0xb1   : > { %v487_v55 = vmax.f32 %v476_v41, %v467_v21  ;;  %v493_v7 = vmax.f32 %v490_v18, %v484_v46  ;;  %v874_v0 = vmin.f32 %v861_v6, %v2731_v33  ;;  %v2783_v44 = vmax.f32 %v858_v50, %v846_v61 }
  0xb2   : > { %v494_v31 = vmin.f32 %v492_v52, %v486_v47  ;;  %v2786_v2 = vmax.f32 %v861_v6, %v2731_v33  ;;  %v876_v14 = vmin.f32 %v863_v23, %v851_v25  ;;  %v2788_v49 = vmax.f32 %v863_v23, %v851_v25 }
  0xb3   : > { %v869_v12 = vmin.f32 %v2754_v58, %v868_v28  ;;  %v2792_v5 = vmax.f32 %v2754_v58, %v868_v28  ;;  %v2794_v48 = vmax.f32 %v492_v52, %v486_v47  ;;  %v2796_v39 = vmin.f32 %v865_v59, %v853_v38  ;;  %v506_v47 = vld [vmem:[%s2570_s5 + $0x1] sm:$0x3f] }
  0xb4   : > { %v496_v53 = vmax.f32 %v494_v31, %v477_v34  ;;  %v629_v54 = vmax.f32 %v494_v31, %v1875_v56  ;;  %v2798_v8 = vmax.f32 %v865_v59, %v853_v38  ;;  %v2800_v9 = vmin.f32 %v867_v62, %v855_v32  ;;  %v1876_v56 = vld [vmem:[%s2570_s5 + $0x19] sm:$0x3f] }
  0xb5   : > { %v2802_v15 = vmax.f32 %v867_v62, %v855_v32  ;;  %v2806_v10 = vmin.f32 %v2760_v3, %v2792_v5  ;;  %v2808_v58 = vmin.f32 %v874_v0, %v876_v14  ;;  %v2810_v1 = vmax.f32 %v874_v0, %v876_v14 }
  0xb6   : > { %v497_v33 = vmin.f32 %v479_v36, %v496_v53  ;;  %v498_v45 = vmax.f32 %v479_v36, %v496_v53  ;;  %v631_v11 = vmax.f32 %v479_v36, %v629_v54  ;;  %v630_v63 = vmin.f32 %v479_v36, %v629_v54 }
  0xb7   : > { %v872_v21 = vmax.f32 %v2760_v3, %v2792_v5  ;;  %v2814_v61 = vmin.f32 %v869_v12, %v857_v37  ;;  %v2816_v4 = vmax.f32 %v869_v12, %v857_v37  ;;  %v885_v3 = vmax.f32 %v2806_v10, %v2778_v16 }
  0xb8   : > { %v499_v17 = vmin.f32 %v481_v24, %v498_v45  ;;  %v500_v19 = vmax.f32 %v481_v24, %v498_v45  ;;  %v507_v25 = vmin.f32 %v497_v33, %v489_v29  ;;  %v632_v60 = vmin.f32 %v481_v24, %v631_v11 }
  0xb9   : > { %v633_v26 = vmax.f32 %v481_v24, %v631_v11  ;;  %v508_v36 = vmax.f32 %v497_v33, %v489_v29  ;;  %v640_v41 = vmin.f32 %v630_v63, %v489_v29  ;;  %v641_v46 = vmax.f32 %v630_v63, %v489_v29 }
  0xba   : > { %v501_v22 = vmin.f32 %v483_v35, %v500_v19  ;;  %v502_v27 = vmax.f32 %v483_v35, %v500_v19  ;;  %v509_v13 = vmin.f32 %v499_v17, %v491_v40  ;;  %v510_v38 = vmax.f32 %v499_v17, %v491_v40 }
  0xbb   : > { %v635_v42 = vmax.f32 %v483_v35, %v633_v26  ;;  %v634_v23 = vmin.f32 %v483_v35, %v633_v26  ;;  %v642_v52 = vmin.f32 %v632_v60, %v491_v40  ;;  %v643_v62 = vmax.f32 %v632_v60, %v491_v40 }
  0xbc   : > { %v503_v6 = vmin.f32 %v2773_v30, %v502_v27  ;;  %v504_v18 = vmax.f32 %v2773_v30, %v502_v27  ;;  %v511_v32 = vmin.f32 %v501_v22, %v493_v7  ;;  %v517_v50 = vmin.f32 %v507_v25, %v509_v13 }
  0xbd   : > { %v636_v24 = vmin.f32 %v2773_v30, %v635_v42  ;;  %v637_v51 = vmax.f32 %v2773_v30, %v635_v42  ;;  %v512_v59 = vmax.f32 %v501_v22, %v493_v7  ;;  %v518_v28 = vmax.f32 %v507_v25, %v509_v13 }
  0xbe   : > { %v505_v37 = vmin.f32 %v487_v55, %v504_v18  ;;  %v513_v34 = vmin.f32 %v503_v6, %v2794_v48  ;;  %v514_v29 = vmax.f32 %v503_v6, %v2794_v48  ;;  %v519_v31 = vmin.f32 %v517_v50, %v511_v32 }
  0xbf   : > { %v638_v0 = vmin.f32 %v487_v55, %v637_v51  ;;  %v520_v53 = vmax.f32 %v517_v50, %v511_v32  ;;  %v644_v54 = vmin.f32 %v634_v23, %v493_v7  ;;  %v645_v33 = vmax.f32 %v634_v23, %v493_v7 }
  0xc0   : > { %v515_v14 = vmin.f32 %v505_v37, %v506_v47  ;;  %v516_v35 = vmax.f32 %v505_v37, %v506_v47  ;;  %v521_v12 = vmin.f32 %v519_v31, %v513_v34  ;;  %v646_v30 = vmin.f32 %v636_v24, %v2794_v48 }
  0xc1   : > { %v649_v45 = vmax.f32 %v638_v0, %v1876_v56  ;;  %v647_v17 = vmax.f32 %v636_v24, %v2794_v48  ;;  %v650_v19 = vmin.f32 %v640_v41, %v642_v52  ;;  %v522_v40 = vmax.f32 %v519_v31, %v513_v34 }
  0xc2   : > { %v524_v11 = vmin.f32 %v508_v36, %v516_v35  ;;  %v525_v63 = vmax.f32 %v508_v36, %v516_v35  ;;  %v648_v60 = vmin.f32 %v638_v0, %v1876_v56  ;;  %v651_v26 = vmax.f32 %v640_v41, %v642_v52 }
  0xc3   : > { %v658_v25 = vmax.f32 %v641_v46, %v649_v45  ;;  %v2828_v22 = vmax.f32 %v521_v12, %v515_v14  ;;  %v652_v42 = vmin.f32 %v650_v19, %v644_v54  ;;  %v653_v6 = vmax.f32 %v650_v19, %v644_v54 }
  0xc4   : > { %v526_v55 = vmin.f32 %v510_v38, %v525_v63  ;;  %v527_v27 = vmax.f32 %v510_v38, %v525_v63  ;;  %v532_v13 = vmin.f32 %v524_v11, %v518_v28  ;;  %v657_v7 = vmin.f32 %v641_v46, %v649_v45 }
  0xc5   : > { %v660_v18 = vmax.f32 %v643_v62, %v658_v25  ;;  %v659_v36 = vmin.f32 %v643_v62, %v658_v25  ;;  %v654_v50 = vmin.f32 %v652_v42, %v646_v30  ;;  %v655_v48 = vmax.f32 %v652_v42, %v646_v30 }
  0xc6   : > { %v528_v32 = vmin.f32 %v512_v59, %v527_v27  ;;  %v529_v23 = vmax.f32 %v512_v59, %v527_v27  ;;  %v534_v47 = vmin.f32 %v526_v55, %v520_v53  ;;  %v2836_v38 = vmin.f32 %v845_v20, %v872_v21 }
  0xc7   : > { %v661_v24 = vmin.f32 %v645_v33, %v660_v18  ;;  %v662_v51 = vmax.f32 %v645_v33, %v660_v18  ;;  %v2838_v46 = vmax.f32 %v654_v50, %v648_v60  ;;  %v665_v34 = vmin.f32 %v657_v7, %v651_v26 }
  0xc8   : > { %v530_v41 = vmin.f32 %v514_v29, %v529_v23  ;;  %v536_v52 = vmin.f32 %v528_v32, %v522_v40  ;;  %v540_v37 = vmin.f32 %v532_v13, %v534_v47  ;;  %v2844_v56 = vmin.f32 %v2806_v10, %v2778_v16 }
  0xc9   : > { %v2840_v59 = vmin.f32 %v647_v17, %v662_v51  ;;  %v890_v57 = vmin.f32 %v2808_v58, %v2796_v39  ;;  %v533_v20 = vmax.f32 %v524_v11, %v518_v28  ;;  %v667_v5 = vmin.f32 %v659_v36, %v653_v6 }
  0xca   : > { %v538_v62 = vmin.f32 %v530_v41, %v2828_v22  ;;  %v542_v29 = vmin.f32 %v540_v37, %v536_v52  ;;  %v669_v21 = vmin.f32 %v661_v24, %v655_v48  ;;  %v886_v31 = vmin.f32 %v2836_v38, %v2783_v44 }
  0xcb   : > { %v535_v0 = vmax.f32 %v526_v55, %v520_v53  ;;  %v537_v14 = vmax.f32 %v528_v32, %v522_v40  ;;  %v541_v35 = vmax.f32 %v532_v13, %v534_v47  ;;  %v539_v12 = vmax.f32 %v530_v41, %v2828_v22  ;;  %v1877_v22 = vld [vmem:[%s2570_s5 + $0x1a] sm:$0x3f]  ;;  %v554_v41 = vld [vmem:[%s2578_s1] sm:$0x3f] }
  0xcc   : > { %v544_v54 = vmin.f32 %v542_v29, %v538_v62  ;;  %v671_v33 = vmin.f32 %v2840_v59, %v2838_v46  ;;  %v673_v30 = vmin.f32 %v665_v34, %v667_v5  ;;  %v887_v45 = vmax.f32 %v2836_v38, %v2783_v44 }
  0xcd   : > { %v543_v28 = vmax.f32 %v540_v37, %v536_v52  ;;  %v666_v63 = vmax.f32 %v657_v7, %v651_v26  ;;  %v668_v17 = vmax.f32 %v659_v36, %v653_v6  ;;  %v2859_v19 = vmax.f32 %v542_v29, %v538_v62 }
  0xce   : > { %v546_v11 = vmax.f32 %v544_v54, %v531_v43  ;;  %v670_v53 = vmax.f32 %v661_v24, %v655_v48  ;;  %v675_v40 = vmin.f32 %v673_v30, %v669_v21  ;;  %v892_v60 = vmin.f32 %v890_v57, %v2800_v9 }
  0xcf   : > { %v672_v27 = vmax.f32 %v2840_v59, %v2838_v46  ;;  %v674_v13 = vmax.f32 %v665_v34, %v667_v5  ;;  %v2867_v18 = vmax.f32 %v2808_v58, %v2796_v39  ;;  %v2870_v26 = vmax.f32 %v890_v57, %v2800_v9 }
  0xd0   : > { %v547_v25 = vmin.f32 %v533_v20, %v546_v11  ;;  %v548_v55 = vmax.f32 %v533_v20, %v546_v11  ;;  %v677_v42 = vmin.f32 %v675_v40, %v671_v33  ;;  %v900_v6 = vmax.f32 %v2786_v2, %v887_v45  ;;  %v1878_v11 = vld [vmem:[%s2578_s1 + $0x18] sm:$0x3f] }
  0xd1   : > { %v676_v47 = vmax.f32 %v673_v30, %v669_v21  ;;  %v2874_v50 = vmin.f32 %v892_v60, %v2814_v61  ;;  %v2877_v48 = vmax.f32 %v892_v60, %v2814_v61  ;;  %v2880_v24 = vmin.f32 %v2786_v2, %v887_v45 }
  0xd2   : > { %v549_v7 = vmin.f32 %v535_v0, %v548_v55  ;;  %v550_v32 = vmax.f32 %v535_v0, %v548_v55  ;;  %v555_v23 = vmin.f32 %v547_v25, %v541_v35  ;;  %v679_v36 = vmax.f32 %v677_v42, %v1877_v22 }
  0xd3   : > { %v678_v51 = vmax.f32 %v675_v40, %v671_v33  ;;  %v2884_v46 = vmin.f32 %v2788_v49, %v900_v6  ;;  %v902_v59 = vmax.f32 %v2788_v49, %v900_v6  ;;  %v556_v62 = vmax.f32 %v547_v25, %v541_v35 }
  0xd4   : > { %v551_v39 = vmin.f32 %v537_v14, %v550_v32  ;;  %v552_v58 = vmax.f32 %v537_v14, %v550_v32  ;;  %v557_v9 = vmin.f32 %v549_v7, %v543_v28  ;;  %v680_v52 = vmin.f32 %v666_v63, %v679_v36 }
  0xd5   : > { %v681_v37 = vmax.f32 %v666_v63, %v679_v36  ;;  %v558_v2 = vmax.f32 %v549_v7, %v543_v28  ;;  %v896_v36 = vmin.f32 %v2874_v50, %v2844_v56 }
  0xd6   : > { %v553_v34 = vmin.f32 %v539_v12, %v552_v58  ;;  %v559_v61 = vmin.f32 %v551_v39, %v2859_v19  ;;  %v563_v29 = vmin.f32 %v555_v23, %v557_v9  ;;  %v689_v20 = vmin.f32 %v680_v52, %v674_v13 }
  0xd7   : > { %v682_v57 = vmin.f32 %v668_v17, %v681_v37  ;;  %v683_v43 = vmax.f32 %v668_v17, %v681_v37  ;;  %v564_v0 = vmax.f32 %v555_v23, %v557_v9  ;;  %v560_v54 = vmax.f32 %v551_v39, %v2859_v19 }
  0xd8   : > { %v561_v5 = vmin.f32 %v553_v34, %v554_v41  ;;  %v562_v21 = vmax.f32 %v553_v34, %v554_v41  ;;  %v565_v14 = vmin.f32 %v563_v29, %v559_v61  ;;  %v566_v49 = vmax.f32 %v563_v29, %v559_v61  ;;  %v573_v34 = vld [vmem:[%s2578_s1 + $0x1] sm:$0x3f] }
  0xd9   : > { %v684_v33 = vmin.f32 %v670_v53, %v683_v43  ;;  %v685_v30 = vmax.f32 %v670_v53, %v683_v43  ;;  %v691_v45 = vmin.f32 %v682_v57, %v676_v47  ;;  %v690_v63 = vmax.f32 %v680_v52, %v674_v13 }
  0xda   : > { %v568_v12 = vmin.f32 %v556_v62, %v562_v21  ;;  %v569_v35 = vmax.f32 %v556_v62, %v562_v21  ;;  %v2890_v40 = vmax.f32 %v565_v14, %v561_v5  ;;  %v692_v42 = vmax.f32 %v682_v57, %v676_v47 }
  0xdb   : > { %v686_v28 = vmin.f32 %v672_v27, %v685_v30  ;;  %v693_v60 = vmin.f32 %v684_v33, %v678_v51  ;;  %v697_v17 = vmin.f32 %v689_v20, %v691_v45  ;;  %v698_v7 = vmax.f32 %v689_v20, %v691_v45  ;;  %v1879_v45 = vld [vmem:[%s2578_s1 + $0x19] sm:$0x3f] }
  0xdc   : > { %v570_v25 = vmin.f32 %v558_v2, %v569_v35  ;;  %v571_v55 = vmax.f32 %v558_v2, %v569_v35  ;;  %v574_v22 = vmin.f32 %v568_v12, %v564_v0  ;;  %v904_v13 = vmax.f32 %v2798_v8, %v902_v59 }
  0xdd   : > { %v695_v6 = vmin.f32 %v686_v28, %v1878_v11  ;;  %v696_v19 = vmax.f32 %v686_v28, %v1878_v11  ;;  %v699_v53 = vmin.f32 %v697_v17, %v693_v60  ;;  %v694_v39 = vmax.f32 %v684_v33, %v678_v51 }
  0xde   : > { %v572_v32 = vmin.f32 %v560_v54, %v571_v55  ;;  %v576_v23 = vmin.f32 %v570_v25, %v566_v49  ;;  %v700_v27 = vmax.f32 %v697_v17, %v693_v60  ;;  %v2898_v47 = vmax.f32 %v2874_v50, %v2844_v56 }
  0xdf   : > { %v702_v58 = vmin.f32 %v690_v63, %v696_v19  ;;  %v703_v9 = vmax.f32 %v690_v63, %v696_v19  ;;  %v903_v37 = vmin.f32 %v2798_v8, %v902_v59  ;;  %v701_v62 = vmax.f32 %v699_v53, %v695_v6 }
  0xe0   : > { %v578_v41 = vmin.f32 %v572_v32, %v2890_v40  ;;  %v580_v52 = vmin.f32 %v574_v22, %v576_v23  ;;  %v575_v57 = vmax.f32 %v568_v12, %v564_v0  ;;  %v2905_v51 = vmax.f32 %v896_v36, %v886_v31 }
  0xe1   : > { %v704_v61 = vmin.f32 %v692_v42, %v703_v9  ;;  %v705_v29 = vmax.f32 %v692_v42, %v703_v9  ;;  %v708_v2 = vmin.f32 %v702_v58, %v698_v7  ;;  %v906_v20 = vmax.f32 %v2802_v15, %v904_v13 }
  0xe2   : > { %v582_v43 = vmin.f32 %v580_v52, %v578_v41  ;;  %v577_v5 = vmax.f32 %v570_v25, %v566_v49  ;;  %v905_v8 = vmin.f32 %v2802_v15, %v904_v13  ;;  %v579_v59 = vmax.f32 %v572_v32, %v2890_v40  ;;  %v590_v25 = vld [vmem:[%s2578_s1 + $0x2] sm:$0x3f] }
  0xe3   : > { %v706_v56 = vmin.f32 %v694_v39, %v705_v29  ;;  %v710_v50 = vmin.f32 %v704_v61, %v700_v27  ;;  %v581_v21 = vmax.f32 %v574_v22, %v576_v23  ;;  %v709_v54 = vmax.f32 %v702_v58, %v698_v7 }
  0xe4   : > { %v584_v14 = vmax.f32 %v582_v43, %v573_v34  ;;  %v583_v0 = vmax.f32 %v580_v52, %v578_v41  ;;  %v908_v44 = vmax.f32 %v2816_v4, %v906_v20  ;;  %v711_v12 = vmax.f32 %v704_v61, %v700_v27  ;;  %v1880_v41 = vld [vmem:[%s2578_s1 + $0x1a] sm:$0x3f] }
  0xe5   : > { %v712_v33 = vmin.f32 %v706_v56, %v701_v62  ;;  %v714_v30 = vmin.f32 %v708_v2, %v710_v50  ;;  %v910_v49 = vmin.f32 %v2880_v24, %v2810_v1  ;;  %v2915_v15 = vmin.f32 %v2816_v4, %v906_v20 }
  0xe6   : > { %v585_v38 = vmin.f32 %v575_v57, %v584_v14  ;;  %v586_v31 = vmax.f32 %v575_v57, %v584_v14  ;;  %v2919_v11 = vmax.f32 %v2880_v24, %v2810_v1  ;;  %v912_v63 = vmin.f32 %v2884_v46, %v2867_v18 }
  0xe7   : > { %v716_v35 = vmin.f32 %v714_v30, %v712_v33  ;;  %v713_v17 = vmax.f32 %v706_v56, %v701_v62  ;;  %v715_v55 = vmax.f32 %v708_v2, %v710_v50  ;;  %v2927_v42 = vmin.f32 %v885_v3, %v908_v44 }
  0xe8   : > { %v587_v40 = vmin.f32 %v577_v5, %v586_v31  ;;  %v588_v28 = vmax.f32 %v577_v5, %v586_v31  ;;  %v591_v60 = vmin.f32 %v585_v38, %v581_v21  ;;  %v2931_v4 = vmax.f32 %v2884_v46, %v2867_v18 }
  0xe9   : > { %v718_v22 = vmax.f32 %v716_v35, %v1879_v45  ;;  %v592_v24 = vmax.f32 %v585_v38, %v581_v21  ;;  %v717_v19 = vmax.f32 %v714_v30, %v712_v33  ;;  %v914_v23 = vmin.f32 %v903_v37, %v2870_v26 }
  0xea   : > { %v589_v1 = vmin.f32 %v579_v59, %v588_v28  ;;  %v593_v6 = vmin.f32 %v587_v40, %v583_v0  ;;  %v594_v7 = vmax.f32 %v587_v40, %v583_v0  ;;  %v915_v18 = vmax.f32 %v903_v37, %v2870_v26 }
  0xeb   : > { %v719_v53 = vmin.f32 %v709_v54, %v718_v22  ;;  %v720_v32 = vmax.f32 %v709_v54, %v718_v22  ;;  %v922_v52 = vmin.f32 %v910_v49, %v912_v63  ;;  %v916_v29 = vmin.f32 %v905_v8, %v2877_v48  ;;  %v603_v54 = vld [vmem:[%s2585_s21] sm:$0x3f] }
  0xec   : > { %v595_v36 = vmin.f32 %v589_v1, %v590_v25  ;;  %v596_v13 = vmax.f32 %v589_v1, %v590_v25  ;;  %v597_v39 = vmin.f32 %v591_v60, %v593_v6  ;;  %v598_v16 = vmax.f32 %v591_v60, %v593_v6  ;;  %v1881_v6 = vld [vmem:[%s2585_s21 + $0x18] sm:$0x3f] }
  0xed   : > { %v721_v10 = vmin.f32 %v711_v12, %v720_v32  ;;  %v722_v3 = vmax.f32 %v711_v12, %v720_v32  ;;  %v725_v27 = vmin.f32 %v719_v53, %v715_v55  ;;  %v726_v62 = vmax.f32 %v719_v53, %v715_v55 }
  0xee   : > { %v599_v46 = vmax.f32 %v597_v39, %v595_v36  ;;  %v600_v58 = vmin.f32 %v592_v24, %v596_v13  ;;  %v601_v9 = vmax.f32 %v592_v24, %v596_v13  ;;  %v924_v20 = vmin.f32 %v922_v52, %v914_v23 }
  0xef   : > { %v723_v34 = vmin.f32 %v713_v17, %v722_v3  ;;  %v727_v61 = vmin.f32 %v721_v10, %v717_v19  ;;  %v728_v43 = vmax.f32 %v721_v10, %v717_v19  ;;  %v2938_v37 = vmax.f32 %v905_v8, %v2877_v48 }
  0xf0   : > { %v602_v2 = vmin.f32 %v594_v7, %v601_v9  ;;  %v604_v57 = vmin.f32 %v600_v58, %v598_v16  ;;  %v918_v21 = vmin.f32 %v2915_v15, %v2898_v47  ;;  %v921_v14 = vmax.f32 %v2927_v42, %v2905_v51 }
  0xf1   : > { %v729_v5 = vmin.f32 %v723_v34, %v1880_v41  ;;  %v730_v56 = vmax.f32 %v723_v34, %v1880_v41  ;;  %v731_v50 = vmin.f32 %v725_v27, %v727_v61  ;;  %v732_v59 = vmax.f32 %v725_v27, %v727_v61  ;;  %v1923_v34 = vld [vmem:[%s2570_s5 + $0x28] sm:$0x3f] }
  0xf2   : > { %v606_v26 = vmin.f32 %v602_v2, %v599_v46  ;;  %v926_v44 = vmin.f32 %v924_v20, %v916_v29  ;;  %v605_v38 = vmax.f32 %v600_v58, %v598_v16  ;;  %v919_v45 = vmax.f32 %v2915_v15, %v2898_v47 }
  0xf3   : > { %v733_v0 = vmax.f32 %v731_v50, %v729_v5  ;;  %v734_v33 = vmin.f32 %v726_v62, %v730_v56  ;;  %v735_v30 = vmax.f32 %v726_v62, %v730_v56  ;;  %v920_v48 = vmin.f32 %v2927_v42, %v2905_v51  ;;  %v1924_v62 = vld [vmem:[%s2570_s5 + $0x29] sm:$0x3f] }
  0xf4   : > { %v608_v31 = vmin.f32 %v604_v57, %v606_v26  ;;  %v923_v35 = vmax.f32 %v910_v49, %v912_v63  ;;  %v931_v40 = vmin.f32 %v2919_v11, %v921_v14  ;;  %v607_v28 = vmax.f32 %v602_v2, %v599_v46  ;;  %v614_v49 = vld [vmem:[%s2585_s21 + $0x1] sm:$0x3f] }
  0xf5   : > { %v736_v8 = vmin.f32 %v728_v43, %v735_v30  ;;  %v739_v12 = vmin.f32 %v734_v33, %v732_v59  ;;  %v609_v60 = vmax.f32 %v604_v57, %v606_v26  ;;  %v932_v25 = vmax.f32 %v2919_v11, %v921_v14  ;;  %v621_v43 = vld [vmem:[%s2585_s21 + $0x2] sm:$0x3f]  ;;  %v1926_v26 = vld [vmem:[%s2570_s5 + $0x30] sm:$0x3f] }
  0xf6   : > { %v610_v17 = vmax.f32 %v608_v31, %v603_v54  ;;  %v925_v22 = vmax.f32 %v922_v52, %v914_v23  ;;  %v2951_v1 = vmax.f32 %v924_v20, %v916_v29  ;;  %v928_v47 = vmin.f32 %v926_v44, %v918_v21 }
  0xf7   : > { %v741_v55 = vmin.f32 %v736_v8, %v733_v0  ;;  %v933_v51 = vmin.f32 %v2931_v4, %v932_v25  ;;  %v934_v42 = vmax.f32 %v2931_v4, %v932_v25  ;;  %v740_v63 = vmax.f32 %v734_v33, %v732_v59  ;;  %v1925_v59 = vld [vmem:[%s2570_s5 + $0x2a] sm:$0x3f] }
  0xf8   : > { %v611_v15 = vmin.f32 %v605_v38, %v610_v17  ;;  %v612_v24 = vmax.f32 %v605_v38, %v610_v17  ;;  %v742_v19 = vmax.f32 %v736_v8, %v733_v0  ;;  %v941_v53 = vmin.f32 %v931_v40, %v923_v35  ;;  %v1928_v17 = vld [vmem:[%s2570_s5 + $0x32] sm:$0x3f]  ;;  %v1929_v25 = vld [vmem:[%s2578_s1 + $0x28] sm:$0x3f] }
  0xf9   : > { %v743_v7 = vmin.f32 %v739_v12, %v741_v55  ;;  %v935_v36 = vmin.f32 %v915_v18, %v934_v42  ;;  %v744_v13 = vmax.f32 %v739_v12, %v741_v55  ;;  %v936_v16 = vmax.f32 %v915_v18, %v934_v42  ;;  %v1882_v18 = vld [vmem:[%s2585_s21 + $0x19] sm:$0x3f]  ;;  %v1931_v42 = vld [vmem:[%s2578_s1 + $0x2a] sm:$0x3f] }
  0xfa   : > { %v613_v32 = vmin.f32 %v607_v28, %v612_v24  ;;  %v615_v11 = vmin.f32 %v611_v15, %v609_v60  ;;  %v616_v23 = vmax.f32 %v611_v15, %v609_v60  ;;  %v943_v10 = vmin.f32 %v933_v51, %v925_v22  ;;  %v1927_v60 = vld [vmem:[%s2570_s5 + $0x31] sm:$0x3f]  ;;  %v1883_v55 = vld [vmem:[%s2585_s21 + $0x1a] sm:$0x3f] }
  0xfb   : > { %v745_v39 = vmax.f32 %v743_v7, %v1881_v6  ;;  %v929_v27 = vmax.f32 %v926_v44, %v918_v21  ;;  %v930_v46 = vmax.f32 %v928_v47, %v920_v48  ;;  %v937_v41 = vmin.f32 %v2938_v37, %v936_v16  ;;  %v1930_v6 = vld [vmem:[%s2578_s1 + $0x29] sm:$0x3f] }
  0xfc   : > { %v617_v3 = vmin.f32 %v613_v32, %v614_v49  ;;  %v618_v4 = vmax.f32 %v613_v32, %v614_v49  ;;  %v938_v52 = vmax.f32 %v2938_v37, %v936_v16  ;;  %v945_v2 = vmin.f32 %v935_v36, %v2951_v1  ;;  %v1903_v49 = vld [vmem:[%s2570_s5 + $0x10] sm:$0x3f]  ;;  %v1913_v7 = vld [vmem:[%s2570_s5 + $0x28] sm:$0x3f] }
  0xfd   : > { %v746_v58 = vmin.f32 %v740_v63, %v745_v39  ;;  %v747_v9 = vmax.f32 %v740_v63, %v745_v39  ;;  %v951_v57 = vmin.f32 %v941_v53, %v943_v10  ;;  %v947_v14 = vmin.f32 %v937_v41, %v929_v27  ;;  %v1932_v32 = vld [vmem:[%s2578_s1 + $0x30] sm:$0x3f] }
  0xfe   : > { %v619_v61 = vmax.f32 %v615_v11, %v617_v3  ;;  %v620_v29 = vmin.f32 %v616_v23, %v618_v4  ;;  %v939_v50 = vmin.f32 %v919_v45, %v938_v52  ;;  %v2967_v54 = vmin.f32 %v1923_v34, %v1924_v62  ;;  %v1933_v11 = vld [vmem:[%s2578_s1 + $0x31] sm:$0x3f] }
  0xff   : > { %v748_v20 = vmin.f32 %v742_v19, %v747_v9  ;;  %v750_v5 = vmin.f32 %v746_v58, %v744_v13  ;;  %v751_v56 = vmax.f32 %v746_v58, %v744_v13  ;;  %v942_v30 = vmax.f32 %v931_v40, %v923_v35  ;;  %v1934_v23 = vld [vmem:[%s2578_s1 + $0x32] sm:$0x3f]  ;;  %v1936_v58 = vld [vmem:[%s2585_s21 + $0x29] sm:$0x3f] }
 0x100   : > { %v622_v21 = vmin.f32 %v620_v29, %v619_v61  ;;  %v623_v37 = vmax.f32 %v620_v29, %v619_v61  ;;  %v2969_v44 = vmax.f32 %v1923_v34, %v1924_v62  ;;  %v949_v31 = vmin.f32 %v939_v50, %v930_v46  ;;  %v3011_v9 = vld [vmem:[%s2585_s21 + $0x2a] sm:$0x3f]  ;;  %v3023_v29 = vld [vmem:[%s2585_s21 + $0x31] sm:$0x3f] }
 0x101   : > { %v752_v0 = vmin.f32 %v748_v20, %v1882_v18  ;;  %v753_v33 = vmax.f32 %v748_v20, %v1882_v18  ;;  %v953_v45 = vmin.f32 %v951_v57, %v945_v2  ;;  %v2971_v48 = vmin.f32 %v1925_v59, %v1926_v26  ;;  %v3026_v18 = vld [vmem:[%s2585_s21 + $0x32] sm:$0x3f] }
 0x102   : > { %v624_v38 = vmax.f32 %v622_v21, %v621_v43  ;;  %v944_v28 = vmax.f32 %v933_v51, %v925_v22  ;;  %v2976_v35 = vmax.f32 %v1925_v59, %v1926_v26  ;;  %v2980_v47 = vmax.f32 %v935_v36, %v2951_v1 }
 0x103   : > { %v754_v8 = vmax.f32 %v750_v5, %v752_v0  ;;  %v755_v12 = vmin.f32 %v751_v56, %v753_v33  ;;  %v952_v15 = vmax.f32 %v941_v53, %v943_v10  ;;  %v955_v24 = vmin.f32 %v953_v45, %v947_v14  ;;  %v1935_v10 = vld [vmem:[%s2585_s21 + $0x28] sm:$0x3f] }
 0x104   : > { %v625_v40 = vmin.f32 %v623_v37, %v624_v38  ;;  %v2985_v63 = vmax.f32 %v937_v41, %v929_v27  ;;  %v2987_v19 = vmax.f32 %v939_v50, %v930_v46  ;;  %v954_v1 = vmax.f32 %v951_v57, %v945_v2  ;;  %v3014_v41 = vld [vmem:[%s2585_s21 + $0x30] sm:$0x3f] }
 0x105   : > { %v757_v22 = vmin.f32 %v755_v12, %v754_v8  ;;  %v758_v51 = vmax.f32 %v755_v12, %v754_v8  ;;  %v957_v53 = vmin.f32 %v955_v24, %v949_v31  ;;  %v2998_v36 = vmin.f32 %v1927_v60, %v1928_v17 }
 0x106   : > { %626 = vst [vmem:[%s2993_s24] sm:$0x3f] %v625_v40  ;;  %v3000_v13 = vmax.f32 %v1927_v60, %v1928_v17  ;;  %v3002_v16 = vmax.f32 %v953_v45, %v947_v14  ;;  %v3005_v3 = vmin.f32 %v1929_v25, %v1930_v6  ;;  %v3007_v4 = vmax.f32 %v1929_v25, %v1930_v6 }
 0x107   : > { %v759_v39 = vmax.f32 %v757_v22, %v1883_v55  ;;  %v959_v27 = vmax.f32 %v957_v53, %v1903_v49  ;;  %v1093_v46 = vmax.f32 %v957_v53, %v1913_v7  ;;  %v3016_v52 = vmin.f32 %v1931_v42, %v1932_v32 }
 0x108   : > { %v3018_v34 = vmax.f32 %v1931_v42, %v1932_v32  ;;  %v3020_v61 = vmax.f32 %v955_v24, %v949_v31  ;;  %v3028_v2 = vmin.f32 %v1933_v11, %v1934_v23  ;;  %v3032_v57 = vmin.f32 %v2967_v54, %v2971_v48 }
 0x109   : > { %v760_v62 = vmin.f32 %v758_v51, %v759_v39  ;;  %v960_v43 = vmin.f32 %v942_v30, %v959_v27  ;;  %v961_v20 = vmax.f32 %v942_v30, %v959_v27  ;;  %v1095_v5 = vmax.f32 %v942_v30, %v1093_v46  ;;  %v1904_v51 = vld [vmem:[%s2570_s5 + $0x11] sm:$0x3f]  ;;  %v1914_v39 = vld [vmem:[%s2570_s5 + $0x29] sm:$0x3f] }
 0x10a   : > { %v3034_v56 = vmax.f32 %v1933_v11, %v1934_v23  ;;  %v1094_v50 = vmin.f32 %v942_v30, %v1093_v46  ;;  %v3037_v59 = vmin.f32 %v1935_v10, %v1936_v58  ;;  %v3039_v26 = vmax.f32 %v1935_v10, %v1936_v58 }
 0x10b   : > { %1884 = vst [vmem:[%s2993_s24 + $0x8] sm:$0x3f] %v760_v62  ;;  %v3043_v21 = vmin.f32 %v3011_v9, %v3014_v41  ;;  %v962_v37 = vmin.f32 %v944_v28, %v961_v20  ;;  %v963_v14 = vmax.f32 %v944_v28, %v961_v20  ;;  %v3049_v33 = vmax.f32 %v3023_v29, %v3026_v18 }
 0x10c   : > { %v970_v38 = vmin.f32 %v960_v43, %v952_v15  ;;  %v1096_v30 = vmin.f32 %v944_v28, %v1095_v5  ;;  %v1097_v31 = vmax.f32 %v944_v28, %v1095_v5  ;;  %v3053_v45 = vmin.f32 %v3032_v57, %v2998_v36 }
 0x10d   : > { %v964_v8 = vmin.f32 %v2980_v47, %v963_v14  ;;  %v965_v12 = vmax.f32 %v2980_v47, %v963_v14  ;;  %v971_v60 = vmax.f32 %v960_v43, %v952_v15  ;;  %v972_v17 = vmin.f32 %v962_v37, %v954_v1 }
 0x10e   : > { %v973_v25 = vmax.f32 %v962_v37, %v954_v1  ;;  %v1099_v40 = vmax.f32 %v2980_v47, %v1097_v31  ;;  %v1104_v55 = vmin.f32 %v1094_v50, %v952_v15  ;;  %v1105_v24 = vmax.f32 %v1094_v50, %v952_v15 }
 0x10f   : > { %v966_v6 = vmin.f32 %v2985_v63, %v965_v12  ;;  %v967_v28 = vmax.f32 %v2985_v63, %v965_v12  ;;  %v974_v42 = vmin.f32 %v964_v8, %v3002_v16  ;;  %v1098_v22 = vmin.f32 %v2980_v47, %v1097_v31 }
 0x110   : > { %v980_v49 = vmin.f32 %v970_v38, %v972_v17  ;;  %v1100_v7 = vmin.f32 %v2985_v63, %v1099_v40  ;;  %v1101_v32 = vmax.f32 %v2985_v63, %v1099_v40  ;;  %v1106_v53 = vmin.f32 %v1096_v30, %v954_v1 }
 0x111   : > { %v968_v11 = vmin.f32 %v2987_v19, %v967_v28  ;;  %v975_v23 = vmax.f32 %v964_v8, %v3002_v16  ;;  %v976_v15 = vmin.f32 %v966_v6, %v3020_v61  ;;  %v1107_v10 = vmax.f32 %v1096_v30, %v954_v1 }
 0x112   : > { %v977_v27 = vmax.f32 %v966_v6, %v3020_v61  ;;  %v981_v46 = vmax.f32 %v970_v38, %v972_v17  ;;  %v982_v58 = vmin.f32 %v980_v49, %v974_v42  ;;  %v1102_v47 = vmin.f32 %v2987_v19, %v1101_v32 }
 0x113   : > { %v978_v62 = vmin.f32 %v968_v11, %v1904_v51  ;;  %v979_v43 = vmax.f32 %v968_v11, %v1904_v51  ;;  %v983_v20 = vmax.f32 %v980_v49, %v974_v42  ;;  %v1108_v63 = vmin.f32 %v1098_v22, %v3002_v16 }
 0x114   : > { %v984_v5 = vmin.f32 %v982_v58, %v976_v15  ;;  %v1109_v50 = vmax.f32 %v1098_v22, %v3002_v16  ;;  %v1110_v37 = vmin.f32 %v1100_v7, %v3020_v61  ;;  %v1113_v14 = vmax.f32 %v1102_v47, %v1914_v39 }
 0x115   : > { %v987_v31 = vmin.f32 %v971_v60, %v979_v43  ;;  %v988_v8 = vmax.f32 %v971_v60, %v979_v43  ;;  %v1111_v1 = vmax.f32 %v1100_v7, %v3020_v61  ;;  %v1114_v30 = vmin.f32 %v1104_v55, %v1106_v53 }
 0x116   : > { %v985_v38 = vmax.f32 %v982_v58, %v976_v15  ;;  %v1112_v12 = vmin.f32 %v1102_v47, %v1914_v39  ;;  %v1115_v17 = vmax.f32 %v1104_v55, %v1106_v53  ;;  %v1122_v19 = vmax.f32 %v1105_v24, %v1113_v14 }
 0x117   : > { %v3075_v40 = vmax.f32 %v984_v5, %v978_v62  ;;  %v989_v6 = vmin.f32 %v973_v25, %v988_v8  ;;  %v990_v28 = vmax.f32 %v973_v25, %v988_v8  ;;  %v995_v42 = vmin.f32 %v987_v31, %v981_v46  ;;  %v1905_v5 = vld [vmem:[%s2570_s5 + $0x12] sm:$0x3f] }
 0x118   : > { %v1116_v51 = vmin.f32 %v1114_v30, %v1108_v63  ;;  %v1117_v49 = vmax.f32 %v1114_v30, %v1108_v63  ;;  %v1121_v16 = vmin.f32 %v1105_v24, %v1113_v14  ;;  %v1124_v22 = vmax.f32 %v1107_v10, %v1122_v19 }
 0x119   : > { %v991_v32 = vmin.f32 %v975_v23, %v990_v28  ;;  %v992_v11 = vmax.f32 %v975_v23, %v990_v28  ;;  %v997_v0 = vmin.f32 %v989_v6, %v983_v20  ;;  %v1123_v60 = vmin.f32 %v1107_v10, %v1122_v19 }
 0x11a   : > { %v1118_v43 = vmin.f32 %v1116_v51, %v1110_v37  ;;  %v1119_v61 = vmax.f32 %v1116_v51, %v1110_v37  ;;  %v1125_v7 = vmin.f32 %v1109_v50, %v1124_v22  ;;  %v1126_v15 = vmax.f32 %v1109_v50, %v1124_v22 }
 0x11b   : > { %v993_v55 = vmin.f32 %v977_v27, %v992_v11  ;;  %v999_v53 = vmin.f32 %v991_v32, %v985_v38  ;;  %v1003_v39 = vmin.f32 %v995_v42, %v997_v0  ;;  %v1264_v25 = vmin.f32 %v3023_v29, %v3026_v18 }
 0x11c   : > { %v3079_v58 = vmax.f32 %v1118_v43, %v1112_v12  ;;  %v3081_v47 = vmin.f32 %v1111_v1, %v1126_v15  ;;  %v1129_v24 = vmin.f32 %v1121_v16, %v1115_v17  ;;  %v3085_v23 = vmax.f32 %v2967_v54, %v2971_v48 }
 0x11d   : > { %v1001_v10 = vmin.f32 %v993_v55, %v3075_v40  ;;  %v1005_v62 = vmin.f32 %v1003_v39, %v999_v53  ;;  %v3090_v27 = vmax.f32 %v3032_v57, %v2998_v36  ;;  %v1270_v63 = vmin.f32 %v3053_v45, %v3005_v3 }
 0x11e   : > { %v1131_v50 = vmin.f32 %v1123_v60, %v1117_v49  ;;  %v1133_v37 = vmin.f32 %v1125_v7, %v1119_v61  ;;  %v3097_v14 = vmin.f32 %v2969_v44, %v3049_v33  ;;  %v1282_v54 = vmax.f32 %v2969_v44, %v3049_v33 }
 0x11f   : > { %v996_v48 = vmax.f32 %v987_v31, %v981_v46  ;;  %v998_v8 = vmax.f32 %v989_v6, %v983_v20  ;;  %v1000_v1 = vmax.f32 %v991_v32, %v985_v38  ;;  %v1007_v30 = vmin.f32 %v1005_v62, %v1001_v10  ;;  %v1915_v38 = vld [vmem:[%s2570_s5 + $0x2a] sm:$0x3f] }
 0x120   : > { %v1002_v36 = vmax.f32 %v993_v55, %v3075_v40  ;;  %v1004_v57 = vmax.f32 %v995_v42, %v997_v0  ;;  %v1135_v12 = vmin.f32 %v3081_v47, %v3079_v58  ;;  %v1137_v19 = vmin.f32 %v1129_v24, %v1131_v50 }
 0x121   : > { %v1006_v28 = vmax.f32 %v1003_v39, %v999_v53  ;;  %v1009_v51 = vmax.f32 %v1007_v30, %v1905_v5  ;;  %v1130_v22 = vmax.f32 %v1121_v16, %v1115_v17  ;;  %v1272_v11 = vmin.f32 %v1270_v63, %v3016_v52 }
 0x122   : > { %v3105_v43 = vmax.f32 %v1005_v62, %v1001_v10  ;;  %v1132_v44 = vmax.f32 %v1123_v60, %v1117_v49  ;;  %v1134_v33 = vmax.f32 %v1125_v7, %v1119_v61  ;;  %v1139_v46 = vmin.f32 %v1137_v19, %v1133_v37 }
 0x123   : > { %v1010_v20 = vmin.f32 %v996_v48, %v1009_v51  ;;  %v1011_v31 = vmax.f32 %v996_v48, %v1009_v51  ;;  %v1136_v0 = vmax.f32 %v3081_v47, %v3079_v58  ;;  %v1138_v40 = vmax.f32 %v1129_v24, %v1131_v50  ;;  %v1906_v58 = vld [vmem:[%s2578_s1 + $0x10] sm:$0x3f] }
 0x124   : > { %v1141_v6 = vmin.f32 %v1139_v46, %v1135_v12  ;;  %v3112_v42 = vmax.f32 %v3053_v45, %v3005_v3  ;;  %v3115_v17 = vmax.f32 %v1270_v63, %v3016_v52  ;;  %v3118_v49 = vmin.f32 %v2976_v35, %v1282_v54 }
 0x125   : > { %v1012_v16 = vmin.f32 %v998_v8, %v1011_v31  ;;  %v1013_v32 = vmax.f32 %v998_v8, %v1011_v31  ;;  %v1018_v60 = vmin.f32 %v1010_v20, %v1004_v57  ;;  %v1274_v61 = vmin.f32 %v1272_v11, %v3028_v2 }
 0x126   : > { %v1140_v7 = vmax.f32 %v1137_v19, %v1133_v37  ;;  %v1143_v15 = vmax.f32 %v1141_v6, %v1915_v38  ;;  %v1284_v55 = vmax.f32 %v2976_v35, %v1282_v54  ;;  %v3124_v53 = vmin.f32 %v3097_v14, %v3085_v23 }
 0x127   : > { %v1014_v3 = vmin.f32 %v1000_v1, %v1013_v32  ;;  %v1015_v45 = vmax.f32 %v1000_v1, %v1013_v32  ;;  %v1020_v52 = vmin.f32 %v1012_v16, %v1006_v28  ;;  %v3127_v39 = vmax.f32 %v1272_v11, %v3028_v2 }
 0x128   : > { %v1019_v47 = vmax.f32 %v1010_v20, %v1004_v57  ;;  %v1142_v24 = vmax.f32 %v1139_v46, %v1135_v12  ;;  %v1144_v10 = vmin.f32 %v1130_v22, %v1143_v15  ;;  %v1145_v62 = vmax.f32 %v1130_v22, %v1143_v15  ;;  %v1916_v20 = vld [vmem:[%s2578_s1 + $0x28] sm:$0x3f] }
 0x129   : > { %v1016_v63 = vmin.f32 %v1002_v36, %v1015_v45  ;;  %v1022_v5 = vmin.f32 %v1014_v3, %v3105_v43  ;;  %v1026_v50 = vmin.f32 %v1018_v60, %v1020_v52  ;;  %v1276_v35 = vmin.f32 %v1274_v61, %v3037_v59 }
 0x12a   : > { %v1021_v37 = vmax.f32 %v1012_v16, %v1006_v28  ;;  %v1146_v54 = vmin.f32 %v1132_v44, %v1145_v62  ;;  %v1147_v48 = vmax.f32 %v1132_v44, %v1145_v62  ;;  %v1153_v8 = vmin.f32 %v1144_v10, %v1138_v40 }
 0x12b   : > { %v1024_v1 = vmin.f32 %v1016_v63, %v1906_v58  ;;  %v1025_v30 = vmax.f32 %v1016_v63, %v1906_v58  ;;  %v1027_v2 = vmax.f32 %v1018_v60, %v1020_v52  ;;  %v1028_v19 = vmin.f32 %v1026_v50, %v1022_v5 }
 0x12c   : > { %v1023_v57 = vmax.f32 %v1014_v3, %v3105_v43  ;;  %v1148_v12 = vmin.f32 %v1134_v33, %v1147_v48  ;;  %v1149_v51 = vmax.f32 %v1134_v33, %v1147_v48  ;;  %v1155_v22 = vmin.f32 %v1146_v54, %v1140_v7 }
 0x12d   : > { %v1029_v36 = vmax.f32 %v1026_v50, %v1022_v5  ;;  %v1031_v11 = vmin.f32 %v1019_v47, %v1025_v30  ;;  %v1032_v46 = vmax.f32 %v1019_v47, %v1025_v30  ;;  %v1154_v31 = vmax.f32 %v1144_v10, %v1138_v40 }
 0x12e   : > { %v3134_v38 = vmax.f32 %v1028_v19, %v1024_v1  ;;  %v1150_v28 = vmin.f32 %v1136_v0, %v1149_v51  ;;  %v1157_v6 = vmin.f32 %v1148_v12, %v1142_v24  ;;  %v1161_v44 = vmin.f32 %v1153_v8, %v1155_v22 }
 0x12f   : > { %v1033_v16 = vmin.f32 %v1021_v37, %v1032_v46  ;;  %v1034_v32 = vmax.f32 %v1021_v37, %v1032_v46  ;;  %v1037_v15 = vmin.f32 %v1031_v11, %v1027_v2  ;;  %v1156_v60 = vmax.f32 %v1146_v54, %v1140_v7  ;;  %v1907_v54 = vld [vmem:[%s2578_s1 + $0x11] sm:$0x3f] }
 0x130   : > { %v1159_v45 = vmin.f32 %v1150_v28, %v1916_v20  ;;  %v1160_v43 = vmax.f32 %v1150_v28, %v1916_v20  ;;  %v1162_v3 = vmax.f32 %v1153_v8, %v1155_v22  ;;  %v1163_v33 = vmin.f32 %v1161_v44, %v1157_v6 }
 0x131   : > { %v1035_v52 = vmin.f32 %v1023_v57, %v1034_v32  ;;  %v1039_v58 = vmin.f32 %v1033_v16, %v1029_v36  ;;  %v3137_v47 = vmin.f32 %v3000_v13, %v1284_v55  ;;  %v1286_v40 = vmax.f32 %v3000_v13, %v1284_v55 }
 0x132   : > { %v1158_v10 = vmax.f32 %v1148_v12, %v1142_v24  ;;  %v1164_v0 = vmax.f32 %v1161_v44, %v1157_v6  ;;  %v1166_v62 = vmin.f32 %v1154_v31, %v1160_v43  ;;  %v1167_v63 = vmax.f32 %v1154_v31, %v1160_v43 }
 0x133   : > { %v1041_v5 = vmin.f32 %v1035_v52, %v3134_v38  ;;  %v1043_v50 = vmin.f32 %v1037_v15, %v1039_v58  ;;  %v3142_v7 = vmax.f32 %v1274_v61, %v3037_v59  ;;  %v1278_v37 = vmin.f32 %v1276_v35, %v3043_v21 }
 0x134   : > { %v1165_v48 = vmax.f32 %v1163_v33, %v1159_v45  ;;  %v1168_v8 = vmin.f32 %v1156_v60, %v1167_v63  ;;  %v1169_v1 = vmax.f32 %v1156_v60, %v1167_v63  ;;  %v1172_v30 = vmin.f32 %v1166_v62, %v1162_v3  ;;  %v1908_v60 = vld [vmem:[%s2578_s1 + $0x12] sm:$0x3f] }
 0x135   : > { %v1038_v19 = vmax.f32 %v1031_v11, %v1027_v2  ;;  %v1045_v57 = vmin.f32 %v1043_v50, %v1041_v5  ;;  %v3147_v13 = vmin.f32 %v3007_v4, %v1286_v40  ;;  %v1288_v55 = vmax.f32 %v3007_v4, %v1286_v40 }
 0x136   : > { %v1040_v24 = vmax.f32 %v1033_v16, %v1029_v36  ;;  %v1170_v12 = vmin.f32 %v1158_v10, %v1169_v1  ;;  %v1174_v51 = vmin.f32 %v1168_v8, %v1164_v0  ;;  %v3151_v59 = vmax.f32 %v1276_v35, %v3043_v21  ;;  %v1917_v21 = vld [vmem:[%s2578_s1 + $0x29] sm:$0x3f] }
 0x137   : > { %v1044_v61 = vmax.f32 %v1037_v15, %v1039_v58  ;;  %v1047_v22 = vmax.f32 %v1045_v57, %v1907_v54  ;;  %v3156_v46 = vmax.f32 %v1278_v37, %v1264_v25  ;;  %v1290_v2 = vmax.f32 %v3018_v34, %v1288_v55 }
 0x138   : > { %v1042_v11 = vmax.f32 %v1035_v52, %v3134_v38  ;;  %v1173_v20 = vmax.f32 %v1166_v62, %v1162_v3  ;;  %v1176_v4 = vmin.f32 %v1170_v12, %v1165_v48  ;;  %v1178_v36 = vmin.f32 %v1172_v30, %v1174_v51 }
 0x139   : > { %v1046_v31 = vmax.f32 %v1043_v50, %v1041_v5  ;;  %v1048_v28 = vmin.f32 %v1038_v19, %v1047_v22  ;;  %v1049_v6 = vmax.f32 %v1038_v19, %v1047_v22  ;;  %v3163_v35 = vmax.f32 %v3097_v14, %v3085_v23 }
 0x13a   : > { %v1175_v44 = vmax.f32 %v1168_v8, %v1164_v0  ;;  %v1180_v29 = vmin.f32 %v1178_v36, %v1176_v4  ;;  %v1292_v18 = vmax.f32 %v3034_v56, %v1290_v2  ;;  %v3168_v25 = vmin.f32 %v3118_v49, %v3090_v27 }
 0x13b   : > { %v1050_v38 = vmin.f32 %v1040_v24, %v1049_v6  ;;  %v1051_v16 = vmax.f32 %v1040_v24, %v1049_v6  ;;  %v1054_v32 = vmin.f32 %v1048_v28, %v1044_v61  ;;  %v1289_v15 = vmin.f32 %v3018_v34, %v1288_v55  ;;  %v1909_v6 = vld [vmem:[%s2585_s21 + $0x10] sm:$0x3f] }
 0x13c   : > { %v1177_v45 = vmax.f32 %v1170_v12, %v1165_v48  ;;  %v1179_v43 = vmax.f32 %v1172_v30, %v1174_v51  ;;  %v1182_v3 = vmax.f32 %v1180_v29, %v1917_v21  ;;  %v3174_v23 = vmax.f32 %v3118_v49, %v3090_v27  ;;  %v1918_v30 = vld [vmem:[%s2578_s1 + $0x2a] sm:$0x3f] }
 0x13d   : > { %v1052_v14 = vmin.f32 %v1042_v11, %v1051_v16  ;;  %v1055_v33 = vmax.f32 %v1048_v28, %v1044_v61  ;;  %v1056_v52 = vmin.f32 %v1050_v38, %v1046_v31  ;;  %v1181_v58 = vmax.f32 %v1178_v36, %v1176_v4 }
 0x13e   : > { %v1057_v40 = vmax.f32 %v1050_v38, %v1046_v31  ;;  %v1183_v10 = vmin.f32 %v1173_v20, %v1182_v3  ;;  %v1184_v0 = vmax.f32 %v1173_v20, %v1182_v3  ;;  %v1294_v62 = vmax.f32 %v3039_v26, %v1292_v18 }
 0x13f   : > { %v1058_v63 = vmin.f32 %v1052_v14, %v1908_v60  ;;  %v1059_v34 = vmax.f32 %v1052_v14, %v1908_v60  ;;  %v1060_v5 = vmin.f32 %v1054_v32, %v1056_v52  ;;  %v1061_v50 = vmax.f32 %v1054_v32, %v1056_v52 }
 0x140   : > { %v1185_v37 = vmin.f32 %v1175_v44, %v1184_v0  ;;  %v1186_v54 = vmax.f32 %v1175_v44, %v1184_v0  ;;  %v1189_v48 = vmin.f32 %v1183_v10, %v1179_v43  ;;  %v1291_v27 = vmin.f32 %v3034_v56, %v1290_v2 }
 0x141   : > { %v1062_v49 = vmax.f32 %v1060_v5, %v1058_v63  ;;  %v1063_v8 = vmin.f32 %v1055_v33, %v1059_v34  ;;  %v1064_v1 = vmax.f32 %v1055_v33, %v1059_v34  ;;  %v1300_v19 = vmin.f32 %v3137_v47, %v3112_v42 }
 0x142   : > { %v1187_v57 = vmin.f32 %v1177_v45, %v1186_v54  ;;  %v1190_v55 = vmax.f32 %v1183_v10, %v1179_v43  ;;  %v1191_v24 = vmin.f32 %v1185_v37, %v1181_v58  ;;  %v3183_v12 = vmax.f32 %v3137_v47, %v3112_v42 }
 0x143   : > { %v1065_v51 = vmin.f32 %v1057_v40, %v1064_v1  ;;  %v1067_v61 = vmin.f32 %v1063_v8, %v1061_v50  ;;  %v1192_v22 = vmax.f32 %v1185_v37, %v1181_v58  ;;  %v3398_v56 = vmax.f32 %v3011_v9, %v3014_v41 }
 0x144   : > { %v1193_v11 = vmin.f32 %v1187_v57, %v1918_v30  ;;  %v1194_v20 = vmax.f32 %v1187_v57, %v1918_v30  ;;  %v1195_v4 = vmin.f32 %v1189_v48, %v1191_v24  ;;  %v1196_v36 = vmax.f32 %v1189_v48, %v1191_v24 }
 0x145   : > { %v3188_v2 = vmin.f32 %v3398_v56, %v1294_v62  ;;  %v1069_v31 = vmin.f32 %v1065_v51, %v1062_v49  ;;  %v3191_v28 = vmin.f32 %v3039_v26, %v1292_v18  ;;  %v1302_v42 = vmin.f32 %v3147_v13, %v3115_v17  ;;  %v1910_v62 = vld [vmem:[%s2585_s21 + $0x11] sm:$0x3f] }
 0x146   : > { %v3197_v47 = vmax.f32 %v3147_v13, %v3115_v17  ;;  %v1197_v21 = vmax.f32 %v1195_v4, %v1193_v11  ;;  %v1198_v9 = vmin.f32 %v1190_v55, %v1194_v20  ;;  %v1199_v41 = vmax.f32 %v1190_v55, %v1194_v20  ;;  %v1911_v4 = vld [vmem:[%s2585_s21 + $0x12] sm:$0x3f] }
 0x147   : > { %v1304_v44 = vmin.f32 %v1289_v15, %v3127_v39  ;;  %v1068_v29 = vmax.f32 %v1063_v8, %v1061_v50  ;;  %v1071_v38 = vmin.f32 %v1067_v61, %v1069_v31  ;;  %v1311_v16 = vmax.f32 %v3188_v2, %v3156_v46 }
 0x148   : > { %v1312_v26 = vmin.f32 %v3124_v53, %v3168_v25  ;;  %v1200_v18 = vmin.f32 %v1192_v22, %v1199_v41  ;;  %v1203_v32 = vmin.f32 %v1198_v9, %v1196_v36  ;;  %v3206_v17 = vmax.f32 %v1289_v15, %v3127_v39  ;;  %v1919_v15 = vld [vmem:[%s2585_s21 + $0x28] sm:$0x3f] }
 0x149   : > { %v3209_v13 = vmin.f32 %v1291_v27, %v3142_v7  ;;  %v1070_v60 = vmax.f32 %v1065_v51, %v1062_v49  ;;  %v1072_v45 = vmax.f32 %v1067_v61, %v1069_v31  ;;  %v1073_v43 = vmax.f32 %v1071_v38, %v1909_v6 }
 0x14a   : > { %v1314_v3 = vmin.f32 %v1312_v26, %v1300_v19  ;;  %v1205_v14 = vmin.f32 %v1200_v18, %v1197_v21  ;;  %v3212_v33 = vmax.f32 %v1291_v27, %v3142_v7  ;;  %v3216_v52 = vmin.f32 %v3191_v28, %v3151_v59 }
 0x14b   : > { %v1326_v58 = vmax.f32 %v3163_v35, %v1311_v16  ;;  %v1074_v40 = vmin.f32 %v1068_v29, %v1073_v43  ;;  %v1075_v39 = vmax.f32 %v1068_v29, %v1073_v43  ;;  %v1309_v10 = vmax.f32 %v3191_v28, %v3151_v59 }
 0x14c   : > { %v1316_v0 = vmin.f32 %v1314_v3, %v1302_v42  ;;  %v1204_v63 = vmax.f32 %v1198_v9, %v1196_v36  ;;  %v1207_v34 = vmin.f32 %v1203_v32, %v1205_v14  ;;  %v1310_v7 = vmin.f32 %v3188_v2, %v3156_v46  ;;  %v1920_v2 = vld [vmem:[%s2585_s21 + $0x29] sm:$0x3f] }
 0x14d   : > { %v1328_v5 = vmax.f32 %v3174_v23, %v1326_v58  ;;  %v1076_v50 = vmin.f32 %v1070_v60, %v1075_v39  ;;  %v1078_v37 = vmin.f32 %v1074_v40, %v1072_v45  ;;  %v1079_v54 = vmax.f32 %v1074_v40, %v1072_v45 }
 0x14e   : > { %v1318_v48 = vmin.f32 %v1316_v0, %v1304_v44  ;;  %v1206_v27 = vmax.f32 %v1200_v18, %v1197_v21  ;;  %v1208_v49 = vmax.f32 %v1203_v32, %v1205_v14  ;;  %v1209_v8 = vmax.f32 %v1207_v34, %v1919_v15 }
 0x14f   : > { %v1330_v59 = vmax.f32 %v3183_v12, %v1328_v5  ;;  %v1080_v1 = vmin.f32 %v1076_v50, %v1910_v62  ;;  %v1081_v30 = vmax.f32 %v1076_v50, %v1910_v62  ;;  %v1313_v57 = vmax.f32 %v3124_v53, %v3168_v25 }
 0x150   : > { %v1320_v46 = vmin.f32 %v1318_v48, %v3209_v13  ;;  %v1210_v55 = vmin.f32 %v1204_v63, %v1209_v8  ;;  %v1211_v24 = vmax.f32 %v1204_v63, %v1209_v8  ;;  %v1315_v51 = vmax.f32 %v1312_v26, %v1300_v19 }
 0x151   : > { %v1332_v61 = vmax.f32 %v3197_v47, %v1330_v59  ;;  %v1082_v22 = vmax.f32 %v1078_v37, %v1080_v1  ;;  %v1083_v56 = vmin.f32 %v1079_v54, %v1081_v30  ;;  %v1325_v20 = vmin.f32 %v3163_v35, %v1311_v16 }
 0x152   : > { %v1322_v11 = vmin.f32 %v1320_v46, %v3216_v52  ;;  %v1212_v36 = vmin.f32 %v1206_v27, %v1211_v24  ;;  %v1214_v31 = vmin.f32 %v1210_v55, %v1208_v49  ;;  %v1215_v28 = vmax.f32 %v1210_v55, %v1208_v49 }
 0x153   : > { %v1327_v53 = vmin.f32 %v3174_v23, %v1326_v58  ;;  %v1085_v25 = vmin.f32 %v1083_v56, %v1082_v22  ;;  %v1086_v6 = vmax.f32 %v1083_v56, %v1082_v22  ;;  %v1317_v21 = vmax.f32 %v1314_v3, %v1302_v42  ;;  %v1921_v42 = vld [vmem:[%s2585_s21 + $0x2a] sm:$0x3f] }
 0x154   : > { %v1334_v19 = vmax.f32 %v3206_v17, %v1332_v61  ;;  %v1216_v9 = vmin.f32 %v1212_v36, %v1920_v2  ;;  %v1217_v41 = vmax.f32 %v1212_v36, %v1920_v2  ;;  %v1319_v29 = vmax.f32 %v1316_v0, %v1304_v44 }
 0x155   : > { %v1329_v38 = vmin.f32 %v3183_v12, %v1328_v5  ;;  %v1087_v26 = vmax.f32 %v1085_v25, %v1911_v4  ;;  %v1324_v35 = vmax.f32 %v1322_v11, %v1310_v7  ;;  %v1331_v16 = vmin.f32 %v3197_v47, %v1330_v59 }
 0x156   : > { %v1336_v18 = vmax.f32 %v3212_v33, %v1334_v19  ;;  %v1218_v32 = vmax.f32 %v1214_v31, %v1216_v9  ;;  %v1219_v23 = vmin.f32 %v1215_v28, %v1217_v41  ;;  %v1338_v60 = vmin.f32 %v1325_v20, %v1313_v57 }
 0x157   : > { %v1340_v45 = vmin.f32 %v1327_v53, %v1315_v51  ;;  %v1088_v43 = vmin.f32 %v1086_v6, %v1087_v26  ;;  %v1321_v3 = vmax.f32 %v1318_v48, %v3209_v13  ;;  %v1333_v14 = vmin.f32 %v3206_v17, %v1332_v61 }
 0x158   : > { %v1337_v44 = vmin.f32 %v1309_v10, %v1336_v18  ;;  %v1221_v58 = vmin.f32 %v1219_v23, %v1218_v32  ;;  %v1222_v12 = vmax.f32 %v1219_v23, %v1218_v32  ;;  %v1342_v40 = vmin.f32 %v1329_v38, %v1317_v21 }
 0x159   : > { %1912 = vst [vmem:[%s2993_s24 + $0x10] sm:$0x3f] %v1088_v43  ;;  %v1323_v39 = vmax.f32 %v1320_v46, %v3216_v52  ;;  %v1335_v47 = vmin.f32 %v3212_v33, %v1334_v19  ;;  %v1339_v15 = vmax.f32 %v1325_v20, %v1313_v57  ;;  %v1344_v62 = vmin.f32 %v1331_v16, %v1319_v29 }
 0x15a   : > { %v1223_v0 = vmax.f32 %v1221_v58, %v1921_v42  ;;  %v1351_v63 = vmax.f32 %v1337_v44, %v1324_v35  ;;  %v1352_v34 = vmin.f32 %v1338_v60, %v1340_v45  ;;  %v1341_v7 = vmax.f32 %v1327_v53, %v1315_v51 }
 0x15b   : > { %v1346_v5 = vmin.f32 %v1333_v14, %v1321_v3  ;;  %v1353_v50 = vmax.f32 %v1338_v60, %v1340_v45  ;;  %v1343_v37 = vmax.f32 %v1329_v38, %v1317_v21  ;;  %v1348_v27 = vmin.f32 %v1335_v47, %v1323_v39 }
 0x15c   : > { %v1224_v13 = vmin.f32 %v1222_v12, %v1223_v0  ;;  %v1354_v17 = vmin.f32 %v1352_v34, %v1342_v40  ;;  %v1363_v10 = vmin.f32 %v1339_v15, %v1351_v63  ;;  %v1355_v54 = vmax.f32 %v1352_v34, %v1342_v40 }
 0x15d   : > { %v1364_v48 = vmax.f32 %v1339_v15, %v1351_v63  ;;  %v1345_v49 = vmax.f32 %v1331_v16, %v1319_v29  ;;  %v1347_v1 = vmax.f32 %v1333_v14, %v1321_v3  ;;  %v1350_v30 = vmin.f32 %v1337_v44, %v1324_v35 }
 0x15e   : > { %1922 = vst [vmem:[%s2993_s24 + $0x18] sm:$0x3f] %v1224_v13  ;;  %v1356_v52 = vmin.f32 %v1354_v17, %v1344_v62  ;;  %v1357_v8 = vmax.f32 %v1354_v17, %v1344_v62  ;;  %v1374_v46 = vmin.f32 %v1363_v10, %v1353_v50  ;;  %v1349_v56 = vmax.f32 %v1335_v47, %v1323_v39  ;;  %v1941_v17 = vld [vmem:[%s2570_s5 + $0x20] sm:$0x3f] }
 0x15f   : > { %v1365_v33 = vmin.f32 %v1341_v7, %v1364_v48  ;;  %v1366_v59 = vmax.f32 %v1341_v7, %v1364_v48  ;;  %v1375_v19 = vmax.f32 %v1363_v10, %v1353_v50  ;;  %v1951_v10 = vld [vmem:[%s2570_s5 + $0x38] sm:$0x3f] }
 0x160   : > { %v1358_v57 = vmin.f32 %v1356_v52, %v1346_v5  ;;  %v1359_v55 = vmax.f32 %v1356_v52, %v1346_v5 }
 0x161   : > { %v1367_v24 = vmin.f32 %v1343_v37, %v1366_v59  ;;  %v1368_v51 = vmax.f32 %v1343_v37, %v1366_v59  ;;  %v1376_v61 = vmin.f32 %v1365_v33, %v1355_v54  ;;  %v1377_v9 = vmax.f32 %v1365_v33, %v1355_v54 }
 0x162   : > { %v1360_v22 = vmin.f32 %v1358_v57, %v1348_v27  ;;  %v1361_v4 = vmax.f32 %v1358_v57, %v1348_v27 }
 0x163   : > { %v1369_v2 = vmin.f32 %v1345_v49, %v1368_v51  ;;  %v1370_v11 = vmax.f32 %v1345_v49, %v1368_v51  ;;  %v1378_v20 = vmin.f32 %v1367_v24, %v1357_v8  ;;  %v1386_v36 = vmin.f32 %v1374_v46, %v1376_v61 }
 0x164   : > { %v1362_v31 = vmax.f32 %v1360_v22, %v1350_v30  ;;  %v1387_v26 = vmax.f32 %v1374_v46, %v1376_v61  ;;  %v1379_v35 = vmax.f32 %v1367_v24, %v1357_v8 }
 0x165   : > { %v1371_v28 = vmin.f32 %v1347_v1, %v1370_v11  ;;  %v1372_v53 = vmax.f32 %v1347_v1, %v1370_v11  ;;  %v1380_v25 = vmin.f32 %v1369_v2, %v1359_v55  ;;  %v1388_v6 = vmin.f32 %v1386_v36, %v1378_v20 }
 0x166   : > { %v1389_v16 = vmax.f32 %v1386_v36, %v1378_v20  ;;  %v1381_v23 = vmax.f32 %v1369_v2, %v1359_v55 }
 0x167   : > { %v1373_v21 = vmin.f32 %v1349_v56, %v1372_v53  ;;  %v1382_v41 = vmin.f32 %v1371_v28, %v1361_v4  ;;  %v1390_v38 = vmin.f32 %v1388_v6, %v1380_v25  ;;  %v1391_v60 = vmax.f32 %v1388_v6, %v1380_v25 }
 0x168   : > { %v1383_v14 = vmax.f32 %v1371_v28, %v1361_v4 }
 0x169   : > { %v1385_v29 = vmax.f32 %v1373_v21, %v1362_v31  ;;  %v1384_v45 = vmin.f32 %v1373_v21, %v1362_v31  ;;  %v1392_v43 = vmin.f32 %v1390_v38, %v1382_v41  ;;  %v1393_v58 = vmax.f32 %v1390_v38, %v1382_v41 }
 0x16b   : > { %v1395_v18 = vmin.f32 %v1375_v19, %v1385_v29  ;;  %v1396_v32 = vmax.f32 %v1375_v19, %v1385_v29  ;;  %v1394_v47 = vmax.f32 %v1392_v43, %v1384_v45  ;;  %v1942_v29 = vld [vmem:[%s2570_s5 + $0x21] sm:$0x3f] }
 0x16d   : > { %v1397_v42 = vmin.f32 %v1377_v9, %v1396_v32  ;;  %v1398_v3 = vmax.f32 %v1377_v9, %v1396_v32  ;;  %v1405_v44 = vmin.f32 %v1395_v18, %v1387_v26  ;;  %v1406_v37 = vmax.f32 %v1395_v18, %v1387_v26 }
 0x16f   : > { %v1399_v12 = vmin.f32 %v1379_v35, %v1398_v3  ;;  %v1400_v40 = vmax.f32 %v1379_v35, %v1398_v3  ;;  %v1407_v39 = vmin.f32 %v1397_v42, %v1389_v16  ;;  %v1408_v48 = vmax.f32 %v1397_v42, %v1389_v16 }
 0x171   : > { %v1401_v15 = vmin.f32 %v1381_v23, %v1400_v40  ;;  %v1402_v0 = vmax.f32 %v1381_v23, %v1400_v40  ;;  %v1409_v62 = vmin.f32 %v1399_v12, %v1391_v60  ;;  %v1415_v63 = vmin.f32 %v1405_v44, %v1407_v39 }
 0x172   : > { %v1410_v49 = vmax.f32 %v1399_v12, %v1391_v60  ;;  %v1416_v8 = vmax.f32 %v1405_v44, %v1407_v39  ;;  %v1952_v60 = vld [vmem:[%s2570_s5 + $0x39] sm:$0x3f] }
 0x173   : > { %v1403_v34 = vmin.f32 %v1383_v14, %v1402_v0  ;;  %v1411_v7 = vmin.f32 %v1401_v15, %v1393_v58  ;;  %v1417_v5 = vmin.f32 %v1415_v63, %v1409_v62  ;;  %v1418_v33 = vmax.f32 %v1415_v63, %v1409_v62 }
 0x174   : > { %v1412_v57 = vmax.f32 %v1401_v15, %v1393_v58 }
 0x175   : > { %v1413_v13 = vmin.f32 %v1403_v34, %v1394_v47  ;;  %v1419_v50 = vmin.f32 %v1417_v5, %v1411_v7  ;;  %v1414_v55 = vmax.f32 %v1403_v34, %v1394_v47  ;;  %v1420_v24 = vmax.f32 %v1417_v5, %v1411_v7 }
 0x177   : > { %v1421_v54 = vmin.f32 %v1419_v50, %v1413_v13  ;;  %v3249_v22 = vmax.f32 %v1419_v50, %v1413_v13 }
 0x179   : > { %v1423_v27 = vmax.f32 %v1421_v54, %v1941_v17  ;;  %v1557_v52 = vmax.f32 %v1421_v54, %v1951_v10 }
 0x17b   : > { %v1424_v59 = vmin.f32 %v1406_v37, %v1423_v27  ;;  %v1425_v1 = vmax.f32 %v1406_v37, %v1423_v27  ;;  %v1559_v30 = vmax.f32 %v1406_v37, %v1557_v52  ;;  %v1558_v46 = vmin.f32 %v1406_v37, %v1557_v52 }
 0x17d   : > { %v1426_v51 = vmin.f32 %v1408_v48, %v1425_v1  ;;  %v1427_v61 = vmax.f32 %v1408_v48, %v1425_v1  ;;  %v1434_v56 = vmin.f32 %v1424_v59, %v1416_v8  ;;  %v1560_v2 = vmin.f32 %v1408_v48, %v1559_v30 }
 0x17e   : > { %v1561_v11 = vmax.f32 %v1408_v48, %v1559_v30  ;;  %v1435_v36 = vmax.f32 %v1424_v59, %v1416_v8  ;;  %v1568_v25 = vmin.f32 %v1558_v46, %v1416_v8  ;;  %v1569_v6 = vmax.f32 %v1558_v46, %v1416_v8 }
 0x17f   : > { %v1428_v20 = vmin.f32 %v1410_v49, %v1427_v61  ;;  %v1429_v4 = vmax.f32 %v1410_v49, %v1427_v61  ;;  %v1436_v31 = vmin.f32 %v1426_v51, %v1418_v33  ;;  %v1437_v28 = vmax.f32 %v1426_v51, %v1418_v33 }
 0x180   : > { %v1563_v53 = vmax.f32 %v1410_v49, %v1561_v11  ;;  %v1562_v41 = vmin.f32 %v1410_v49, %v1561_v11  ;;  %v1570_v16 = vmin.f32 %v1560_v2, %v1418_v33  ;;  %v1571_v45 = vmax.f32 %v1560_v2, %v1418_v33 }
 0x181   : > { %v1430_v21 = vmin.f32 %v1412_v57, %v1429_v4  ;;  %v1431_v19 = vmax.f32 %v1412_v57, %v1429_v4  ;;  %v1438_v9 = vmin.f32 %v1428_v20, %v1420_v24  ;;  %v1444_v38 = vmin.f32 %v1434_v56, %v1436_v31 }
 0x182   : > { %v1564_v26 = vmin.f32 %v1412_v57, %v1563_v53  ;;  %v1565_v35 = vmax.f32 %v1412_v57, %v1563_v53  ;;  %v1439_v32 = vmax.f32 %v1428_v20, %v1420_v24  ;;  %v1445_v42 = vmax.f32 %v1434_v56, %v1436_v31 }
 0x183   : > { %v1432_v18 = vmin.f32 %v1414_v55, %v1431_v19  ;;  %v1440_v23 = vmin.f32 %v1430_v21, %v3249_v22  ;;  %v1441_v43 = vmax.f32 %v1430_v21, %v3249_v22  ;;  %v1446_v3 = vmin.f32 %v1444_v38, %v1438_v9 }
 0x184   : > { %v1566_v14 = vmin.f32 %v1414_v55, %v1565_v35  ;;  %v1447_v12 = vmax.f32 %v1444_v38, %v1438_v9  ;;  %v1572_v40 = vmin.f32 %v1562_v41, %v1420_v24  ;;  %v1573_v47 = vmax.f32 %v1562_v41, %v1420_v24 }
 0x185   : > { %v1442_v44 = vmin.f32 %v1432_v18, %v1942_v29  ;;  %v1443_v58 = vmax.f32 %v1432_v18, %v1942_v29  ;;  %v1448_v39 = vmin.f32 %v1446_v3, %v1440_v23  ;;  %v1574_v15 = vmin.f32 %v1564_v26, %v3249_v22  ;;  %v1953_v18 = vld [vmem:[%s2570_s5 + $0x3a] sm:$0x3f] }
 0x186   : > { %v1577_v0 = vmax.f32 %v1566_v14, %v1952_v60  ;;  %v1575_v34 = vmax.f32 %v1564_v26, %v3249_v22  ;;  %v1578_v7 = vmin.f32 %v1568_v25, %v1570_v16  ;;  %v1449_v5 = vmax.f32 %v1446_v3, %v1440_v23 }
 0x187   : > { %v1451_v62 = vmin.f32 %v1435_v36, %v1443_v58  ;;  %v1452_v63 = vmax.f32 %v1435_v36, %v1443_v58  ;;  %v1576_v13 = vmin.f32 %v1566_v14, %v1952_v60  ;;  %v1579_v50 = vmax.f32 %v1568_v25, %v1570_v16  ;;  %v1943_v36 = vld [vmem:[%s2570_s5 + $0x22] sm:$0x3f]  ;;  %s2179_s5 = scalar_lea.vmem %s3287_s11, 768 }
 0x188   : > { %v1586_v17 = vmax.f32 %v1569_v6, %v1577_v0  ;;  %v1450_v10 = vmax.f32 %v1448_v39, %v1442_v44  ;;  %v1580_v27 = vmin.f32 %v1578_v7, %v1572_v40  ;;  %v1581_v52 = vmax.f32 %v1578_v7, %v1572_v40  ;;  %p2180_p8 = scmp.ne.s32.totalorder %s3287_s11, %s2179_s5  ;;  %p2187_p4 = scmp.lt.s32.totalorder %s2185_s15, %s2179_s5 }
 0x189   : > { %v1453_v37 = vmin.f32 %v1437_v28, %v1452_v63  ;;  %v1454_v54 = vmax.f32 %v1437_v28, %v1452_v63  ;;  %v1459_v48 = vmin.f32 %v1451_v62, %v1445_v42  ;;  %v1585_v49 = vmin.f32 %v1569_v6, %v1577_v0  ;;  %v1944_v0 = vld [vmem:[%s2578_s1 + $0x20] sm:$0x3f] }
 0x18a   : > { %v1588_v8 = vmax.f32 %v1571_v45, %v1586_v17  ;;  %v1587_v30 = vmin.f32 %v1571_v45, %v1586_v17  ;;  %v1582_v57 = vmin.f32 %v1580_v27, %v1574_v15  ;;  %v1583_v46 = vmax.f32 %v1580_v27, %v1574_v15  ;;  %p2181_p2 = pnand %p2180_p8, %p2500_p12  ;;  %p2188_p5 = por %p2187_p4, %p2186_p13 }
 0x18b   : > { %v1455_v33 = vmin.f32 %v1439_v32, %v1454_v54  ;;  %v1456_v59 = vmax.f32 %v1439_v32, %v1454_v54  ;;  %v1461_v1 = vmin.f32 %v1453_v37, %v1447_v12  ;;  %v1593_v11 = vmin.f32 %v1585_v49, %v1579_v50 }
 0x18c   : > { %v1589_v55 = vmin.f32 %v1573_v47, %v1588_v8  ;;  %v1590_v24 = vmax.f32 %v1573_v47, %v1588_v8  ;;  %v3257_v56 = vmax.f32 %v1582_v57, %v1576_v13  ;;  %v1595_v31 = vmin.f32 %v1587_v30, %v1581_v52  ;;  %p2182_p11 = pneg %p2181_p2 }
 0x18d   : > { %v1457_v51 = vmin.f32 %v1441_v43, %v1456_v59  ;;  %v1463_v61 = vmin.f32 %v1455_v33, %v1449_v5  ;;  %v1467_v22 = vmin.f32 %v1459_v48, %v1461_v1  ;;  %v1460_v53 = vmax.f32 %v1451_v62, %v1445_v42 }
 0x18e   : > { %v3259_v2 = vmin.f32 %v1575_v34, %v1590_v24  ;;  %v1597_v28 = vmin.f32 %v1589_v55, %v1583_v46  ;;  %v1601_v21 = vmin.f32 %v1593_v11, %v1595_v31  ;;  %v1462_v19 = vmax.f32 %v1453_v37, %v1447_v12  ;;  %v1954_v24 = vld [vmem:[%s2578_s1 + $0x38] sm:$0x3f]  ;;  %p2189_p1 = pnand %p2188_p5, %p2182_p11 }
 0x18f   : > { %v1465_v20 = vmin.f32 %v1457_v51, %v1450_v10  ;;  %v1469_v4 = vmin.f32 %v1467_v22, %v1463_v61  ;;  %v1468_v9 = vmax.f32 %v1459_v48, %v1461_v1  ;;  %v1464_v38 = vmax.f32 %v1455_v33, %v1449_v5 }
 0x190   : > { %v1599_v6 = vmin.f32 %v3259_v2, %v3257_v56  ;;  %v1603_v29 = vmin.f32 %v1601_v21, %v1597_v28  ;;  %v1470_v26 = vmax.f32 %v1467_v22, %v1463_v61  ;;  %v1466_v32 = vmax.f32 %v1457_v51, %v1450_v10 }
 0x191   : > { %v1471_v25 = vmin.f32 %v1469_v4, %v1465_v20  ;;  %v1594_v23 = vmax.f32 %v1585_v49, %v1579_v50  ;;  %v1472_v45 = vmax.f32 %v1469_v4, %v1465_v20  ;;  %v1596_v14 = vmax.f32 %v1587_v30, %v1581_v52 }
 0x192   : > { %v1605_v60 = vmin.f32 %v1603_v29, %v1599_v6  ;;  %v1598_v44 = vmax.f32 %v1589_v55, %v1583_v46  ;;  %v1602_v58 = vmax.f32 %v1593_v11, %v1595_v31  ;;  %v1600_v15 = vmax.f32 %v3259_v2, %v3257_v56 }
 0x193   : > { %v1473_v41 = vmax.f32 %v1471_v25, %v1943_v36  ;;  %v1604_v62 = vmax.f32 %v1601_v21, %v1597_v28  ;;  %v1606_v63 = vmax.f32 %v1603_v29, %v1599_v6 }
 0x194   : > { %v1607_v12 = vmax.f32 %v1605_v60, %v1953_v18 }
 0x195   : > { %v1474_v35 = vmin.f32 %v1460_v53, %v1473_v41  ;;  %v1475_v16 = vmax.f32 %v1460_v53, %v1473_v41 }
 0x196   : > { %v1608_v34 = vmin.f32 %v1594_v23, %v1607_v12  ;;  %v1609_v7 = vmax.f32 %v1594_v23, %v1607_v12 }
 0x197   : > { %v1476_v43 = vmin.f32 %v1462_v19, %v1475_v16  ;;  %v1477_v42 = vmax.f32 %v1462_v19, %v1475_v16  ;;  %v1482_v3 = vmin.f32 %v1474_v35, %v1468_v9  ;;  %v1483_v13 = vmax.f32 %v1474_v35, %v1468_v9  ;;  %v1945_v35 = vld [vmem:[%s2578_s1 + $0x21] sm:$0x3f] }
 0x198   : > { %v1610_v37 = vmin.f32 %v1596_v14, %v1609_v7  ;;  %v1611_v54 = vmax.f32 %v1596_v14, %v1609_v7  ;;  %v1617_v48 = vmin.f32 %v1608_v34, %v1602_v58  ;;  %v1618_v51 = vmax.f32 %v1608_v34, %v1602_v58 }
 0x199   : > { %v1478_v40 = vmin.f32 %v1464_v38, %v1477_v42  ;;  %v1479_v39 = vmax.f32 %v1464_v38, %v1477_v42  ;;  %v1484_v47 = vmin.f32 %v1476_v43, %v1470_v26  ;;  %v1485_v10 = vmax.f32 %v1476_v43, %v1470_v26 }
 0x19a   : > { %v1612_v59 = vmin.f32 %v1598_v44, %v1611_v54  ;;  %v1613_v1 = vmax.f32 %v1598_v44, %v1611_v54  ;;  %v1619_v30 = vmin.f32 %v1610_v37, %v1604_v62  ;;  %v1620_v36 = vmax.f32 %v1610_v37, %v1604_v62 }
 0x19b   : > { %v1480_v5 = vmin.f32 %v1466_v32, %v1479_v39  ;;  %v1486_v50 = vmin.f32 %v1478_v40, %v1472_v45  ;;  %v1490_v17 = vmin.f32 %v1482_v3, %v1484_v47  ;;  %v1491_v49 = vmax.f32 %v1482_v3, %v1484_v47 }
 0x19c   : > { %v1487_v33 = vmax.f32 %v1478_v40, %v1472_v45  ;;  %v1614_v22 = vmin.f32 %v1600_v15, %v1613_v1  ;;  %v1621_v56 = vmin.f32 %v1612_v59, %v1606_v63  ;;  %v1625_v2 = vmin.f32 %v1617_v48, %v1619_v30 }
 0x19d   : > { %v1488_v27 = vmin.f32 %v1480_v5, %v1944_v0  ;;  %v1489_v52 = vmax.f32 %v1480_v5, %v1944_v0  ;;  %v1492_v8 = vmin.f32 %v1490_v17, %v1486_v50  ;;  %v1493_v57 = vmax.f32 %v1490_v17, %v1486_v50  ;;  %v1955_v0 = vld [vmem:[%s2578_s1 + $0x39] sm:$0x3f] }
 0x19e   : > { %v1623_v31 = vmin.f32 %v1614_v22, %v1954_v24  ;;  %v1624_v28 = vmax.f32 %v1614_v22, %v1954_v24  ;;  %v1626_v53 = vmax.f32 %v1617_v48, %v1619_v30  ;;  %v1627_v25 = vmin.f32 %v1625_v2, %v1621_v56 }
 0x19f   : > { %v1495_v46 = vmin.f32 %v1483_v13, %v1489_v52  ;;  %v1496_v55 = vmax.f32 %v1483_v13, %v1489_v52  ;;  %v1494_v61 = vmax.f32 %v1492_v8, %v1488_v27  ;;  %v1622_v19 = vmax.f32 %v1612_v59, %v1606_v63  ;;  %v1946_v13 = vld [vmem:[%s2578_s1 + $0x22] sm:$0x3f] }
 0x1a0   : > { %v1628_v9 = vmax.f32 %v1625_v2, %v1621_v56  ;;  %v1630_v41 = vmin.f32 %v1618_v51, %v1624_v28  ;;  %v1631_v29 = vmax.f32 %v1618_v51, %v1624_v28  ;;  %v1629_v16 = vmax.f32 %v1627_v25, %v1623_v31  ;;  %v1956_v56 = vld [vmem:[%s2578_s1 + $0x3a] sm:$0x3f] }
 0x1a1   : > { %v1497_v11 = vmin.f32 %v1485_v10, %v1496_v55  ;;  %v1498_v20 = vmax.f32 %v1485_v10, %v1496_v55  ;;  %v1501_v4 = vmin.f32 %v1495_v46, %v1491_v49  ;;  %v1502_v60 = vmax.f32 %v1495_v46, %v1491_v49 }
 0x1a2   : > { %v1632_v18 = vmin.f32 %v1620_v36, %v1631_v29  ;;  %v1633_v32 = vmax.f32 %v1620_v36, %v1631_v29  ;;  %v1636_v23 = vmin.f32 %v1630_v41, %v1626_v53  ;;  %v1637_v62 = vmax.f32 %v1630_v41, %v1626_v53 }
 0x1a3   : > { %v1499_v6 = vmin.f32 %v1487_v33, %v1498_v20  ;;  %v1503_v21 = vmin.f32 %v1497_v11, %v1493_v57  ;;  %v1504_v3 = vmax.f32 %v1497_v11, %v1493_v57 }
 0x1a4   : > { %v1634_v43 = vmin.f32 %v1622_v19, %v1633_v32  ;;  %v1638_v42 = vmin.f32 %v1632_v18, %v1628_v9  ;;  %v1639_v50 = vmax.f32 %v1632_v18, %v1628_v9  ;;  %v1947_v19 = vld [vmem:[%s2585_s21 + $0x20] sm:$0x3f] }
 0x1a5   : > { %v1505_v38 = vmin.f32 %v1499_v6, %v1494_v61  ;;  %v1507_v26 = vmin.f32 %v1501_v4, %v1503_v21  ;;  %v1508_v14 = vmax.f32 %v1501_v4, %v1503_v21  ;;  %v1506_v40 = vmax.f32 %v1499_v6, %v1494_v61 }
 0x1a6   : > { %v1640_v58 = vmin.f32 %v1634_v43, %v1629_v16  ;;  %v1642_v12 = vmin.f32 %v1636_v23, %v1638_v42  ;;  %v1643_v17 = vmax.f32 %v1636_v23, %v1638_v42  ;;  %v1641_v27 = vmax.f32 %v1634_v43, %v1629_v16  ;;  %v1957_v42 = vld [vmem:[%s2585_s21 + $0x38] sm:$0x3f] }
 0x1a7   : > { %v1509_v45 = vmin.f32 %v1507_v26, %v1505_v38  ;;  %v1510_v39 = vmax.f32 %v1507_v26, %v1505_v38 }
 0x1a8   : > { %v1644_v63 = vmin.f32 %v1642_v12, %v1640_v58  ;;  %v1645_v49 = vmax.f32 %v1642_v12, %v1640_v58 }
 0x1a9   : > { %v1511_v44 = vmax.f32 %v1509_v45, %v1945_v35 }
 0x1aa   : > { %v1646_v10 = vmax.f32 %v1644_v63, %v1955_v0 }
 0x1ab   : > { %v1512_v47 = vmin.f32 %v1502_v60, %v1511_v44  ;;  %v1513_v15 = vmax.f32 %v1502_v60, %v1511_v44 }
 0x1ac   : > { %v1647_v8 = vmin.f32 %v1637_v62, %v1646_v10  ;;  %v1648_v33 = vmax.f32 %v1637_v62, %v1646_v10 }
 0x1ad   : > { %v1514_v34 = vmin.f32 %v1504_v3, %v1513_v15  ;;  %v1515_v7 = vmax.f32 %v1504_v3, %v1513_v15  ;;  %v1518_v5 = vmin.f32 %v1512_v47, %v1508_v14  ;;  %v1519_v54 = vmax.f32 %v1512_v47, %v1508_v14  ;;  %v1948_v3 = vld [vmem:[%s2585_s21 + $0x21] sm:$0x3f] }
 0x1ae   : > { %v1649_v46 = vmin.f32 %v1639_v50, %v1648_v33  ;;  %v1650_v55 = vmax.f32 %v1639_v50, %v1648_v33  ;;  %v1653_v24 = vmin.f32 %v1647_v8, %v1643_v17  ;;  %v1654_v11 = vmax.f32 %v1647_v8, %v1643_v17  ;;  %v1949_v50 = vld [vmem:[%s2585_s21 + $0x22] sm:$0x3f] }
 0x1af   : > { %v1516_v37 = vmin.f32 %v1506_v40, %v1515_v7  ;;  %v1520_v48 = vmin.f32 %v1514_v34, %v1510_v39  ;;  %v1521_v52 = vmax.f32 %v1514_v34, %v1510_v39 }
 0x1b0   : > { %v1651_v2 = vmin.f32 %v1641_v27, %v1650_v55  ;;  %v1655_v20 = vmin.f32 %v1649_v46, %v1645_v49  ;;  %v1656_v31 = vmax.f32 %v1649_v46, %v1645_v49 }
 0x1b1   : > { %v1522_v59 = vmin.f32 %v1516_v37, %v1946_v13  ;;  %v1523_v1 = vmax.f32 %v1516_v37, %v1946_v13  ;;  %v1524_v30 = vmin.f32 %v1518_v5, %v1520_v48  ;;  %v1525_v57 = vmax.f32 %v1518_v5, %v1520_v48  ;;  %v1958_v13 = vld [vmem:[%s2585_s21 + $0x39] sm:$0x3f] }
 0x1b2   : > { %v1657_v28 = vmin.f32 %v1651_v2, %v1956_v56  ;;  %v1658_v53 = vmax.f32 %v1651_v2, %v1956_v56  ;;  %v1659_v25 = vmin.f32 %v1653_v24, %v1655_v20  ;;  %v1660_v6 = vmax.f32 %v1653_v24, %v1655_v20 }
 0x1b3   : > { %v1526_v51 = vmax.f32 %v1524_v30, %v1522_v59  ;;  %v1527_v61 = vmin.f32 %v1519_v54, %v1523_v1  ;;  %v1528_v22 = vmax.f32 %v1519_v54, %v1523_v1  ;;  %v1959_v1 = vld [vmem:[%s2585_s21 + $0x3a] sm:$0x3f] }
 0x1b4   : > { %v1661_v9 = vmax.f32 %v1659_v25, %v1657_v28  ;;  %v1662_v41 = vmin.f32 %v1654_v11, %v1658_v53  ;;  %v1663_v29 = vmax.f32 %v1654_v11, %v1658_v53 }
 0x1b5   : > { %v1529_v4 = vmin.f32 %v1521_v52, %v1528_v22  ;;  %v1531_v36 = vmin.f32 %v1527_v61, %v1525_v57  ;;  %v1532_v38 = vmax.f32 %v1527_v61, %v1525_v57 }
 0x1b6   : > { %v1664_v35 = vmin.f32 %v1656_v31, %v1663_v29  ;;  %v1667_v16 = vmin.f32 %v1662_v41, %v1660_v6  ;;  %v1668_v14 = vmax.f32 %v1662_v41, %v1660_v6 }
 0x1b7   : > { %v1533_v21 = vmin.f32 %v1529_v4, %v1526_v51  ;;  %v1534_v18 = vmax.f32 %v1529_v4, %v1526_v51 }
 0x1b8   : > { %v1669_v60 = vmin.f32 %v1664_v35, %v1661_v9  ;;  %v1670_v39 = vmax.f32 %v1664_v35, %v1661_v9 }
 0x1b9   : > { %v1535_v26 = vmin.f32 %v1531_v36, %v1533_v21  ;;  %v1536_v32 = vmax.f32 %v1531_v36, %v1533_v21 }
 0x1ba   : > { %v1671_v44 = vmin.f32 %v1667_v16, %v1669_v60  ;;  %v1672_v47 = vmax.f32 %v1667_v16, %v1669_v60 }
 0x1bb   : > { %v1537_v23 = vmax.f32 %v1535_v26, %v1947_v19 }
 0x1bc   : > { %v1673_v15 = vmax.f32 %v1671_v44, %v1957_v42 }
 0x1bd   : > { %v1538_v45 = vmin.f32 %v1532_v38, %v1537_v23  ;;  %v1539_v43 = vmax.f32 %v1532_v38, %v1537_v23 }
 0x1be   : > { %v1674_v63 = vmin.f32 %v1668_v14, %v1673_v15  ;;  %v1675_v34 = vmax.f32 %v1668_v14, %v1673_v15 }
 0x1bf   : > { %v1540_v58 = vmin.f32 %v1534_v18, %v1539_v43  ;;  %v1542_v12 = vmin.f32 %v1538_v45, %v1536_v32  ;;  %v1543_v40 = vmax.f32 %v1538_v45, %v1536_v32 }
 0x1c0   : > { %v1676_v17 = vmin.f32 %v1670_v39, %v1675_v34  ;;  %v1678_v10 = vmin.f32 %v1674_v63, %v1672_v47  ;;  %v1679_v37 = vmax.f32 %v1674_v63, %v1672_v47 }
 0x1c1   : > { %v1544_v0 = vmin.f32 %v1540_v58, %v1948_v3  ;;  %v1545_v62 = vmax.f32 %v1540_v58, %v1948_v3 }
 0x1c2   : > { %v1680_v27 = vmin.f32 %v1676_v17, %v1958_v13  ;;  %v1681_v52 = vmax.f32 %v1676_v17, %v1958_v13 }
 0x1c3   : > { %v1546_v7 = vmax.f32 %v1542_v12, %v1544_v0  ;;  %v1547_v5 = vmin.f32 %v1543_v40, %v1545_v62 }
 0x1c4   : > { %v1682_v8 = vmax.f32 %v1678_v10, %v1680_v27  ;;  %v1683_v33 = vmin.f32 %v1679_v37, %v1681_v52 }
 0x1c5   : > { %v1549_v54 = vmin.f32 %v1547_v5, %v1546_v7  ;;  %v1550_v48 = vmax.f32 %v1547_v5, %v1546_v7 }
 0x1c6   : > { %v1685_v30 = vmin.f32 %v1683_v33, %v1682_v8  ;;  %v1686_v57 = vmax.f32 %v1683_v33, %v1682_v8 }
 0x1c7   : > { %v1551_v49 = vmax.f32 %v1549_v54, %v1949_v50 }
 0x1c8   : > { %v1687_v46 = vmax.f32 %v1685_v30, %v1959_v1 }
 0x1c9   : > { %v1552_v59 = vmin.f32 %v1550_v48, %v1551_v49 }
 0x1ca   : > { %v1688_v55 = vmin.f32 %v1686_v57, %v1687_v46 }
 0x1cb   : > { %1950 = vst [vmem:[%s2993_s24 + $0x20] sm:$0x3f] %v1552_v59 }
 0x1cc   : > { %1960 = vst [vmem:[%s2993_s24 + $0x28] sm:$0x3f] %v1688_v55 }
 0x1cd   : > { %2192 = shalt.err (!%p2189_p1)
}
 0x1ce   : > { %s2193_s25 = scalar_lea.hbm %s3285_s30, 768  ;;  %s2197_s12 = scalar_lea.hbm %s3400_s29, 4608 }
 0x1cf   : > { %p2194_p9 = scmp.ne.s32.totalorder %s3285_s30, %s2193_s25  ;;  %p2198_p6 = scmp.lt.s32.totalorder %s3285_s30, %s3400_s29 }
 0x1d0   : > { %p2199_p3 = scmp.lt.s32.totalorder %s2197_s12, %s2193_s25 }
 0x1d1   : > { %p2195_p0 = pnand %p2194_p9, %p2500_p12 }
 0x1d2   : > { %p2200_p7 = por %p2199_p3, %p2198_p6 }
 0x1d3   : > { %p2196_p10 = pneg %p2195_p0 }
 0x1d5   : > { %p2201_p8 = pnand %p2200_p7, %p2196_p10 }
 0x1d7   : > { %2204 = shalt.err (!%p2201_p8)
}
 0x1d8   : > { %s2323_s24 = smov 128   ;;  %s2324_s6 = smov 8  }
 0x1d9   : > { %1975 = dma.vmem_to_hbm [thread:$0]  (%p2500_p12), %s3287_s11, 768, %s3285_s30, %s1692_s28, %s2323_s24, %s2323_s24, %s2324_s6  }
 0x1da PF: > { %p1992_p2 = scmp.ge.s32.totalorder %s2315_s23, 2  ;;  %s1721_s10 = sand.u32 1, %s2295_s18  }
 0x1db   : > { %p3401_p11 = scmp.ne.s32.totalorder %s3386_s7, 0  ;;  %s1722_s26 = scalar_lea.sflag [#allocation4], %s1721_s10 }
 0x1dd   : > { %p1988_p13 = pnand %p1992_p2, %p3401_p11 }
 0x1df   : > { %p1989_p4 = pneg %p1988_p13 }
 0x1e1   : > { %2266 = dma.done.wait (%p1989_p4), %s1722_s26, 768  }
 0x1e2   : > { %2268 = vsyncadd (%p1989_p4), %s1722_s26, 4294966528  ;;  %s22_s23 = sadd.s32 1, %s2315_s23   ;;  %s3402_s8 = sld [smem:[#allocation17_spill]] }
 0x1e3   : > { %p19_p5 = scmp.ge.s32.totalorder %s22_s23, 8   ;;  %s3403_s20 = sld [smem:[#allocation13_spill]] }
 0x1e4   : > { %s3404_s11 = sld [smem:[#allocation18_spill]]  ;;  %s3407_s12 = smov %s2275_s13 }
 0x1e5   : > { %s3405_s21 = sld [smem:[#allocation15_spill]]  ;;  %s3408_s13 = smov %s2279_s14 }
 0x1e6   : > { %s3406_s22 = sld [smem:[#allocation16_spill]]  ;;  %s3409_s14 = smov %s2530_s3 }
 0x1e7   : > { %s3410_s15 = smov %s2287_s16  ;;  %s3411_s16 = smov %s2291_s17 }
 0x1e8   : > { %s3412_s17 = smov %s3402_s8  ;;  %s3413_s18 = smov %s2299_s19 }
 0x1e9   : > { %s3414_s19 = smov %s3403_s20  ;;  %21 = sbr.rel (!%p19_p5) target bundleno = 15 (0xf), region = 127 }
 0x1ea   : > { %s3415_s20 = smov %s3404_s11 }
 0x1ee   :  { %1727 = vsyncpa [#allocation3], 1 }
 0x1ef   :  { %1729 = vsyncpa [#allocation3 + $0x1], 1 }
 0x1f0   :  { %1730 = vsyncpa [#allocation6], 1 }
 0x1f1   :  { %1732 = vsyncpa [#allocation6 + $0x1], 1 }
 0x1f2   :  { %1733 = vsyncpa [#allocation4], 1 }
 0x1f3   :  { %1735 = vsyncpa [#allocation4 + $0x1], 1 }

</bundles_post_ra>
